<compile_context>
chip_gen: v7x
topology: tpu7x:2x2x1
jax: 0.10.0
libtpu: 0.0.40
codegen_flags: <defaults>
</compile_context>

<pallas_src>
import functools

import jax
import jax.numpy as jnp
from jax.experimental import pallas as pl
from jax.experimental.pallas import tpu as pltpu

F32 = jnp.float32
LN_EPS = 1e-5  # torch.nn.LayerNorm default


# ----------------------------- in-kernel helpers ----------------------------

def _layernorm(x, gamma, beta):
    mean = jnp.mean(x, axis=-1, keepdims=True)
    c = x - mean
    var = jnp.mean(c * c, axis=-1, keepdims=True)
    return c * jax.lax.rsqrt(var + LN_EPS) * gamma + beta


# ----------------------------- Pallas kernels -------------------------------

def _attn_block_kernel(scale, num_heads, has_mask, *refs):
    """One batch element per grid step: full DetrAttention + residual + LN."""
    if has_mask:
        (h_ref, qpos_ref, kv_ref, kvpos_ref, mask_ref,
         wq_ref, bq_ref, wk_ref, bk_ref, wv_ref, bv_ref, wo_ref, bo_ref,
         g_ref, bln_ref, o_ref) = refs
    else:
        (h_ref, qpos_ref, kv_ref, kvpos_ref,
         wq_ref, bq_ref, wk_ref, bk_ref, wv_ref, bv_ref, wo_ref, bo_ref,
         g_ref, bln_ref, o_ref) = refs
        mask_ref = None

    h = h_ref[0]                      # (T, D)  original hidden states (residual)
    x_q = h + qpos_ref[0]             # queries/keys source gets query pos embed
    kv = kv_ref[0]                    # (S, D)  original kv source (values use this)
    x_kv = kv + kvpos_ref[0]          # keys source gets kv pos embed

    # Fused Q/K/V projections (three MXU matmuls in one kernel body).
    q = jnp.dot(x_q, wq_ref[...], preferred_element_type=jnp.float32) + bq_ref[...]
    k = jnp.dot(x_kv, wk_ref[...], preferred_element_type=jnp.float32) + bk_ref[...]
    v = jnp.dot(kv, wv_ref[...], preferred_element_type=jnp.float32) + bv_ref[...]

    t, d = q.shape
    hd = d // num_heads
    mask = mask_ref[0] if mask_ref is not None else None   # (1, S) additive

    head_outs = []
    for head in range(num_heads):                           # static loop, all heads per step
        lo = head * hd
        qh = q[:, lo:lo + hd]                                # (T, hd)
        kh = k[:, lo:lo + hd]                                # (S, hd)
        vh = v[:, lo:lo + hd]                                # (S, hd)
        scores = jax.lax.dot_general(qh, kh, (((1,), (1,)), ((), ())),
                                     preferred_element_type=jnp.float32) * scale
        if mask is not None:
            scores = scores + mask                           # broadcast over T
        scores = scores - jnp.max(scores, axis=-1, keepdims=True)
        p = jnp.exp(scores)
        p = p * pl.reciprocal(jnp.sum(p, axis=-1, keepdims=True), approx=True)
        head_outs.append(jnp.dot(p, vh, preferred_element_type=jnp.float32))
    attn = jnp.concatenate(head_outs, axis=-1)               # (T, D) lane-dense

    # Output projection + residual + LayerNorm (fused epilogue).
    out = jnp.dot(attn, wo_ref[...], preferred_element_type=jnp.float32) + bo_ref[...]
    o_ref[0] = _layernorm(out + h, g_ref[...], bln_ref[...]).astype(o_ref.dtype)


def _ffn_block_kernel(x_ref, w1_ref, b1_ref, w2_ref, b2_ref,
                      g1_ref, bln1_ref, g2_ref, bln2_ref, o_ref):
    """fc1 -> SiLU -> fc2 -> +residual -> final LN -> decoder-level LN."""
    x = x_ref[0]                                             # (T, D)
    h = jnp.dot(x, w1_ref[...], preferred_element_type=jnp.float32) + b1_ref[...]
    h = h * jax.nn.sigmoid(h)                                # SiLU
    h = jnp.dot(h, w2_ref[...], preferred_element_type=jnp.float32) + b2_ref[...]
    h = h + x                                                # residual
    y = _layernorm(h, g1_ref[...], bln1_ref[...])            # final_layer_norm
    # DetrDecoder.layernorm applied after every layer (as in the reference loop)
    o_ref[0] = _layernorm(y, g2_ref[...], bln2_ref[...]).astype(o_ref.dtype)


# ----------------------------- kernel wrappers -------------------------------

def _replicated(shape):
    # Full-array block, same block for every grid step (weights / biases).
    return pl.BlockSpec(shape, lambda i: (0,) * len(shape))


def attention_block(ap, h, q_pos, kv, kv_pos, mask, ln_g, ln_b, num_heads):
    """Fused DetrAttention + residual + LayerNorm.

    h:      (B, T, D)  query source (also the residual)
    q_pos:  (B, T, D)  position embeddings added to the query/key source
    kv:     (B, S, D)  key/value source (values use this without pos)
    kv_pos: (B, S, D)  position embeddings added to the key source
    mask:   (B, 1, S) additive mask or None
    """
    b, t, d = h.shape
    s = kv.shape[1]
    hd = d // num_heads
    scale = float(hd) ** -0.5

    spec_t = pl.BlockSpec((1, t, d), lambda i: (i, 0, 0))
    spec_s = pl.BlockSpec((1, s, d), lambda i: (i, 0, 0))
    w_spec = _replicated((d, d))
    b_spec = _replicated((1, d))

    in_specs = [spec_t, spec_t, spec_s, spec_s]
    args = [h, q_pos, kv, kv_pos]
    if mask is not None:
        in_specs.append(pl.BlockSpec((1, 1, s), lambda i: (i, 0, 0)))
        args.append(mask)
    in_specs += [w_spec, b_spec, w_spec, b_spec, w_spec, b_spec, w_spec, b_spec,
                 b_spec, b_spec]
    args += [ap["wq"], ap["bq"], ap["wk"], ap["bk"], ap["wv"], ap["bv"],
             ap["wo"], ap["bo"], ln_g, ln_b]

    return pl.pallas_call(
        functools.partial(_attn_block_kernel, scale, num_heads, mask is not None),
        out_shape=jax.ShapeDtypeStruct((b, t, d), F32),
        grid=(b,),
        in_specs=in_specs,
        out_specs=spec_t,
        compiler_params=pltpu.CompilerParams(dimension_semantics=("parallel",)),
    )(*args)


def ffn_block(x, w1, b1, w2, b2, g1, bln1, g2, bln2):
    """Fused fc1 -> SiLU -> fc2 -> +residual -> final LN -> decoder LN."""
    b, t, d = x.shape
    f = w1.shape[1]
    spec_t = pl.BlockSpec((1, t, d), lambda i: (i, 0, 0))
    return pl.pallas_call(
        _ffn_block_kernel,
        out_shape=jax.ShapeDtypeStruct((b, t, d), F32),
        grid=(b,),
        in_specs=[spec_t,
                  _replicated((d, f)), _replicated((1, f)),
                  _replicated((f, d)), _replicated((1, d)),
                  _replicated((1, d)), _replicated((1, d)),
                  _replicated((1, d)), _replicated((1, d))],
        out_specs=spec_t,
        compiler_params=pltpu.CompilerParams(dimension_semantics=("parallel",)),
    )(x, w1, b1, w2, b2, g1, bln1, g2, bln2)


# ----------------------------- model glue (JAX) ------------------------------

def decoder_layer(p, dec_ln_g, dec_ln_b, h, query_pos, enc_h, enc_mask_add,
                  obj_q, num_heads):
    # self-attention: queries/keys get query_pos, values use raw h; no mask
    h = attention_block(p["self_attn"], h, query_pos, h, query_pos, None,
                        p["sa_ln_g"], p["sa_ln_b"], num_heads)
    # cross-attention: queries get query_pos, keys get encoder object_queries
    if enc_h is not None:
        h = attention_block(p["cross_attn"], h, query_pos, enc_h, obj_q,
                            enc_mask_add, p["ca_ln_g"], p["ca_ln_b"], num_heads)
    # FFN + final LN + decoder-level LN (fused epilogue)
    h = ffn_block(h, p["w1"], p["b1"], p["w2"], p["b2"],
                  p["final_ln_g"], p["final_ln_b"], dec_ln_g, dec_ln_b)
    return h


def detr_decoder(params, inputs_embeds, encoder_hidden_states,
                 encoder_attention_mask, object_queries,
                 query_position_embeddings, num_heads):
    h = inputs_embeds

    enc_mask_add = None
    if encoder_hidden_states is not None and encoder_attention_mask is not None:
        # _expand_mask semantics, but stored compactly as (B, 1, S);
        # broadcast over T and heads happens inside the kernel (no HBM dup).
        inv = 1.0 - encoder_attention_mask.astype(F32)
        add = jnp.where(inv != 0.0, jnp.finfo(F32).min, inv)
        enc_mask_add = add[:, None, :]                       # (B, 1, S)

    for lp in params["layers"]:
        h = decoder_layer(lp, params["ln_g"], params["ln_b"], h,
                          query_position_embeddings, encoder_hidden_states,
                          enc_mask_add, object_queries, num_heads)
    return h


# ----------------------------- deterministic params --------------------------

def _init_linear(key, din, dout, scale=0.05):
    kw, kb = jax.random.split(key)
    w = jax.random.normal(kw, (din, dout), F32) * scale
    b = jax.random.normal(kb, (1, dout), F32) * scale
    return w, b


def _init_attention(key, d):
    ks = jax.random.split(key, 4)
    p = {}
    for name, kk in zip(("q", "k", "v", "o"), ks):
        w, b = _init_linear(kk, d, d)
        p["w" + name] = w
        p["b" + name] = b
    return p


def init_decoder_params(key, num_layers, d, ffn_dim):
    layers = []
    keys = jax.random.split(key, num_layers)
    for lk in keys:
        k_sa, k_ca, k_fc1, k_fc2 = jax.random.split(lk, 4)
        w1, b1 = _init_linear(k_fc1, d, ffn_dim)
        w2, b2 = _init_linear(k_fc2, ffn_dim, d)
        layers.append({
            "self_attn": _init_attention(k_sa, d),
            "sa_ln_g": jnp.ones((1, d), F32), "sa_ln_b": jnp.zeros((1, d), F32),
            "cross_attn": _init_attention(k_ca, d),
            "ca_ln_g": jnp.ones((1, d), F32), "ca_ln_b": jnp.zeros((1, d), F32),
            "w1": w1, "b1": b1, "w2": w2, "b2": b2,
            "final_ln_g": jnp.ones((1, d), F32), "final_ln_b": jnp.zeros((1, d), F32),
        })
    return {"layers": layers,
            "ln_g": jnp.ones((1, d), F32), "ln_b": jnp.zeros((1, d), F32)}


# ----------------------------- demo -------------------------------------------

if __name__ == "__main__":
    B, T, S = 2, 8, 16           # batch, num object queries, encoder sequence length
    D, H, FFN, L = 64, 4, 32, 2  # d_model, heads, decoder_ffn_dim, decoder_layers

    key = jax.random.PRNGKey(0)
    k_in, k_enc, k_oq, k_qp, k_par = jax.random.split(key, 5)

    inputs_embeds = jax.random.normal(k_in, (B, T, D), F32)
    encoder_hidden_states = jax.random.normal(k_enc, (B, S, D), F32)
    object_queries = jax.random.normal(k_oq, (B, S, D), F32)             # encoder spatial pos
    query_position_embeddings = jax.random.normal(k_qp, (B, T, D), F32)  # decoder query pos
    # last 4 encoder positions are padding
    encoder_attention_mask = jnp.concatenate(
        [jnp.ones((B, S - 4), F32), jnp.zeros((B, 4), F32)], axis=1)

    params = init_decoder_params(k_par, L, D, FFN)

    run = jax.jit(functools.partial(detr_decoder, num_heads=H))
    out = run(params, inputs_embeds, encoder_hidden_states,
              encoder_attention_mask, object_queries, query_position_embeddings)
    out = jax.block_until_ready(out)

    assert out.shape == (B, T, D), out.shape
    assert bool(jnp.all(jnp.isfinite(out)))
    print("KERNEL_OK")
</pallas_src>

<mosaic_0001>
module attributes {stable_mosaic.version = 11 : i64} {
  func.func @_attn_block_kernel(%arg0: i32, %arg1: memref<1x8x64xf32, #tpu.memory_space<vmem>>, %arg2: memref<1x8x64xf32, #tpu.memory_space<vmem>>, %arg3: memref<1x8x64xf32, #tpu.memory_space<vmem>>, %arg4: memref<1x8x64xf32, #tpu.memory_space<vmem>>, %arg5: memref<64x64xf32, #tpu.memory_space<vmem>>, %arg6: memref<1x64xf32, #tpu.memory_space<vmem>>, %arg7: memref<64x64xf32, #tpu.memory_space<vmem>>, %arg8: memref<1x64xf32, #tpu.memory_space<vmem>>, %arg9: memref<64x64xf32, #tpu.memory_space<vmem>>, %arg10: memref<1x64xf32, #tpu.memory_space<vmem>>, %arg11: memref<64x64xf32, #tpu.memory_space<vmem>>, %arg12: memref<1x64xf32, #tpu.memory_space<vmem>>, %arg13: memref<1x64xf32, #tpu.memory_space<vmem>>, %arg14: memref<1x64xf32, #tpu.memory_space<vmem>>, %arg15: memref<1x8x64xf32, #tpu.memory_space<vmem>>) attributes {dimension_semantics = [#tpu.dimension_semantics<parallel>], iteration_bounds = array<i64: 2>, scalar_prefetch = 0 : i64, scratch_operands = 0 : i64, tpu.core_type = #tpu.core_type<tc>, window_params = [{transform_indices = @transform_0, window_bounds = array<i64: 1, 8, 64>}, {transform_indices = @transform_1, window_bounds = array<i64: 1, 8, 64>}, {transform_indices = @transform_2, window_bounds = array<i64: 1, 8, 64>}, {transform_indices = @transform_3, window_bounds = array<i64: 1, 8, 64>}, {pipeline_mode = #tpu.pipeline_mode<synchronous>, transform_indices = @transform_4, window_bounds = array<i64: 64, 64>}, {pipeline_mode = #tpu.pipeline_mode<synchronous>, transform_indices = @transform_5, window_bounds = array<i64: 1, 64>}, {pipeline_mode = #tpu.pipeline_mode<synchronous>, transform_indices = @transform_6, window_bounds = array<i64: 64, 64>}, {pipeline_mode = #tpu.pipeline_mode<synchronous>, transform_indices = @transform_7, window_bounds = array<i64: 1, 64>}, {pipeline_mode = #tpu.pipeline_mode<synchronous>, transform_indices = @transform_8, window_bounds = array<i64: 64, 64>}, {pipeline_mode = #tpu.pipeline_mode<synchronous>, transform_indices = @transform_9, window_bounds = array<i64: 1, 64>}, {pipeline_mode = #tpu.pipeline_mode<synchronous>, transform_indices = @transform_10, window_bounds = array<i64: 64, 64>}, {pipeline_mode = #tpu.pipeline_mode<synchronous>, transform_indices = @transform_11, window_bounds = array<i64: 1, 64>}, {pipeline_mode = #tpu.pipeline_mode<synchronous>, transform_indices = @transform_12, window_bounds = array<i64: 1, 64>}, {pipeline_mode = #tpu.pipeline_mode<synchronous>, transform_indices = @transform_13, window_bounds = array<i64: 1, 64>}, {transform_indices = @transform_14, window_bounds = array<i64: 1, 8, 64>}]} {
    %c0 = arith.constant 0 : index
    %c0_0 = arith.constant 0 : index
    %c0_1 = arith.constant 0 : index
    %0 = vector.load %arg1[%c0, %c0_0, %c0_1] : memref<1x8x64xf32, #tpu.memory_space<vmem>>, vector<1x8x64xf32>
    %1 = vector.shape_cast %0 : vector<1x8x64xf32> to vector<8x64xf32>
    %c0_2 = arith.constant 0 : index
    %c0_3 = arith.constant 0 : index
    %c0_4 = arith.constant 0 : index
    %2 = vector.load %arg2[%c0_2, %c0_3, %c0_4] : memref<1x8x64xf32, #tpu.memory_space<vmem>>, vector<1x8x64xf32>
    %3 = vector.shape_cast %2 : vector<1x8x64xf32> to vector<8x64xf32>
    %4 = arith.addf %1, %3 : vector<8x64xf32>
    %c0_5 = arith.constant 0 : index
    %c0_6 = arith.constant 0 : index
    %c0_7 = arith.constant 0 : index
    %5 = vector.load %arg3[%c0_5, %c0_6, %c0_7] : memref<1x8x64xf32, #tpu.memory_space<vmem>>, vector<1x8x64xf32>
    %6 = vector.shape_cast %5 : vector<1x8x64xf32> to vector<8x64xf32>
    %c0_8 = arith.constant 0 : index
    %c0_9 = arith.constant 0 : index
    %c0_10 = arith.constant 0 : index
    %7 = vector.load %arg4[%c0_8, %c0_9, %c0_10] : memref<1x8x64xf32, #tpu.memory_space<vmem>>, vector<1x8x64xf32>
    %8 = vector.shape_cast %7 : vector<1x8x64xf32> to vector<8x64xf32>
    %9 = arith.addf %6, %8 : vector<8x64xf32>
    %c0_11 = arith.constant 0 : index
    %c0_12 = arith.constant 0 : index
    %10 = vector.load %arg5[%c0_11, %c0_12] : memref<64x64xf32, #tpu.memory_space<vmem>>, vector<64x64xf32>
    %cst = arith.constant dense<0.000000e+00> : vector<8x64xf32>
    %11 = tpu.matmul %4, %10, %cst {dimension_numbers = #tpu.dot_dimension_numbers<[1], [0], [0], [1], [0, 0, 1, 1], [], []>} : vector<8x64xf32>, vector<64x64xf32>, vector<8x64xf32> -> vector<8x64xf32>
    %c0_13 = arith.constant 0 : index
    %c0_14 = arith.constant 0 : index
    %12 = vector.load %arg6[%c0_13, %c0_14] : memref<1x64xf32, #tpu.memory_space<vmem>>, vector<1x64xf32>
    %13 = vector.broadcast %12 : vector<1x64xf32> to vector<8x64xf32>
    %14 = arith.addf %11, %13 : vector<8x64xf32>
    %c0_15 = arith.constant 0 : index
    %c0_16 = arith.constant 0 : index
    %15 = vector.load %arg7[%c0_15, %c0_16] : memref<64x64xf32, #tpu.memory_space<vmem>>, vector<64x64xf32>
    %cst_17 = arith.constant dense<0.000000e+00> : vector<8x64xf32>
    %16 = tpu.matmul %9, %15, %cst_17 {dimension_numbers = #tpu.dot_dimension_numbers<[1], [0], [0], [1], [0, 0, 1, 1], [], []>} : vector<8x64xf32>, vector<64x64xf32>, vector<8x64xf32> -> vector<8x64xf32>
    %c0_18 = arith.constant 0 : index
    %c0_19 = arith.constant 0 : index
    %17 = vector.load %arg8[%c0_18, %c0_19] : memref<1x64xf32, #tpu.memory_space<vmem>>, vector<1x64xf32>
    %18 = vector.broadcast %17 : vector<1x64xf32> to vector<8x64xf32>
    %19 = arith.addf %16, %18 : vector<8x64xf32>
    %c0_20 = arith.constant 0 : index
    %c0_21 = arith.constant 0 : index
    %20 = vector.load %arg9[%c0_20, %c0_21] : memref<64x64xf32, #tpu.memory_space<vmem>>, vector<64x64xf32>
    %cst_22 = arith.constant dense<0.000000e+00> : vector<8x64xf32>
    %21 = tpu.matmul %6, %20, %cst_22 {dimension_numbers = #tpu.dot_dimension_numbers<[1], [0], [0], [1], [0, 0, 1, 1], [], []>} : vector<8x64xf32>, vector<64x64xf32>, vector<8x64xf32> -> vector<8x64xf32>
    %c0_23 = arith.constant 0 : index
    %c0_24 = arith.constant 0 : index
    %22 = vector.load %arg10[%c0_23, %c0_24] : memref<1x64xf32, #tpu.memory_space<vmem>>, vector<1x64xf32>
    %23 = vector.broadcast %22 : vector<1x64xf32> to vector<8x64xf32>
    %24 = arith.addf %21, %23 : vector<8x64xf32>
    %25 = vector.extract_strided_slice %14 {offsets = [0, 0], sizes = [8, 16], strides = [1, 1]} : vector<8x64xf32> to vector<8x16xf32>
    %26 = vector.extract_strided_slice %19 {offsets = [0, 0], sizes = [8, 16], strides = [1, 1]} : vector<8x64xf32> to vector<8x16xf32>
    %27 = vector.extract_strided_slice %24 {offsets = [0, 0], sizes = [8, 16], strides = [1, 1]} : vector<8x64xf32> to vector<8x16xf32>
    %cst_25 = arith.constant dense<0.000000e+00> : vector<8x8xf32>
    %28 = tpu.matmul %25, %26, %cst_25 {dimension_numbers = #tpu.dot_dimension_numbers<[1], [1], [0], [0], [0, 0, 1, 0], [], []>} : vector<8x16xf32>, vector<8x16xf32>, vector<8x8xf32> -> vector<8x8xf32>
    %cst_26 = arith.constant 2.500000e-01 : f32
    %29 = vector.broadcast %cst_26 : f32 to vector<8x8xf32>
    %30 = arith.mulf %28, %29 : vector<8x8xf32>
    %cst_27 = arith.constant dense<0xFF800000> : vector<8xf32>
    %31 = vector.multi_reduction <maximumf>, %30, %cst_27 [1] : vector<8x8xf32> to vector<8xf32>
    %32 = vector.shape_cast %31 : vector<8xf32> to vector<8x1xf32>
    %33 = vector.broadcast %32 : vector<8x1xf32> to vector<8x8xf32>
    %34 = arith.subf %30, %33 : vector<8x8xf32>
    %35 = math.exp %34 : vector<8x8xf32>
    %cst_28 = arith.constant dense<0.000000e+00> : vector<8xf32>
    %36 = vector.multi_reduction <add>, %35, %cst_28 [1] : vector<8x8xf32> to vector<8xf32>
    %37 = vector.shape_cast %36 : vector<8xf32> to vector<8x1xf32>
    %38 = tpu.reciprocal %37 {approx = true} : vector<8x1xf32> -> vector<8x1xf32>
    %39 = vector.broadcast %38 : vector<8x1xf32> to vector<8x8xf32>
    %40 = arith.mulf %35, %39 : vector<8x8xf32>
    %cst_29 = arith.constant dense<0.000000e+00> : vector<8x16xf32>
    %41 = tpu.matmul %40, %27, %cst_29 {dimension_numbers = #tpu.dot_dimension_numbers<[1], [0], [0], [1], [0, 0, 1, 1], [], []>} : vector<8x8xf32>, vector<8x16xf32>, vector<8x16xf32> -> vector<8x16xf32>
    %42 = vector.extract_strided_slice %14 {offsets = [0, 16], sizes = [8, 16], strides = [1, 1]} : vector<8x64xf32> to vector<8x16xf32>
    %43 = vector.extract_strided_slice %19 {offsets = [0, 16], sizes = [8, 16], strides = [1, 1]} : vector<8x64xf32> to vector<8x16xf32>
    %44 = vector.extract_strided_slice %24 {offsets = [0, 16], sizes = [8, 16], strides = [1, 1]} : vector<8x64xf32> to vector<8x16xf32>
    %cst_30 = arith.constant dense<0.000000e+00> : vector<8x8xf32>
    %45 = tpu.matmul %42, %43, %cst_30 {dimension_numbers = #tpu.dot_dimension_numbers<[1], [1], [0], [0], [0, 0, 1, 0], [], []>} : vector<8x16xf32>, vector<8x16xf32>, vector<8x8xf32> -> vector<8x8xf32>
    %cst_31 = arith.constant 2.500000e-01 : f32
    %46 = vector.broadcast %cst_31 : f32 to vector<8x8xf32>
    %47 = arith.mulf %45, %46 : vector<8x8xf32>
    %cst_32 = arith.constant dense<0xFF800000> : vector<8xf32>
    %48 = vector.multi_reduction <maximumf>, %47, %cst_32 [1] : vector<8x8xf32> to vector<8xf32>
    %49 = vector.shape_cast %48 : vector<8xf32> to vector<8x1xf32>
    %50 = vector.broadcast %49 : vector<8x1xf32> to vector<8x8xf32>
    %51 = arith.subf %47, %50 : vector<8x8xf32>
    %52 = math.exp %51 : vector<8x8xf32>
    %cst_33 = arith.constant dense<0.000000e+00> : vector<8xf32>
    %53 = vector.multi_reduction <add>, %52, %cst_33 [1] : vector<8x8xf32> to vector<8xf32>
    %54 = vector.shape_cast %53 : vector<8xf32> to vector<8x1xf32>
    %55 = tpu.reciprocal %54 {approx = true} : vector<8x1xf32> -> vector<8x1xf32>
    %56 = vector.broadcast %55 : vector<8x1xf32> to vector<8x8xf32>
    %57 = arith.mulf %52, %56 : vector<8x8xf32>
    %cst_34 = arith.constant dense<0.000000e+00> : vector<8x16xf32>
    %58 = tpu.matmul %57, %44, %cst_34 {dimension_numbers = #tpu.dot_dimension_numbers<[1], [0], [0], [1], [0, 0, 1, 1], [], []>} : vector<8x8xf32>, vector<8x16xf32>, vector<8x16xf32> -> vector<8x16xf32>
    %59 = vector.extract_strided_slice %14 {offsets = [0, 32], sizes = [8, 16], strides = [1, 1]} : vector<8x64xf32> to vector<8x16xf32>
    %60 = vector.extract_strided_slice %19 {offsets = [0, 32], sizes = [8, 16], strides = [1, 1]} : vector<8x64xf32> to vector<8x16xf32>
    %61 = vector.extract_strided_slice %24 {offsets = [0, 32], sizes = [8, 16], strides = [1, 1]} : vector<8x64xf32> to vector<8x16xf32>
    %cst_35 = arith.constant dense<0.000000e+00> : vector<8x8xf32>
    %62 = tpu.matmul %59, %60, %cst_35 {dimension_numbers = #tpu.dot_dimension_numbers<[1], [1], [0], [0], [0, 0, 1, 0], [], []>} : vector<8x16xf32>, vector<8x16xf32>, vector<8x8xf32> -> vector<8x8xf32>
    %cst_36 = arith.constant 2.500000e-01 : f32
    %63 = vector.broadcast %cst_36 : f32 to vector<8x8xf32>
    %64 = arith.mulf %62, %63 : vector<8x8xf32>
    %cst_37 = arith.constant dense<0xFF800000> : vector<8xf32>
    %65 = vector.multi_reduction <maximumf>, %64, %cst_37 [1] : vector<8x8xf32> to vector<8xf32>
    %66 = vector.shape_cast %65 : vector<8xf32> to vector<8x1xf32>
    %67 = vector.broadcast %66 : vector<8x1xf32> to vector<8x8xf32>
    %68 = arith.subf %64, %67 : vector<8x8xf32>
    %69 = math.exp %68 : vector<8x8xf32>
    %cst_38 = arith.constant dense<0.000000e+00> : vector<8xf32>
    %70 = vector.multi_reduction <add>, %69, %cst_38 [1] : vector<8x8xf32> to vector<8xf32>
    %71 = vector.shape_cast %70 : vector<8xf32> to vector<8x1xf32>
    %72 = tpu.reciprocal %71 {approx = true} : vector<8x1xf32> -> vector<8x1xf32>
    %73 = vector.broadcast %72 : vector<8x1xf32> to vector<8x8xf32>
    %74 = arith.mulf %69, %73 : vector<8x8xf32>
    %cst_39 = arith.constant dense<0.000000e+00> : vector<8x16xf32>
    %75 = tpu.matmul %74, %61, %cst_39 {dimension_numbers = #tpu.dot_dimension_numbers<[1], [0], [0], [1], [0, 0, 1, 1], [], []>} : vector<8x8xf32>, vector<8x16xf32>, vector<8x16xf32> -> vector<8x16xf32>
    %76 = vector.extract_strided_slice %14 {offsets = [0, 48], sizes = [8, 16], strides = [1, 1]} : vector<8x64xf32> to vector<8x16xf32>
    %77 = vector.extract_strided_slice %19 {offsets = [0, 48], sizes = [8, 16], strides = [1, 1]} : vector<8x64xf32> to vector<8x16xf32>
    %78 = vector.extract_strided_slice %24 {offsets = [0, 48], sizes = [8, 16], strides = [1, 1]} : vector<8x64xf32> to vector<8x16xf32>
    %cst_40 = arith.constant dense<0.000000e+00> : vector<8x8xf32>
    %79 = tpu.matmul %76, %77, %cst_40 {dimension_numbers = #tpu.dot_dimension_numbers<[1], [1], [0], [0], [0, 0, 1, 0], [], []>} : vector<8x16xf32>, vector<8x16xf32>, vector<8x8xf32> -> vector<8x8xf32>
    %cst_41 = arith.constant 2.500000e-01 : f32
    %80 = vector.broadcast %cst_41 : f32 to vector<8x8xf32>
    %81 = arith.mulf %79, %80 : vector<8x8xf32>
    %cst_42 = arith.constant dense<0xFF800000> : vector<8xf32>
    %82 = vector.multi_reduction <maximumf>, %81, %cst_42 [1] : vector<8x8xf32> to vector<8xf32>
    %83 = vector.shape_cast %82 : vector<8xf32> to vector<8x1xf32>
    %84 = vector.broadcast %83 : vector<8x1xf32> to vector<8x8xf32>
    %85 = arith.subf %81, %84 : vector<8x8xf32>
    %86 = math.exp %85 : vector<8x8xf32>
    %cst_43 = arith.constant dense<0.000000e+00> : vector<8xf32>
    %87 = vector.multi_reduction <add>, %86, %cst_43 [1] : vector<8x8xf32> to vector<8xf32>
    %88 = vector.shape_cast %87 : vector<8xf32> to vector<8x1xf32>
    %89 = tpu.reciprocal %88 {approx = true} : vector<8x1xf32> -> vector<8x1xf32>
    %90 = vector.broadcast %89 : vector<8x1xf32> to vector<8x8xf32>
    %91 = arith.mulf %86, %90 : vector<8x8xf32>
    %cst_44 = arith.constant dense<0.000000e+00> : vector<8x16xf32>
    %92 = tpu.matmul %91, %78, %cst_44 {dimension_numbers = #tpu.dot_dimension_numbers<[1], [0], [0], [1], [0, 0, 1, 1], [], []>} : vector<8x8xf32>, vector<8x16xf32>, vector<8x16xf32> -> vector<8x16xf32>
    %93 = tpu.concatenate %41, %58, %75, %92 in 1 : vector<8x16xf32>, vector<8x16xf32>, vector<8x16xf32>, vector<8x16xf32> -> vector<8x64xf32>
    %c0_45 = arith.constant 0 : index
    %c0_46 = arith.constant 0 : index
    %94 = vector.load %arg11[%c0_45, %c0_46] : memref<64x64xf32, #tpu.memory_space<vmem>>, vector<64x64xf32>
    %cst_47 = arith.constant dense<0.000000e+00> : vector<8x64xf32>
    %95 = tpu.matmul %93, %94, %cst_47 {dimension_numbers = #tpu.dot_dimension_numbers<[1], [0], [0], [1], [0, 0, 1, 1], [], []>} : vector<8x64xf32>, vector<64x64xf32>, vector<8x64xf32> -> vector<8x64xf32>
    %c0_48 = arith.constant 0 : index
    %c0_49 = arith.constant 0 : index
    %96 = vector.load %arg12[%c0_48, %c0_49] : memref<1x64xf32, #tpu.memory_space<vmem>>, vector<1x64xf32>
    %97 = vector.broadcast %96 : vector<1x64xf32> to vector<8x64xf32>
    %98 = arith.addf %95, %97 : vector<8x64xf32>
    %99 = arith.addf %98, %1 : vector<8x64xf32>
    %c0_50 = arith.constant 0 : index
    %c0_51 = arith.constant 0 : index
    %100 = vector.load %arg13[%c0_50, %c0_51] : memref<1x64xf32, #tpu.memory_space<vmem>>, vector<1x64xf32>
    %c0_52 = arith.constant 0 : index
    %c0_53 = arith.constant 0 : index
    %101 = vector.load %arg14[%c0_52, %c0_53] : memref<1x64xf32, #tpu.memory_space<vmem>>, vector<1x64xf32>
    %cst_54 = arith.constant dense<0.000000e+00> : vector<8xf32>
    %102 = vector.multi_reduction <add>, %99, %cst_54 [1] : vector<8x64xf32> to vector<8xf32>
    %103 = vector.shape_cast %102 : vector<8xf32> to vector<8x1xf32>
    %cst_55 = arith.constant 6.400000e+01 : f32
    %104 = vector.broadcast %cst_55 : f32 to vector<8x1xf32>
    %105 = arith.divf %103, %104 : vector<8x1xf32>
    %106 = vector.broadcast %105 : vector<8x1xf32> to vector<8x64xf32>
    %107 = arith.subf %99, %106 : vector<8x64xf32>
    %108 = arith.mulf %107, %107 : vector<8x64xf32>
    %cst_56 = arith.constant dense<0.000000e+00> : vector<8xf32>
    %109 = vector.multi_reduction <add>, %108, %cst_56 [1] : vector<8x64xf32> to vector<8xf32>
    %110 = vector.shape_cast %109 : vector<8xf32> to vector<8x1xf32>
    %cst_57 = arith.constant 6.400000e+01 : f32
    %111 = vector.broadcast %cst_57 : f32 to vector<8x1xf32>
    %112 = arith.divf %110, %111 : vector<8x1xf32>
    %cst_58 = arith.constant 9.99999974E-6 : f32
    %113 = vector.broadcast %cst_58 : f32 to vector<8x1xf32>
    %114 = arith.addf %112, %113 : vector<8x1xf32>
    %115 = math.rsqrt %114 : vector<8x1xf32>
    %116 = vector.broadcast %115 : vector<8x1xf32> to vector<8x64xf32>
    %117 = arith.mulf %107, %116 : vector<8x64xf32>
    %118 = vector.broadcast %100 : vector<1x64xf32> to vector<8x64xf32>
    %119 = arith.mulf %117, %118 : vector<8x64xf32>
    %120 = vector.broadcast %101 : vector<1x64xf32> to vector<8x64xf32>
    %121 = arith.addf %119, %120 : vector<8x64xf32>
    %c0_59 = arith.constant 0 : index
    %c0_60 = arith.constant 0 : index
    %c0_61 = arith.constant 0 : index
    %122 = vector.load %arg15[%c0_59, %c0_60, %c0_61] : memref<1x8x64xf32, #tpu.memory_space<vmem>>, vector<1x8x64xf32>
    %123 = vector.shape_cast %122 : vector<1x8x64xf32> to vector<8x64xf32>
    %124 = vector.shape_cast %121 : vector<8x64xf32> to vector<1x8x64xf32>
    tpu.vector_store %arg15[%c0_59, %c0_60, %c0_61], %124 {strides = array<i32>} : memref<1x8x64xf32, #tpu.memory_space<vmem>>, vector<1x8x64xf32>,
    return
  }
  func.func @transform_0(%arg0: i32) -> (i32, i32, i32) {
    %c0_i32 = arith.constant 0 : i32
    %c0_i32_0 = arith.constant 0 : i32
    %c0_i32_1 = arith.constant 0 : i32
    return %arg0, %c0_i32, %c0_i32_0 : i32, i32, i32
  }
  func.func @transform_1(%arg0: i32) -> (i32, i32, i32) {
    %c0_i32 = arith.constant 0 : i32
    %c0_i32_0 = arith.constant 0 : i32
    %c0_i32_1 = arith.constant 0 : i32
    return %arg0, %c0_i32, %c0_i32_0 : i32, i32, i32
  }
  func.func @transform_2(%arg0: i32) -> (i32, i32, i32) {
    %c0_i32 = arith.constant 0 : i32
    %c0_i32_0 = arith.constant 0 : i32
    %c0_i32_1 = arith.constant 0 : i32
    return %arg0, %c0_i32, %c0_i32_0 : i32, i32, i32
  }
  func.func @transform_3(%arg0: i32) -> (i32, i32, i32) {
    %c0_i32 = arith.constant 0 : i32
    %c0_i32_0 = arith.constant 0 : i32
    %c0_i32_1 = arith.constant 0 : i32
    return %arg0, %c0_i32, %c0_i32_0 : i32, i32, i32
  }
  func.func @transform_4(%arg0: i32) -> (i32, i32) {
    %c0_i32 = arith.constant 0 : i32
    %c0_i32_0 = arith.constant 0 : i32
    %c0_i32_1 = arith.constant 0 : i32
    return %c0_i32, %c0_i32_0 : i32, i32
  }
  func.func @transform_5(%arg0: i32) -> (i32, i32) {
    %c0_i32 = arith.constant 0 : i32
    %c0_i32_0 = arith.constant 0 : i32
    %c0_i32_1 = arith.constant 0 : i32
    return %c0_i32, %c0_i32_0 : i32, i32
  }
  func.func @transform_6(%arg0: i32) -> (i32, i32) {
    %c0_i32 = arith.constant 0 : i32
    %c0_i32_0 = arith.constant 0 : i32
    %c0_i32_1 = arith.constant 0 : i32
    return %c0_i32, %c0_i32_0 : i32, i32
  }
  func.func @transform_7(%arg0: i32) -> (i32, i32) {
    %c0_i32 = arith.constant 0 : i32
    %c0_i32_0 = arith.constant 0 : i32
    %c0_i32_1 = arith.constant 0 : i32
    return %c0_i32, %c0_i32_0 : i32, i32
  }
  func.func @transform_8(%arg0: i32) -> (i32, i32) {
    %c0_i32 = arith.constant 0 : i32
    %c0_i32_0 = arith.constant 0 : i32
    %c0_i32_1 = arith.constant 0 : i32
    return %c0_i32, %c0_i32_0 : i32, i32
  }
  func.func @transform_9(%arg0: i32) -> (i32, i32) {
    %c0_i32 = arith.constant 0 : i32
    %c0_i32_0 = arith.constant 0 : i32
    %c0_i32_1 = arith.constant 0 : i32
    return %c0_i32, %c0_i32_0 : i32, i32
  }
  func.func @transform_10(%arg0: i32) -> (i32, i32) {
    %c0_i32 = arith.constant 0 : i32
    %c0_i32_0 = arith.constant 0 : i32
    %c0_i32_1 = arith.constant 0 : i32
    return %c0_i32, %c0_i32_0 : i32, i32
  }
  func.func @transform_11(%arg0: i32) -> (i32, i32) {
    %c0_i32 = arith.constant 0 : i32
    %c0_i32_0 = arith.constant 0 : i32
    %c0_i32_1 = arith.constant 0 : i32
    return %c0_i32, %c0_i32_0 : i32, i32
  }
  func.func @transform_12(%arg0: i32) -> (i32, i32) {
    %c0_i32 = arith.constant 0 : i32
    %c0_i32_0 = arith.constant 0 : i32
    %c0_i32_1 = arith.constant 0 : i32
    return %c0_i32, %c0_i32_0 : i32, i32
  }
  func.func @transform_13(%arg0: i32) -> (i32, i32) {
    %c0_i32 = arith.constant 0 : i32
    %c0_i32_0 = arith.constant 0 : i32
    %c0_i32_1 = arith.constant 0 : i32
    return %c0_i32, %c0_i32_0 : i32, i32
  }
  func.func @transform_14(%arg0: i32) -> (i32, i32, i32) {
    %c0_i32 = arith.constant 0 : i32
    %c0_i32_0 = arith.constant 0 : i32
    %c0_i32_1 = arith.constant 0 : i32
    return %arg0, %c0_i32, %c0_i32_0 : i32, i32, i32
  }
}

module attributes {stable_mosaic.version = 11 : i64} {
  func.func @_attn_block_kernel(%arg0: i32, %arg1: memref<1x8x64xf32, #tpu.memory_space<vmem>>, %arg2: memref<1x8x64xf32, #tpu.memory_space<vmem>>, %arg3: memref<1x16x64xf32, #tpu.memory_space<vmem>>, %arg4: memref<1x16x64xf32, #tpu.memory_space<vmem>>, %arg5: memref<1x1x16xf32, #tpu.memory_space<vmem>>, %arg6: memref<64x64xf32, #tpu.memory_space<vmem>>, %arg7: memref<1x64xf32, #tpu.memory_space<vmem>>, %arg8: memref<64x64xf32, #tpu.memory_space<vmem>>, %arg9: memref<1x64xf32, #tpu.memory_space<vmem>>, %arg10: memref<64x64xf32, #tpu.memory_space<vmem>>, %arg11: memref<1x64xf32, #tpu.memory_space<vmem>>, %arg12: memref<64x64xf32, #tpu.memory_space<vmem>>, %arg13: memref<1x64xf32, #tpu.memory_space<vmem>>, %arg14: memref<1x64xf32, #tpu.memory_space<vmem>>, %arg15: memref<1x64xf32, #tpu.memory_space<vmem>>, %arg16: memref<1x8x64xf32, #tpu.memory_space<vmem>>) attributes {dimension_semantics = [#tpu.dimension_semantics<parallel>], iteration_bounds = array<i64: 2>, scalar_prefetch = 0 : i64, scratch_operands = 0 : i64, tpu.core_type = #tpu.core_type<tc>, window_params = [{transform_indices = @transform_0, window_bounds = array<i64: 1, 8, 64>}, {transform_indices = @transform_1, window_bounds = array<i64: 1, 8, 64>}, {transform_indices = @transform_2, window_bounds = array<i64: 1, 16, 64>}, {transform_indices = @transform_3, window_bounds = array<i64: 1, 16, 64>}, {transform_indices = @transform_4, window_bounds = array<i64: 1, 1, 16>}, {pipeline_mode = #tpu.pipeline_mode<synchronous>, transform_indices = @transform_5, window_bounds = array<i64: 64, 64>}, {pipeline_mode = #tpu.pipeline_mode<synchronous>, transform_indices = @transform_6, window_bounds = array<i64: 1, 64>}, {pipeline_mode = #tpu.pipeline_mode<synchronous>, transform_indices = @transform_7, window_bounds = array<i64: 64, 64>}, {pipeline_mode = #tpu.pipeline_mode<synchronous>, transform_indices = @transform_8, window_bounds = array<i64: 1, 64>}, {pipeline_mode = #tpu.pipeline_mode<synchronous>, transform_indices = @transform_9, window_bounds = array<i64: 64, 64>}, {pipeline_mode = #tpu.pipeline_mode<synchronous>, transform_indices = @transform_10, window_bounds = array<i64: 1, 64>}, {pipeline_mode = #tpu.pipeline_mode<synchronous>, transform_indices = @transform_11, window_bounds = array<i64: 64, 64>}, {pipeline_mode = #tpu.pipeline_mode<synchronous>, transform_indices = @transform_12, window_bounds = array<i64: 1, 64>}, {pipeline_mode = #tpu.pipeline_mode<synchronous>, transform_indices = @transform_13, window_bounds = array<i64: 1, 64>}, {pipeline_mode = #tpu.pipeline_mode<synchronous>, transform_indices = @transform_14, window_bounds = array<i64: 1, 64>}, {transform_indices = @transform_15, window_bounds = array<i64: 1, 8, 64>}]} {
    %c0 = arith.constant 0 : index
    %c0_0 = arith.constant 0 : index
    %c0_1 = arith.constant 0 : index
    %0 = vector.load %arg1[%c0, %c0_0, %c0_1] : memref<1x8x64xf32, #tpu.memory_space<vmem>>, vector<1x8x64xf32>
    %1 = vector.shape_cast %0 : vector<1x8x64xf32> to vector<8x64xf32>
    %c0_2 = arith.constant 0 : index
    %c0_3 = arith.constant 0 : index
    %c0_4 = arith.constant 0 : index
    %2 = vector.load %arg2[%c0_2, %c0_3, %c0_4] : memref<1x8x64xf32, #tpu.memory_space<vmem>>, vector<1x8x64xf32>
    %3 = vector.shape_cast %2 : vector<1x8x64xf32> to vector<8x64xf32>
    %4 = arith.addf %1, %3 : vector<8x64xf32>
    %c0_5 = arith.constant 0 : index
    %c0_6 = arith.constant 0 : index
    %c0_7 = arith.constant 0 : index
    %5 = vector.load %arg3[%c0_5, %c0_6, %c0_7] : memref<1x16x64xf32, #tpu.memory_space<vmem>>, vector<1x16x64xf32>
    %6 = vector.shape_cast %5 : vector<1x16x64xf32> to vector<16x64xf32>
    %c0_8 = arith.constant 0 : index
    %c0_9 = arith.constant 0 : index
    %c0_10 = arith.constant 0 : index
    %7 = vector.load %arg4[%c0_8, %c0_9, %c0_10] : memref<1x16x64xf32, #tpu.memory_space<vmem>>, vector<1x16x64xf32>
    %8 = vector.shape_cast %7 : vector<1x16x64xf32> to vector<16x64xf32>
    %9 = arith.addf %6, %8 : vector<16x64xf32>
    %c0_11 = arith.constant 0 : index
    %c0_12 = arith.constant 0 : index
    %10 = vector.load %arg6[%c0_11, %c0_12] : memref<64x64xf32, #tpu.memory_space<vmem>>, vector<64x64xf32>
    %cst = arith.constant dense<0.000000e+00> : vector<8x64xf32>
    %11 = tpu.matmul %4, %10, %cst {dimension_numbers = #tpu.dot_dimension_numbers<[1], [0], [0], [1], [0, 0, 1, 1], [], []>} : vector<8x64xf32>, vector<64x64xf32>, vector<8x64xf32> -> vector<8x64xf32>
    %c0_13 = arith.constant 0 : index
    %c0_14 = arith.constant 0 : index
    %12 = vector.load %arg7[%c0_13, %c0_14] : memref<1x64xf32, #tpu.memory_space<vmem>>, vector<1x64xf32>
    %13 = vector.broadcast %12 : vector<1x64xf32> to vector<8x64xf32>
    %14 = arith.addf %11, %13 : vector<8x64xf32>
    %c0_15 = arith.constant 0 : index
    %c0_16 = arith.constant 0 : index
    %15 = vector.load %arg8[%c0_15, %c0_16] : memref<64x64xf32, #tpu.memory_space<vmem>>, vector<64x64xf32>
    %cst_17 = arith.constant dense<0.000000e+00> : vector<16x64xf32>
    %16 = tpu.matmul %9, %15, %cst_17 {dimension_numbers = #tpu.dot_dimension_numbers<[1], [0], [0], [1], [0, 0, 1, 1], [], []>} : vector<16x64xf32>, vector<64x64xf32>, vector<16x64xf32> -> vector<16x64xf32>
    %c0_18 = arith.constant 0 : index
    %c0_19 = arith.constant 0 : index
    %17 = vector.load %arg9[%c0_18, %c0_19] : memref<1x64xf32, #tpu.memory_space<vmem>>, vector<1x64xf32>
    %18 = vector.broadcast %17 : vector<1x64xf32> to vector<16x64xf32>
    %19 = arith.addf %16, %18 : vector<16x64xf32>
    %c0_20 = arith.constant 0 : index
    %c0_21 = arith.constant 0 : index
    %20 = vector.load %arg10[%c0_20, %c0_21] : memref<64x64xf32, #tpu.memory_space<vmem>>, vector<64x64xf32>
    %cst_22 = arith.constant dense<0.000000e+00> : vector<16x64xf32>
    %21 = tpu.matmul %6, %20, %cst_22 {dimension_numbers = #tpu.dot_dimension_numbers<[1], [0], [0], [1], [0, 0, 1, 1], [], []>} : vector<16x64xf32>, vector<64x64xf32>, vector<16x64xf32> -> vector<16x64xf32>
    %c0_23 = arith.constant 0 : index
    %c0_24 = arith.constant 0 : index
    %22 = vector.load %arg11[%c0_23, %c0_24] : memref<1x64xf32, #tpu.memory_space<vmem>>, vector<1x64xf32>
    %23 = vector.broadcast %22 : vector<1x64xf32> to vector<16x64xf32>
    %24 = arith.addf %21, %23 : vector<16x64xf32>
    %c0_25 = arith.constant 0 : index
    %c0_26 = arith.constant 0 : index
    %c0_27 = arith.constant 0 : index
    %25 = vector.load %arg5[%c0_25, %c0_26, %c0_27] : memref<1x1x16xf32, #tpu.memory_space<vmem>>, vector<1x1x16xf32>
    %26 = vector.shape_cast %25 : vector<1x1x16xf32> to vector<1x16xf32>
    %27 = vector.extract_strided_slice %14 {offsets = [0, 0], sizes = [8, 16], strides = [1, 1]} : vector<8x64xf32> to vector<8x16xf32>
    %28 = vector.extract_strided_slice %19 {offsets = [0, 0], sizes = [16, 16], strides = [1, 1]} : vector<16x64xf32> to vector<16x16xf32>
    %29 = vector.extract_strided_slice %24 {offsets = [0, 0], sizes = [16, 16], strides = [1, 1]} : vector<16x64xf32> to vector<16x16xf32>
    %cst_28 = arith.constant dense<0.000000e+00> : vector<8x16xf32>
    %30 = tpu.matmul %27, %28, %cst_28 {dimension_numbers = #tpu.dot_dimension_numbers<[1], [1], [0], [0], [0, 0, 1, 0], [], []>} : vector<8x16xf32>, vector<16x16xf32>, vector<8x16xf32> -> vector<8x16xf32>
    %cst_29 = arith.constant 2.500000e-01 : f32
    %31 = vector.broadcast %cst_29 : f32 to vector<8x16xf32>
    %32 = arith.mulf %30, %31 : vector<8x16xf32>
    %33 = vector.broadcast %26 : vector<1x16xf32> to vector<8x16xf32>
    %34 = arith.addf %32, %33 : vector<8x16xf32>
    %cst_30 = arith.constant dense<0xFF800000> : vector<8xf32>
    %35 = vector.multi_reduction <maximumf>, %34, %cst_30 [1] : vector<8x16xf32> to vector<8xf32>
    %36 = vector.shape_cast %35 : vector<8xf32> to vector<8x1xf32>
    %37 = vector.broadcast %36 : vector<8x1xf32> to vector<8x16xf32>
    %38 = arith.subf %34, %37 : vector<8x16xf32>
    %39 = math.exp %38 : vector<8x16xf32>
    %cst_31 = arith.constant dense<0.000000e+00> : vector<8xf32>
    %40 = vector.multi_reduction <add>, %39, %cst_31 [1] : vector<8x16xf32> to vector<8xf32>
    %41 = vector.shape_cast %40 : vector<8xf32> to vector<8x1xf32>
    %42 = tpu.reciprocal %41 {approx = true} : vector<8x1xf32> -> vector<8x1xf32>
    %43 = vector.broadcast %42 : vector<8x1xf32> to vector<8x16xf32>
    %44 = arith.mulf %39, %43 : vector<8x16xf32>
    %cst_32 = arith.constant dense<0.000000e+00> : vector<8x16xf32>
    %45 = tpu.matmul %44, %29, %cst_32 {dimension_numbers = #tpu.dot_dimension_numbers<[1], [0], [0], [1], [0, 0, 1, 1], [], []>} : vector<8x16xf32>, vector<16x16xf32>, vector<8x16xf32> -> vector<8x16xf32>
    %46 = vector.extract_strided_slice %14 {offsets = [0, 16], sizes = [8, 16], strides = [1, 1]} : vector<8x64xf32> to vector<8x16xf32>
    %47 = vector.extract_strided_slice %19 {offsets = [0, 16], sizes = [16, 16], strides = [1, 1]} : vector<16x64xf32> to vector<16x16xf32>
    %48 = vector.extract_strided_slice %24 {offsets = [0, 16], sizes = [16, 16], strides = [1, 1]} : vector<16x64xf32> to vector<16x16xf32>
    %cst_33 = arith.constant dense<0.000000e+00> : vector<8x16xf32>
    %49 = tpu.matmul %46, %47, %cst_33 {dimension_numbers = #tpu.dot_dimension_numbers<[1], [1], [0], [0], [0, 0, 1, 0], [], []>} : vector<8x16xf32>, vector<16x16xf32>, vector<8x16xf32> -> vector<8x16xf32>
    %cst_34 = arith.constant 2.500000e-01 : f32
    %50 = vector.broadcast %cst_34 : f32 to vector<8x16xf32>
    %51 = arith.mulf %49, %50 : vector<8x16xf32>
    %52 = vector.broadcast %26 : vector<1x16xf32> to vector<8x16xf32>
    %53 = arith.addf %51, %52 : vector<8x16xf32>
    %cst_35 = arith.constant dense<0xFF800000> : vector<8xf32>
    %54 = vector.multi_reduction <maximumf>, %53, %cst_35 [1] : vector<8x16xf32> to vector<8xf32>
    %55 = vector.shape_cast %54 : vector<8xf32> to vector<8x1xf32>
    %56 = vector.broadcast %55 : vector<8x1xf32> to vector<8x16xf32>
    %57 = arith.subf %53, %56 : vector<8x16xf32>
    %58 = math.exp %57 : vector<8x16xf32>
    %cst_36 = arith.constant dense<0.000000e+00> : vector<8xf32>
    %59 = vector.multi_reduction <add>, %58, %cst_36 [1] : vector<8x16xf32> to vector<8xf32>
    %60 = vector.shape_cast %59 : vector<8xf32> to vector<8x1xf32>
    %61 = tpu.reciprocal %60 {approx = true} : vector<8x1xf32> -> vector<8x1xf32>
    %62 = vector.broadcast %61 : vector<8x1xf32> to vector<8x16xf32>
    %63 = arith.mulf %58, %62 : vector<8x16xf32>
    %cst_37 = arith.constant dense<0.000000e+00> : vector<8x16xf32>
    %64 = tpu.matmul %63, %48, %cst_37 {dimension_numbers = #tpu.dot_dimension_numbers<[1], [0], [0], [1], [0, 0, 1, 1], [], []>} : vector<8x16xf32>, vector<16x16xf32>, vector<8x16xf32> -> vector<8x16xf32>
    %65 = vector.extract_strided_slice %14 {offsets = [0, 32], sizes = [8, 16], strides = [1, 1]} : vector<8x64xf32> to vector<8x16xf32>
    %66 = vector.extract_strided_slice %19 {offsets = [0, 32], sizes = [16, 16], strides = [1, 1]} : vector<16x64xf32> to vector<16x16xf32>
    %67 = vector.extract_strided_slice %24 {offsets = [0, 32], sizes = [16, 16], strides = [1, 1]} : vector<16x64xf32> to vector<16x16xf32>
    %cst_38 = arith.constant dense<0.000000e+00> : vector<8x16xf32>
    %68 = tpu.matmul %65, %66, %cst_38 {dimension_numbers = #tpu.dot_dimension_numbers<[1], [1], [0], [0], [0, 0, 1, 0], [], []>} : vector<8x16xf32>, vector<16x16xf32>, vector<8x16xf32> -> vector<8x16xf32>
    %cst_39 = arith.constant 2.500000e-01 : f32
    %69 = vector.broadcast %cst_39 : f32 to vector<8x16xf32>
    %70 = arith.mulf %68, %69 : vector<8x16xf32>
    %71 = vector.broadcast %26 : vector<1x16xf32> to vector<8x16xf32>
    %72 = arith.addf %70, %71 : vector<8x16xf32>
    %cst_40 = arith.constant dense<0xFF800000> : vector<8xf32>
    %73 = vector.multi_reduction <maximumf>, %72, %cst_40 [1] : vector<8x16xf32> to vector<8xf32>
    %74 = vector.shape_cast %73 : vector<8xf32> to vector<8x1xf32>
    %75 = vector.broadcast %74 : vector<8x1xf32> to vector<8x16xf32>
    %76 = arith.subf %72, %75 : vector<8x16xf32>
    %77 = math.exp %76 : vector<8x16xf32>
    %cst_41 = arith.constant dense<0.000000e+00> : vector<8xf32>
    %78 = vector.multi_reduction <add>, %77, %cst_41 [1] : vector<8x16xf32> to vector<8xf32>
    %79 = vector.shape_cast %78 : vector<8xf32> to vector<8x1xf32>
    %80 = tpu.reciprocal %79 {approx = true} : vector<8x1xf32> -> vector<8x1xf32>
    %81 = vector.broadcast %80 : vector<8x1xf32> to vector<8x16xf32>
    %82 = arith.mulf %77, %81 : vector<8x16xf32>
    %cst_42 = arith.constant dense<0.000000e+00> : vector<8x16xf32>
    %83 = tpu.matmul %82, %67, %cst_42 {dimension_numbers = #tpu.dot_dimension_numbers<[1], [0], [0], [1], [0, 0, 1, 1], [], []>} : vector<8x16xf32>, vector<16x16xf32>, vector<8x16xf32> -> vector<8x16xf32>
    %84 = vector.extract_strided_slice %14 {offsets = [0, 48], sizes = [8, 16], strides = [1, 1]} : vector<8x64xf32> to vector<8x16xf32>
    %85 = vector.extract_strided_slice %19 {offsets = [0, 48], sizes = [16, 16], strides = [1, 1]} : vector<16x64xf32> to vector<16x16xf32>
    %86 = vector.extract_strided_slice %24 {offsets = [0, 48], sizes = [16, 16], strides = [1, 1]} : vector<16x64xf32> to vector<16x16xf32>
    %cst_43 = arith.constant dense<0.000000e+00> : vector<8x16xf32>
    %87 = tpu.matmul %84, %85, %cst_43 {dimension_numbers = #tpu.dot_dimension_numbers<[1], [1], [0], [0], [0, 0, 1, 0], [], []>} : vector<8x16xf32>, vector<16x16xf32>, vector<8x16xf32> -> vector<8x16xf32>
    %cst_44 = arith.constant 2.500000e-01 : f32
    %88 = vector.broadcast %cst_44 : f32 to vector<8x16xf32>
    %89 = arith.mulf %87, %88 : vector<8x16xf32>
    %90 = vector.broadcast %26 : vector<1x16xf32> to vector<8x16xf32>
    %91 = arith.addf %89, %90 : vector<8x16xf32>
    %cst_45 = arith.constant dense<0xFF800000> : vector<8xf32>
    %92 = vector.multi_reduction <maximumf>, %91, %cst_45 [1] : vector<8x16xf32> to vector<8xf32>
    %93 = vector.shape_cast %92 : vector<8xf32> to vector<8x1xf32>
    %94 = vector.broadcast %93 : vector<8x1xf32> to vector<8x16xf32>
    %95 = arith.subf %91, %94 : vector<8x16xf32>
    %96 = math.exp %95 : vector<8x16xf32>
    %cst_46 = arith.constant dense<0.000000e+00> : vector<8xf32>
    %97 = vector.multi_reduction <add>, %96, %cst_46 [1] : vector<8x16xf32> to vector<8xf32>
    %98 = vector.shape_cast %97 : vector<8xf32> to vector<8x1xf32>
    %99 = tpu.reciprocal %98 {approx = true} : vector<8x1xf32> -> vector<8x1xf32>
    %100 = vector.broadcast %99 : vector<8x1xf32> to vector<8x16xf32>
    %101 = arith.mulf %96, %100 : vector<8x16xf32>
    %cst_47 = arith.constant dense<0.000000e+00> : vector<8x16xf32>
    %102 = tpu.matmul %101, %86, %cst_47 {dimension_numbers = #tpu.dot_dimension_numbers<[1], [0], [0], [1], [0, 0, 1, 1], [], []>} : vector<8x16xf32>, vector<16x16xf32>, vector<8x16xf32> -> vector<8x16xf32>
    %103 = tpu.concatenate %45, %64, %83, %102 in 1 : vector<8x16xf32>, vector<8x16xf32>, vector<8x16xf32>, vector<8x16xf32> -> vector<8x64xf32>
    %c0_48 = arith.constant 0 : index
    %c0_49 = arith.constant 0 : index
    %104 = vector.load %arg12[%c0_48, %c0_49] : memref<64x64xf32, #tpu.memory_space<vmem>>, vector<64x64xf32>
    %cst_50 = arith.constant dense<0.000000e+00> : vector<8x64xf32>
    %105 = tpu.matmul %103, %104, %cst_50 {dimension_numbers = #tpu.dot_dimension_numbers<[1], [0], [0], [1], [0, 0, 1, 1], [], []>} : vector<8x64xf32>, vector<64x64xf32>, vector<8x64xf32> -> vector<8x64xf32>
    %c0_51 = arith.constant 0 : index
    %c0_52 = arith.constant 0 : index
    %106 = vector.load %arg13[%c0_51, %c0_52] : memref<1x64xf32, #tpu.memory_space<vmem>>, vector<1x64xf32>
    %107 = vector.broadcast %106 : vector<1x64xf32> to vector<8x64xf32>
    %108 = arith.addf %105, %107 : vector<8x64xf32>
    %109 = arith.addf %108, %1 : vector<8x64xf32>
    %c0_53 = arith.constant 0 : index
    %c0_54 = arith.constant 0 : index
    %110 = vector.load %arg14[%c0_53, %c0_54] : memref<1x64xf32, #tpu.memory_space<vmem>>, vector<1x64xf32>
    %c0_55 = arith.constant 0 : index
    %c0_56 = arith.constant 0 : index
    %111 = vector.load %arg15[%c0_55, %c0_56] : memref<1x64xf32, #tpu.memory_space<vmem>>, vector<1x64xf32>
    %cst_57 = arith.constant dense<0.000000e+00> : vector<8xf32>
    %112 = vector.multi_reduction <add>, %109, %cst_57 [1] : vector<8x64xf32> to vector<8xf32>
    %113 = vector.shape_cast %112 : vector<8xf32> to vector<8x1xf32>
    %cst_58 = arith.constant 6.400000e+01 : f32
    %114 = vector.broadcast %cst_58 : f32 to vector<8x1xf32>
    %115 = arith.divf %113, %114 : vector<8x1xf32>
    %116 = vector.broadcast %115 : vector<8x1xf32> to vector<8x64xf32>
    %117 = arith.subf %109, %116 : vector<8x64xf32>
    %118 = arith.mulf %117, %117 : vector<8x64xf32>
    %cst_59 = arith.constant dense<0.000000e+00> : vector<8xf32>
    %119 = vector.multi_reduction <add>, %118, %cst_59 [1] : vector<8x64xf32> to vector<8xf32>
    %120 = vector.shape_cast %119 : vector<8xf32> to vector<8x1xf32>
    %cst_60 = arith.constant 6.400000e+01 : f32
    %121 = vector.broadcast %cst_60 : f32 to vector<8x1xf32>
    %122 = arith.divf %120, %121 : vector<8x1xf32>
    %cst_61 = arith.constant 9.99999974E-6 : f32
    %123 = vector.broadcast %cst_61 : f32 to vector<8x1xf32>
    %124 = arith.addf %122, %123 : vector<8x1xf32>
    %125 = math.rsqrt %124 : vector<8x1xf32>
    %126 = vector.broadcast %125 : vector<8x1xf32> to vector<8x64xf32>
    %127 = arith.mulf %117, %126 : vector<8x64xf32>
    %128 = vector.broadcast %110 : vector<1x64xf32> to vector<8x64xf32>
    %129 = arith.mulf %127, %128 : vector<8x64xf32>
    %130 = vector.broadcast %111 : vector<1x64xf32> to vector<8x64xf32>
    %131 = arith.addf %129, %130 : vector<8x64xf32>
    %c0_62 = arith.constant 0 : index
    %c0_63 = arith.constant 0 : index
    %c0_64 = arith.constant 0 : index
    %132 = vector.load %arg16[%c0_62, %c0_63, %c0_64] : memref<1x8x64xf32, #tpu.memory_space<vmem>>, vector<1x8x64xf32>
    %133 = vector.shape_cast %132 : vector<1x8x64xf32> to vector<8x64xf32>
    %134 = vector.shape_cast %131 : vector<8x64xf32> to vector<1x8x64xf32>
    tpu.vector_store %arg16[%c0_62, %c0_63, %c0_64], %134 {strides = array<i32>} : memref<1x8x64xf32, #tpu.memory_space<vmem>>, vector<1x8x64xf32>,
    return
  }
  func.func @transform_0(%arg0: i32) -> (i32, i32, i32) {
    %c0_i32 = arith.constant 0 : i32
    %c0_i32_0 = arith.constant 0 : i32
    %c0_i32_1 = arith.constant 0 : i32
    return %arg0, %c0_i32, %c0_i32_0 : i32, i32, i32
  }
  func.func @transform_1(%arg0: i32) -> (i32, i32, i32) {
    %c0_i32 = arith.constant 0 : i32
    %c0_i32_0 = arith.constant 0 : i32
    %c0_i32_1 = arith.constant 0 : i32
    return %arg0, %c0_i32, %c0_i32_0 : i32, i32, i32
  }
  func.func @transform_2(%arg0: i32) -> (i32, i32, i32) {
    %c0_i32 = arith.constant 0 : i32
    %c0_i32_0 = arith.constant 0 : i32
    %c0_i32_1 = arith.constant 0 : i32
    return %arg0, %c0_i32, %c0_i32_0 : i32, i32, i32
  }
  func.func @transform_3(%arg0: i32) -> (i32, i32, i32) {
    %c0_i32 = arith.constant 0 : i32
    %c0_i32_0 = arith.constant 0 : i32
    %c0_i32_1 = arith.constant 0 : i32
    return %arg0, %c0_i32, %c0_i32_0 : i32, i32, i32
  }
  func.func @transform_4(%arg0: i32) -> (i32, i32, i32) {
    %c0_i32 = arith.constant 0 : i32
    %c0_i32_0 = arith.constant 0 : i32
    %c0_i32_1 = arith.constant 0 : i32
    return %arg0, %c0_i32, %c0_i32_0 : i32, i32, i32
  }
  func.func @transform_5(%arg0: i32) -> (i32, i32) {
    %c0_i32 = arith.constant 0 : i32
    %c0_i32_0 = arith.constant 0 : i32
    %c0_i32_1 = arith.constant 0 : i32
    return %c0_i32, %c0_i32_0 : i32, i32
  }
  func.func @transform_6(%arg0: i32) -> (i32, i32) {
    %c0_i32 = arith.constant 0 : i32
    %c0_i32_0 = arith.constant 0 : i32
    %c0_i32_1 = arith.constant 0 : i32
    return %c0_i32, %c0_i32_0 : i32, i32
  }
  func.func @transform_7(%arg0: i32) -> (i32, i32) {
    %c0_i32 = arith.constant 0 : i32
    %c0_i32_0 = arith.constant 0 : i32
    %c0_i32_1 = arith.constant 0 : i32
    return %c0_i32, %c0_i32_0 : i32, i32
  }
  func.func @transform_8(%arg0: i32) -> (i32, i32) {
    %c0_i32 = arith.constant 0 : i32
    %c0_i32_0 = arith.constant 0 : i32
    %c0_i32_1 = arith.constant 0 : i32
    return %c0_i32, %c0_i32_0 : i32, i32
  }
  func.func @transform_9(%arg0: i32) -> (i32, i32) {
    %c0_i32 = arith.constant 0 : i32
    %c0_i32_0 = arith.constant 0 : i32
    %c0_i32_1 = arith.constant 0 : i32
    return %c0_i32, %c0_i32_0 : i32, i32
  }
  func.func @transform_10(%arg0: i32) -> (i32, i32) {
    %c0_i32 = arith.constant 0 : i32
    %c0_i32_0 = arith.constant 0 : i32
    %c0_i32_1 = arith.constant 0 : i32
    return %c0_i32, %c0_i32_0 : i32, i32
  }
  func.func @transform_11(%arg0: i32) -> (i32, i32) {
    %c0_i32 = arith.constant 0 : i32
    %c0_i32_0 = arith.constant 0 : i32
    %c0_i32_1 = arith.constant 0 : i32
    return %c0_i32, %c0_i32_0 : i32, i32
  }
  func.func @transform_12(%arg0: i32) -> (i32, i32) {
    %c0_i32 = arith.constant 0 : i32
    %c0_i32_0 = arith.constant 0 : i32
    %c0_i32_1 = arith.constant 0 : i32
    return %c0_i32, %c0_i32_0 : i32, i32
  }
  func.func @transform_13(%arg0: i32) -> (i32, i32) {
    %c0_i32 = arith.constant 0 : i32
    %c0_i32_0 = arith.constant 0 : i32
    %c0_i32_1 = arith.constant 0 : i32
    return %c0_i32, %c0_i32_0 : i32, i32
  }
  func.func @transform_14(%arg0: i32) -> (i32, i32) {
    %c0_i32 = arith.constant 0 : i32
    %c0_i32_0 = arith.constant 0 : i32
    %c0_i32_1 = arith.constant 0 : i32
    return %c0_i32, %c0_i32_0 : i32, i32
  }
  func.func @transform_15(%arg0: i32) -> (i32, i32, i32) {
    %c0_i32 = arith.constant 0 : i32
    %c0_i32_0 = arith.constant 0 : i32
    %c0_i32_1 = arith.constant 0 : i32
    return %arg0, %c0_i32, %c0_i32_0 : i32, i32, i32
  }
}

module attributes {stable_mosaic.version = 11 : i64} {
  func.func @_ffn_block_kernel(%arg0: i32, %arg1: memref<1x8x64xf32, #tpu.memory_space<vmem>>, %arg2: memref<64x32xf32, #tpu.memory_space<vmem>>, %arg3: memref<1x32xf32, #tpu.memory_space<vmem>>, %arg4: memref<32x64xf32, #tpu.memory_space<vmem>>, %arg5: memref<1x64xf32, #tpu.memory_space<vmem>>, %arg6: memref<1x64xf32, #tpu.memory_space<vmem>>, %arg7: memref<1x64xf32, #tpu.memory_space<vmem>>, %arg8: memref<1x64xf32, #tpu.memory_space<vmem>>, %arg9: memref<1x64xf32, #tpu.memory_space<vmem>>, %arg10: memref<1x8x64xf32, #tpu.memory_space<vmem>>) attributes {dimension_semantics = [#tpu.dimension_semantics<parallel>], iteration_bounds = array<i64: 2>, scalar_prefetch = 0 : i64, scratch_operands = 0 : i64, tpu.core_type = #tpu.core_type<tc>, window_params = [{transform_indices = @transform_0, window_bounds = array<i64: 1, 8, 64>}, {pipeline_mode = #tpu.pipeline_mode<synchronous>, transform_indices = @transform_1, window_bounds = array<i64: 64, 32>}, {pipeline_mode = #tpu.pipeline_mode<synchronous>, transform_indices = @transform_2, window_bounds = array<i64: 1, 32>}, {pipeline_mode = #tpu.pipeline_mode<synchronous>, transform_indices = @transform_3, window_bounds = array<i64: 32, 64>}, {pipeline_mode = #tpu.pipeline_mode<synchronous>, transform_indices = @transform_4, window_bounds = array<i64: 1, 64>}, {pipeline_mode = #tpu.pipeline_mode<synchronous>, transform_indices = @transform_5, window_bounds = array<i64: 1, 64>}, {pipeline_mode = #tpu.pipeline_mode<synchronous>, transform_indices = @transform_6, window_bounds = array<i64: 1, 64>}, {pipeline_mode = #tpu.pipeline_mode<synchronous>, transform_indices = @transform_7, window_bounds = array<i64: 1, 64>}, {pipeline_mode = #tpu.pipeline_mode<synchronous>, transform_indices = @transform_8, window_bounds = array<i64: 1, 64>}, {transform_indices = @transform_9, window_bounds = array<i64: 1, 8, 64>}]} {
    %c0 = arith.constant 0 : index
    %c0_0 = arith.constant 0 : index
    %c0_1 = arith.constant 0 : index
    %0 = vector.load %arg1[%c0, %c0_0, %c0_1] : memref<1x8x64xf32, #tpu.memory_space<vmem>>, vector<1x8x64xf32>
    %1 = vector.shape_cast %0 : vector<1x8x64xf32> to vector<8x64xf32>
    %c0_2 = arith.constant 0 : index
    %c0_3 = arith.constant 0 : index
    %2 = vector.load %arg2[%c0_2, %c0_3] : memref<64x32xf32, #tpu.memory_space<vmem>>, vector<64x32xf32>
    %cst = arith.constant dense<0.000000e+00> : vector<8x32xf32>
    %3 = tpu.matmul %1, %2, %cst {dimension_numbers = #tpu.dot_dimension_numbers<[1], [0], [0], [1], [0, 0, 1, 1], [], []>} : vector<8x64xf32>, vector<64x32xf32>, vector<8x32xf32> -> vector<8x32xf32>
    %c0_4 = arith.constant 0 : index
    %c0_5 = arith.constant 0 : index
    %4 = vector.load %arg3[%c0_4, %c0_5] : memref<1x32xf32, #tpu.memory_space<vmem>>, vector<1x32xf32>
    %5 = vector.broadcast %4 : vector<1x32xf32> to vector<8x32xf32>
    %6 = arith.addf %3, %5 : vector<8x32xf32>
    %7 = arith.negf %6 : vector<8x32xf32>
    %8 = math.exp %7 : vector<8x32xf32>
    %cst_6 = arith.constant 1.000000e+00 : f32
    %9 = vector.broadcast %cst_6 : f32 to vector<8x32xf32>
    %10 = arith.addf %9, %8 : vector<8x32xf32>
    %11 = arith.divf %9, %10 : vector<8x32xf32>
    %12 = arith.mulf %6, %11 : vector<8x32xf32>
    %c0_7 = arith.constant 0 : index
    %c0_8 = arith.constant 0 : index
    %13 = vector.load %arg4[%c0_7, %c0_8] : memref<32x64xf32, #tpu.memory_space<vmem>>, vector<32x64xf32>
    %cst_9 = arith.constant dense<0.000000e+00> : vector<8x64xf32>
    %14 = tpu.matmul %12, %13, %cst_9 {dimension_numbers = #tpu.dot_dimension_numbers<[1], [0], [0], [1], [0, 0, 1, 1], [], []>} : vector<8x32xf32>, vector<32x64xf32>, vector<8x64xf32> -> vector<8x64xf32>
    %c0_10 = arith.constant 0 : index
    %c0_11 = arith.constant 0 : index
    %15 = vector.load %arg5[%c0_10, %c0_11] : memref<1x64xf32, #tpu.memory_space<vmem>>, vector<1x64xf32>
    %16 = vector.broadcast %15 : vector<1x64xf32> to vector<8x64xf32>
    %17 = arith.addf %14, %16 : vector<8x64xf32>
    %18 = arith.addf %17, %1 : vector<8x64xf32>
    %c0_12 = arith.constant 0 : index
    %c0_13 = arith.constant 0 : index
    %19 = vector.load %arg6[%c0_12, %c0_13] : memref<1x64xf32, #tpu.memory_space<vmem>>, vector<1x64xf32>
    %c0_14 = arith.constant 0 : index
    %c0_15 = arith.constant 0 : index
    %20 = vector.load %arg7[%c0_14, %c0_15] : memref<1x64xf32, #tpu.memory_space<vmem>>, vector<1x64xf32>
    %cst_16 = arith.constant dense<0.000000e+00> : vector<8xf32>
    %21 = vector.multi_reduction <add>, %18, %cst_16 [1] : vector<8x64xf32> to vector<8xf32>
    %22 = vector.shape_cast %21 : vector<8xf32> to vector<8x1xf32>
    %cst_17 = arith.constant 6.400000e+01 : f32
    %23 = vector.broadcast %cst_17 : f32 to vector<8x1xf32>
    %24 = arith.divf %22, %23 : vector<8x1xf32>
    %25 = vector.broadcast %24 : vector<8x1xf32> to vector<8x64xf32>
    %26 = arith.subf %18, %25 : vector<8x64xf32>
    %27 = arith.mulf %26, %26 : vector<8x64xf32>
    %cst_18 = arith.constant dense<0.000000e+00> : vector<8xf32>
    %28 = vector.multi_reduction <add>, %27, %cst_18 [1] : vector<8x64xf32> to vector<8xf32>
    %29 = vector.shape_cast %28 : vector<8xf32> to vector<8x1xf32>
    %cst_19 = arith.constant 6.400000e+01 : f32
    %30 = vector.broadcast %cst_19 : f32 to vector<8x1xf32>
    %31 = arith.divf %29, %30 : vector<8x1xf32>
    %cst_20 = arith.constant 9.99999974E-6 : f32
    %32 = vector.broadcast %cst_20 : f32 to vector<8x1xf32>
    %33 = arith.addf %31, %32 : vector<8x1xf32>
    %34 = math.rsqrt %33 : vector<8x1xf32>
    %35 = vector.broadcast %34 : vector<8x1xf32> to vector<8x64xf32>
    %36 = arith.mulf %26, %35 : vector<8x64xf32>
    %37 = vector.broadcast %19 : vector<1x64xf32> to vector<8x64xf32>
    %38 = arith.mulf %36, %37 : vector<8x64xf32>
    %39 = vector.broadcast %20 : vector<1x64xf32> to vector<8x64xf32>
    %40 = arith.addf %38, %39 : vector<8x64xf32>
    %c0_21 = arith.constant 0 : index
    %c0_22 = arith.constant 0 : index
    %41 = vector.load %arg8[%c0_21, %c0_22] : memref<1x64xf32, #tpu.memory_space<vmem>>, vector<1x64xf32>
    %c0_23 = arith.constant 0 : index
    %c0_24 = arith.constant 0 : index
    %42 = vector.load %arg9[%c0_23, %c0_24] : memref<1x64xf32, #tpu.memory_space<vmem>>, vector<1x64xf32>
    %cst_25 = arith.constant dense<0.000000e+00> : vector<8xf32>
    %43 = vector.multi_reduction <add>, %40, %cst_25 [1] : vector<8x64xf32> to vector<8xf32>
    %44 = vector.shape_cast %43 : vector<8xf32> to vector<8x1xf32>
    %cst_26 = arith.constant 6.400000e+01 : f32
    %45 = vector.broadcast %cst_26 : f32 to vector<8x1xf32>
    %46 = arith.divf %44, %45 : vector<8x1xf32>
    %47 = vector.broadcast %46 : vector<8x1xf32> to vector<8x64xf32>
    %48 = arith.subf %40, %47 : vector<8x64xf32>
    %49 = arith.mulf %48, %48 : vector<8x64xf32>
    %cst_27 = arith.constant dense<0.000000e+00> : vector<8xf32>
    %50 = vector.multi_reduction <add>, %49, %cst_27 [1] : vector<8x64xf32> to vector<8xf32>
    %51 = vector.shape_cast %50 : vector<8xf32> to vector<8x1xf32>
    %cst_28 = arith.constant 6.400000e+01 : f32
    %52 = vector.broadcast %cst_28 : f32 to vector<8x1xf32>
    %53 = arith.divf %51, %52 : vector<8x1xf32>
    %cst_29 = arith.constant 9.99999974E-6 : f32
    %54 = vector.broadcast %cst_29 : f32 to vector<8x1xf32>
    %55 = arith.addf %53, %54 : vector<8x1xf32>
    %56 = math.rsqrt %55 : vector<8x1xf32>
    %57 = vector.broadcast %56 : vector<8x1xf32> to vector<8x64xf32>
    %58 = arith.mulf %48, %57 : vector<8x64xf32>
    %59 = vector.broadcast %41 : vector<1x64xf32> to vector<8x64xf32>
    %60 = arith.mulf %58, %59 : vector<8x64xf32>
    %61 = vector.broadcast %42 : vector<1x64xf32> to vector<8x64xf32>
    %62 = arith.addf %60, %61 : vector<8x64xf32>
    %c0_30 = arith.constant 0 : index
    %c0_31 = arith.constant 0 : index
    %c0_32 = arith.constant 0 : index
    %63 = vector.load %arg10[%c0_30, %c0_31, %c0_32] : memref<1x8x64xf32, #tpu.memory_space<vmem>>, vector<1x8x64xf32>
    %64 = vector.shape_cast %63 : vector<1x8x64xf32> to vector<8x64xf32>
    %65 = vector.shape_cast %62 : vector<8x64xf32> to vector<1x8x64xf32>
    tpu.vector_store %arg10[%c0_30, %c0_31, %c0_32], %65 {strides = array<i32>} : memref<1x8x64xf32, #tpu.memory_space<vmem>>, vector<1x8x64xf32>,
    return
  }
  func.func @transform_0(%arg0: i32) -> (i32, i32, i32) {
    %c0_i32 = arith.constant 0 : i32
    %c0_i32_0 = arith.constant 0 : i32
    %c0_i32_1 = arith.constant 0 : i32
    return %arg0, %c0_i32, %c0_i32_0 : i32, i32, i32
  }
  func.func @transform_1(%arg0: i32) -> (i32, i32) {
    %c0_i32 = arith.constant 0 : i32
    %c0_i32_0 = arith.constant 0 : i32
    %c0_i32_1 = arith.constant 0 : i32
    return %c0_i32, %c0_i32_0 : i32, i32
  }
  func.func @transform_2(%arg0: i32) -> (i32, i32) {
    %c0_i32 = arith.constant 0 : i32
    %c0_i32_0 = arith.constant 0 : i32
    %c0_i32_1 = arith.constant 0 : i32
    return %c0_i32, %c0_i32_0 : i32, i32
  }
  func.func @transform_3(%arg0: i32) -> (i32, i32) {
    %c0_i32 = arith.constant 0 : i32
    %c0_i32_0 = arith.constant 0 : i32
    %c0_i32_1 = arith.constant 0 : i32
    return %c0_i32, %c0_i32_0 : i32, i32
  }
  func.func @transform_4(%arg0: i32) -> (i32, i32) {
    %c0_i32 = arith.constant 0 : i32
    %c0_i32_0 = arith.constant 0 : i32
    %c0_i32_1 = arith.constant 0 : i32
    return %c0_i32, %c0_i32_0 : i32, i32
  }
  func.func @transform_5(%arg0: i32) -> (i32, i32) {
    %c0_i32 = arith.constant 0 : i32
    %c0_i32_0 = arith.constant 0 : i32
    %c0_i32_1 = arith.constant 0 : i32
    return %c0_i32, %c0_i32_0 : i32, i32
  }
  func.func @transform_6(%arg0: i32) -> (i32, i32) {
    %c0_i32 = arith.constant 0 : i32
    %c0_i32_0 = arith.constant 0 : i32
    %c0_i32_1 = arith.constant 0 : i32
    return %c0_i32, %c0_i32_0 : i32, i32
  }
  func.func @transform_7(%arg0: i32) -> (i32, i32) {
    %c0_i32 = arith.constant 0 : i32
    %c0_i32_0 = arith.constant 0 : i32
    %c0_i32_1 = arith.constant 0 : i32
    return %c0_i32, %c0_i32_0 : i32, i32
  }
  func.func @transform_8(%arg0: i32) -> (i32, i32) {
    %c0_i32 = arith.constant 0 : i32
    %c0_i32_0 = arith.constant 0 : i32
    %c0_i32_1 = arith.constant 0 : i32
    return %c0_i32, %c0_i32_0 : i32, i32
  }
  func.func @transform_9(%arg0: i32) -> (i32, i32, i32) {
    %c0_i32 = arith.constant 0 : i32
    %c0_i32_0 = arith.constant 0 : i32
    %c0_i32_1 = arith.constant 0 : i32
    return %arg0, %c0_i32, %c0_i32_0 : i32, i32, i32
  }
}

module attributes {stable_mosaic.version = 11 : i64} {
  func.func @_attn_block_kernel(%arg0: i32, %arg1: memref<1x8x64xf32, #tpu.memory_space<vmem>>, %arg2: memref<1x8x64xf32, #tpu.memory_space<vmem>>, %arg3: memref<1x8x64xf32, #tpu.memory_space<vmem>>, %arg4: memref<1x8x64xf32, #tpu.memory_space<vmem>>, %arg5: memref<64x64xf32, #tpu.memory_space<vmem>>, %arg6: memref<1x64xf32, #tpu.memory_space<vmem>>, %arg7: memref<64x64xf32, #tpu.memory_space<vmem>>, %arg8: memref<1x64xf32, #tpu.memory_space<vmem>>, %arg9: memref<64x64xf32, #tpu.memory_space<vmem>>, %arg10: memref<1x64xf32, #tpu.memory_space<vmem>>, %arg11: memref<64x64xf32, #tpu.memory_space<vmem>>, %arg12: memref<1x64xf32, #tpu.memory_space<vmem>>, %arg13: memref<1x64xf32, #tpu.memory_space<vmem>>, %arg14: memref<1x64xf32, #tpu.memory_space<vmem>>, %arg15: memref<1x8x64xf32, #tpu.memory_space<vmem>>) attributes {dimension_semantics = [#tpu.dimension_semantics<parallel>], iteration_bounds = array<i64: 2>, scalar_prefetch = 0 : i64, scratch_operands = 0 : i64, tpu.core_type = #tpu.core_type<tc>, window_params = [{transform_indices = @transform_0, window_bounds = array<i64: 1, 8, 64>}, {transform_indices = @transform_1, window_bounds = array<i64: 1, 8, 64>}, {transform_indices = @transform_2, window_bounds = array<i64: 1, 8, 64>}, {transform_indices = @transform_3, window_bounds = array<i64: 1, 8, 64>}, {pipeline_mode = #tpu.pipeline_mode<synchronous>, transform_indices = @transform_4, window_bounds = array<i64: 64, 64>}, {pipeline_mode = #tpu.pipeline_mode<synchronous>, transform_indices = @transform_5, window_bounds = array<i64: 1, 64>}, {pipeline_mode = #tpu.pipeline_mode<synchronous>, transform_indices = @transform_6, window_bounds = array<i64: 64, 64>}, {pipeline_mode = #tpu.pipeline_mode<synchronous>, transform_indices = @transform_7, window_bounds = array<i64: 1, 64>}, {pipeline_mode = #tpu.pipeline_mode<synchronous>, transform_indices = @transform_8, window_bounds = array<i64: 64, 64>}, {pipeline_mode = #tpu.pipeline_mode<synchronous>, transform_indices = @transform_9, window_bounds = array<i64: 1, 64>}, {pipeline_mode = #tpu.pipeline_mode<synchronous>, transform_indices = @transform_10, window_bounds = array<i64: 64, 64>}, {pipeline_mode = #tpu.pipeline_mode<synchronous>, transform_indices = @transform_11, window_bounds = array<i64: 1, 64>}, {pipeline_mode = #tpu.pipeline_mode<synchronous>, transform_indices = @transform_12, window_bounds = array<i64: 1, 64>}, {pipeline_mode = #tpu.pipeline_mode<synchronous>, transform_indices = @transform_13, window_bounds = array<i64: 1, 64>}, {transform_indices = @transform_14, window_bounds = array<i64: 1, 8, 64>}]} {
    %c0 = arith.constant 0 : index
    %c0_0 = arith.constant 0 : index
    %c0_1 = arith.constant 0 : index
    %0 = vector.load %arg1[%c0, %c0_0, %c0_1] : memref<1x8x64xf32, #tpu.memory_space<vmem>>, vector<1x8x64xf32>
    %1 = vector.shape_cast %0 : vector<1x8x64xf32> to vector<8x64xf32>
    %c0_2 = arith.constant 0 : index
    %c0_3 = arith.constant 0 : index
    %c0_4 = arith.constant 0 : index
    %2 = vector.load %arg2[%c0_2, %c0_3, %c0_4] : memref<1x8x64xf32, #tpu.memory_space<vmem>>, vector<1x8x64xf32>
    %3 = vector.shape_cast %2 : vector<1x8x64xf32> to vector<8x64xf32>
    %4 = arith.addf %1, %3 : vector<8x64xf32>
    %c0_5 = arith.constant 0 : index
    %c0_6 = arith.constant 0 : index
    %c0_7 = arith.constant 0 : index
    %5 = vector.load %arg3[%c0_5, %c0_6, %c0_7] : memref<1x8x64xf32, #tpu.memory_space<vmem>>, vector<1x8x64xf32>
    %6 = vector.shape_cast %5 : vector<1x8x64xf32> to vector<8x64xf32>
    %c0_8 = arith.constant 0 : index
    %c0_9 = arith.constant 0 : index
    %c0_10 = arith.constant 0 : index
    %7 = vector.load %arg4[%c0_8, %c0_9, %c0_10] : memref<1x8x64xf32, #tpu.memory_space<vmem>>, vector<1x8x64xf32>
    %8 = vector.shape_cast %7 : vector<1x8x64xf32> to vector<8x64xf32>
    %9 = arith.addf %6, %8 : vector<8x64xf32>
    %c0_11 = arith.constant 0 : index
    %c0_12 = arith.constant 0 : index
    %10 = vector.load %arg5[%c0_11, %c0_12] : memref<64x64xf32, #tpu.memory_space<vmem>>, vector<64x64xf32>
    %cst = arith.constant dense<0.000000e+00> : vector<8x64xf32>
    %11 = tpu.matmul %4, %10, %cst {dimension_numbers = #tpu.dot_dimension_numbers<[1], [0], [0], [1], [0, 0, 1, 1], [], []>} : vector<8x64xf32>, vector<64x64xf32>, vector<8x64xf32> -> vector<8x64xf32>
    %c0_13 = arith.constant 0 : index
    %c0_14 = arith.constant 0 : index
    %12 = vector.load %arg6[%c0_13, %c0_14] : memref<1x64xf32, #tpu.memory_space<vmem>>, vector<1x64xf32>
    %13 = vector.broadcast %12 : vector<1x64xf32> to vector<8x64xf32>
    %14 = arith.addf %11, %13 : vector<8x64xf32>
    %c0_15 = arith.constant 0 : index
    %c0_16 = arith.constant 0 : index
    %15 = vector.load %arg7[%c0_15, %c0_16] : memref<64x64xf32, #tpu.memory_space<vmem>>, vector<64x64xf32>
    %cst_17 = arith.constant dense<0.000000e+00> : vector<8x64xf32>
    %16 = tpu.matmul %9, %15, %cst_17 {dimension_numbers = #tpu.dot_dimension_numbers<[1], [0], [0], [1], [0, 0, 1, 1], [], []>} : vector<8x64xf32>, vector<64x64xf32>, vector<8x64xf32> -> vector<8x64xf32>
    %c0_18 = arith.constant 0 : index
    %c0_19 = arith.constant 0 : index
    %17 = vector.load %arg8[%c0_18, %c0_19] : memref<1x64xf32, #tpu.memory_space<vmem>>, vector<1x64xf32>
    %18 = vector.broadcast %17 : vector<1x64xf32> to vector<8x64xf32>
    %19 = arith.addf %16, %18 : vector<8x64xf32>
    %c0_20 = arith.constant 0 : index
    %c0_21 = arith.constant 0 : index
    %20 = vector.load %arg9[%c0_20, %c0_21] : memref<64x64xf32, #tpu.memory_space<vmem>>, vector<64x64xf32>
    %cst_22 = arith.constant dense<0.000000e+00> : vector<8x64xf32>
    %21 = tpu.matmul %6, %20, %cst_22 {dimension_numbers = #tpu.dot_dimension_numbers<[1], [0], [0], [1], [0, 0, 1, 1], [], []>} : vector<8x64xf32>, vector<64x64xf32>, vector<8x64xf32> -> vector<8x64xf32>
    %c0_23 = arith.constant 0 : index
    %c0_24 = arith.constant 0 : index
    %22 = vector.load %arg10[%c0_23, %c0_24] : memref<1x64xf32, #tpu.memory_space<vmem>>, vector<1x64xf32>
    %23 = vector.broadcast %22 : vector<1x64xf32> to vector<8x64xf32>
    %24 = arith.addf %21, %23 : vector<8x64xf32>
    %25 = vector.extract_strided_slice %14 {offsets = [0, 0], sizes = [8, 16], strides = [1, 1]} : vector<8x64xf32> to vector<8x16xf32>
    %26 = vector.extract_strided_slice %19 {offsets = [0, 0], sizes = [8, 16], strides = [1, 1]} : vector<8x64xf32> to vector<8x16xf32>
    %27 = vector.extract_strided_slice %24 {offsets = [0, 0], sizes = [8, 16], strides = [1, 1]} : vector<8x64xf32> to vector<8x16xf32>
    %cst_25 = arith.constant dense<0.000000e+00> : vector<8x8xf32>
    %28 = tpu.matmul %25, %26, %cst_25 {dimension_numbers = #tpu.dot_dimension_numbers<[1], [1], [0], [0], [0, 0, 1, 0], [], []>} : vector<8x16xf32>, vector<8x16xf32>, vector<8x8xf32> -> vector<8x8xf32>
    %cst_26 = arith.constant 2.500000e-01 : f32
    %29 = vector.broadcast %cst_26 : f32 to vector<8x8xf32>
    %30 = arith.mulf %28, %29 : vector<8x8xf32>
    %cst_27 = arith.constant dense<0xFF800000> : vector<8xf32>
    %31 = vector.multi_reduction <maximumf>, %30, %cst_27 [1] : vector<8x8xf32> to vector<8xf32>
    %32 = vector.shape_cast %31 : vector<8xf32> to vector<8x1xf32>
    %33 = vector.broadcast %32 : vector<8x1xf32> to vector<8x8xf32>
    %34 = arith.subf %30, %33 : vector<8x8xf32>
    %35 = math.exp %34 : vector<8x8xf32>
    %cst_28 = arith.constant dense<0.000000e+00> : vector<8xf32>
    %36 = vector.multi_reduction <add>, %35, %cst_28 [1] : vector<8x8xf32> to vector<8xf32>
    %37 = vector.shape_cast %36 : vector<8xf32> to vector<8x1xf32>
    %38 = tpu.reciprocal %37 {approx = true} : vector<8x1xf32> -> vector<8x1xf32>
    %39 = vector.broadcast %38 : vector<8x1xf32> to vector<8x8xf32>
    %40 = arith.mulf %35, %39 : vector<8x8xf32>
    %cst_29 = arith.constant dense<0.000000e+00> : vector<8x16xf32>
    %41 = tpu.matmul %40, %27, %cst_29 {dimension_numbers = #tpu.dot_dimension_numbers<[1], [0], [0], [1], [0, 0, 1, 1], [], []>} : vector<8x8xf32>, vector<8x16xf32>, vector<8x16xf32> -> vector<8x16xf32>
    %42 = vector.extract_strided_slice %14 {offsets = [0, 16], sizes = [8, 16], strides = [1, 1]} : vector<8x64xf32> to vector<8x16xf32>
    %43 = vector.extract_strided_slice %19 {offsets = [0, 16], sizes = [8, 16], strides = [1, 1]} : vector<8x64xf32> to vector<8x16xf32>
    %44 = vector.extract_strided_slice %24 {offsets = [0, 16], sizes = [8, 16], strides = [1, 1]} : vector<8x64xf32> to vector<8x16xf32>
    %cst_30 = arith.constant dense<0.000000e+00> : vector<8x8xf32>
    %45 = tpu.matmul %42, %43, %cst_30 {dimension_numbers = #tpu.dot_dimension_numbers<[1], [1], [0], [0], [0, 0, 1, 0], [], []>} : vector<8x16xf32>, vector<8x16xf32>, vector<8x8xf32> -> vector<8x8xf32>
    %cst_31 = arith.constant 2.500000e-01 : f32
    %46 = vector.broadcast %cst_31 : f32 to vector<8x8xf32>
    %47 = arith.mulf %45, %46 : vector<8x8xf32>
    %cst_32 = arith.constant dense<0xFF800000> : vector<8xf32>
    %48 = vector.multi_reduction <maximumf>, %47, %cst_32 [1] : vector<8x8xf32> to vector<8xf32>
    %49 = vector.shape_cast %48 : vector<8xf32> to vector<8x1xf32>
    %50 = vector.broadcast %49 : vector<8x1xf32> to vector<8x8xf32>
    %51 = arith.subf %47, %50 : vector<8x8xf32>
    %52 = math.exp %51 : vector<8x8xf32>
    %cst_33 = arith.constant dense<0.000000e+00> : vector<8xf32>
    %53 = vector.multi_reduction <add>, %52, %cst_33 [1] : vector<8x8xf32> to vector<8xf32>
    %54 = vector.shape_cast %53 : vector<8xf32> to vector<8x1xf32>
    %55 = tpu.reciprocal %54 {approx = true} : vector<8x1xf32> -> vector<8x1xf32>
    %56 = vector.broadcast %55 : vector<8x1xf32> to vector<8x8xf32>
    %57 = arith.mulf %52, %56 : vector<8x8xf32>
    %cst_34 = arith.constant dense<0.000000e+00> : vector<8x16xf32>
    %58 = tpu.matmul %57, %44, %cst_34 {dimension_numbers = #tpu.dot_dimension_numbers<[1], [0], [0], [1], [0, 0, 1, 1], [], []>} : vector<8x8xf32>, vector<8x16xf32>, vector<8x16xf32> -> vector<8x16xf32>
    %59 = vector.extract_strided_slice %14 {offsets = [0, 32], sizes = [8, 16], strides = [1, 1]} : vector<8x64xf32> to vector<8x16xf32>
    %60 = vector.extract_strided_slice %19 {offsets = [0, 32], sizes = [8, 16], strides = [1, 1]} : vector<8x64xf32> to vector<8x16xf32>
    %61 = vector.extract_strided_slice %24 {offsets = [0, 32], sizes = [8, 16], strides = [1, 1]} : vector<8x64xf32> to vector<8x16xf32>
    %cst_35 = arith.constant dense<0.000000e+00> : vector<8x8xf32>
    %62 = tpu.matmul %59, %60, %cst_35 {dimension_numbers = #tpu.dot_dimension_numbers<[1], [1], [0], [0], [0, 0, 1, 0], [], []>} : vector<8x16xf32>, vector<8x16xf32>, vector<8x8xf32> -> vector<8x8xf32>
    %cst_36 = arith.constant 2.500000e-01 : f32
    %63 = vector.broadcast %cst_36 : f32 to vector<8x8xf32>
    %64 = arith.mulf %62, %63 : vector<8x8xf32>
    %cst_37 = arith.constant dense<0xFF800000> : vector<8xf32>
    %65 = vector.multi_reduction <maximumf>, %64, %cst_37 [1] : vector<8x8xf32> to vector<8xf32>
    %66 = vector.shape_cast %65 : vector<8xf32> to vector<8x1xf32>
    %67 = vector.broadcast %66 : vector<8x1xf32> to vector<8x8xf32>
    %68 = arith.subf %64, %67 : vector<8x8xf32>
    %69 = math.exp %68 : vector<8x8xf32>
    %cst_38 = arith.constant dense<0.000000e+00> : vector<8xf32>
    %70 = vector.multi_reduction <add>, %69, %cst_38 [1] : vector<8x8xf32> to vector<8xf32>
    %71 = vector.shape_cast %70 : vector<8xf32> to vector<8x1xf32>
    %72 = tpu.reciprocal %71 {approx = true} : vector<8x1xf32> -> vector<8x1xf32>
    %73 = vector.broadcast %72 : vector<8x1xf32> to vector<8x8xf32>
    %74 = arith.mulf %69, %73 : vector<8x8xf32>
    %cst_39 = arith.constant dense<0.000000e+00> : vector<8x16xf32>
    %75 = tpu.matmul %74, %61, %cst_39 {dimension_numbers = #tpu.dot_dimension_numbers<[1], [0], [0], [1], [0, 0, 1, 1], [], []>} : vector<8x8xf32>, vector<8x16xf32>, vector<8x16xf32> -> vector<8x16xf32>
    %76 = vector.extract_strided_slice %14 {offsets = [0, 48], sizes = [8, 16], strides = [1, 1]} : vector<8x64xf32> to vector<8x16xf32>
    %77 = vector.extract_strided_slice %19 {offsets = [0, 48], sizes = [8, 16], strides = [1, 1]} : vector<8x64xf32> to vector<8x16xf32>
    %78 = vector.extract_strided_slice %24 {offsets = [0, 48], sizes = [8, 16], strides = [1, 1]} : vector<8x64xf32> to vector<8x16xf32>
    %cst_40 = arith.constant dense<0.000000e+00> : vector<8x8xf32>
    %79 = tpu.matmul %76, %77, %cst_40 {dimension_numbers = #tpu.dot_dimension_numbers<[1], [1], [0], [0], [0, 0, 1, 0], [], []>} : vector<8x16xf32>, vector<8x16xf32>, vector<8x8xf32> -> vector<8x8xf32>
    %cst_41 = arith.constant 2.500000e-01 : f32
    %80 = vector.broadcast %cst_41 : f32 to vector<8x8xf32>
    %81 = arith.mulf %79, %80 : vector<8x8xf32>
    %cst_42 = arith.constant dense<0xFF800000> : vector<8xf32>
    %82 = vector.multi_reduction <maximumf>, %81, %cst_42 [1] : vector<8x8xf32> to vector<8xf32>
    %83 = vector.shape_cast %82 : vector<8xf32> to vector<8x1xf32>
    %84 = vector.broadcast %83 : vector<8x1xf32> to vector<8x8xf32>
    %85 = arith.subf %81, %84 : vector<8x8xf32>
    %86 = math.exp %85 : vector<8x8xf32>
    %cst_43 = arith.constant dense<0.000000e+00> : vector<8xf32>
    %87 = vector.multi_reduction <add>, %86, %cst_43 [1] : vector<8x8xf32> to vector<8xf32>
    %88 = vector.shape_cast %87 : vector<8xf32> to vector<8x1xf32>
    %89 = tpu.reciprocal %88 {approx = true} : vector<8x1xf32> -> vector<8x1xf32>
    %90 = vector.broadcast %89 : vector<8x1xf32> to vector<8x8xf32>
    %91 = arith.mulf %86, %90 : vector<8x8xf32>
    %cst_44 = arith.constant dense<0.000000e+00> : vector<8x16xf32>
    %92 = tpu.matmul %91, %78, %cst_44 {dimension_numbers = #tpu.dot_dimension_numbers<[1], [0], [0], [1], [0, 0, 1, 1], [], []>} : vector<8x8xf32>, vector<8x16xf32>, vector<8x16xf32> -> vector<8x16xf32>
    %93 = tpu.concatenate %41, %58, %75, %92 in 1 : vector<8x16xf32>, vector<8x16xf32>, vector<8x16xf32>, vector<8x16xf32> -> vector<8x64xf32>
    %c0_45 = arith.constant 0 : index
    %c0_46 = arith.constant 0 : index
    %94 = vector.load %arg11[%c0_45, %c0_46] : memref<64x64xf32, #tpu.memory_space<vmem>>, vector<64x64xf32>
    %cst_47 = arith.constant dense<0.000000e+00> : vector<8x64xf32>
    %95 = tpu.matmul %93, %94, %cst_47 {dimension_numbers = #tpu.dot_dimension_numbers<[1], [0], [0], [1], [0, 0, 1, 1], [], []>} : vector<8x64xf32>, vector<64x64xf32>, vector<8x64xf32> -> vector<8x64xf32>
    %c0_48 = arith.constant 0 : index
    %c0_49 = arith.constant 0 : index
    %96 = vector.load %arg12[%c0_48, %c0_49] : memref<1x64xf32, #tpu.memory_space<vmem>>, vector<1x64xf32>
    %97 = vector.broadcast %96 : vector<1x64xf32> to vector<8x64xf32>
    %98 = arith.addf %95, %97 : vector<8x64xf32>
    %99 = arith.addf %98, %1 : vector<8x64xf32>
    %c0_50 = arith.constant 0 : index
    %c0_51 = arith.constant 0 : index
    %100 = vector.load %arg13[%c0_50, %c0_51] : memref<1x64xf32, #tpu.memory_space<vmem>>, vector<1x64xf32>
    %c0_52 = arith.constant 0 : index
    %c0_53 = arith.constant 0 : index
    %101 = vector.load %arg14[%c0_52, %c0_53] : memref<1x64xf32, #tpu.memory_space<vmem>>, vector<1x64xf32>
    %cst_54 = arith.constant dense<0.000000e+00> : vector<8xf32>
    %102 = vector.multi_reduction <add>, %99, %cst_54 [1] : vector<8x64xf32> to vector<8xf32>
    %103 = vector.shape_cast %102 : vector<8xf32> to vector<8x1xf32>
    %cst_55 = arith.constant 6.400000e+01 : f32
    %104 = vector.broadcast %cst_55 : f32 to vector<8x1xf32>
    %105 = arith.divf %103, %104 : vector<8x1xf32>
    %106 = vector.broadcast %105 : vector<8x1xf32> to vector<8x64xf32>
    %107 = arith.subf %99, %106 : vector<8x64xf32>
    %108 = arith.mulf %107, %107 : vector<8x64xf32>
    %cst_56 = arith.constant dense<0.000000e+00> : vector<8xf32>
    %109 = vector.multi_reduction <add>, %108, %cst_56 [1] : vector<8x64xf32> to vector<8xf32>
    %110 = vector.shape_cast %109 : vector<8xf32> to vector<8x1xf32>
    %cst_57 = arith.constant 6.400000e+01 : f32
    %111 = vector.broadcast %cst_57 : f32 to vector<8x1xf32>
    %112 = arith.divf %110, %111 : vector<8x1xf32>
    %cst_58 = arith.constant 9.99999974E-6 : f32
    %113 = vector.broadcast %cst_58 : f32 to vector<8x1xf32>
    %114 = arith.addf %112, %113 : vector<8x1xf32>
    %115 = math.rsqrt %114 : vector<8x1xf32>
    %116 = vector.broadcast %115 : vector<8x1xf32> to vector<8x64xf32>
    %117 = arith.mulf %107, %116 : vector<8x64xf32>
    %118 = vector.broadcast %100 : vector<1x64xf32> to vector<8x64xf32>
    %119 = arith.mulf %117, %118 : vector<8x64xf32>
    %120 = vector.broadcast %101 : vector<1x64xf32> to vector<8x64xf32>
    %121 = arith.addf %119, %120 : vector<8x64xf32>
    %c0_59 = arith.constant 0 : index
    %c0_60 = arith.constant 0 : index
    %c0_61 = arith.constant 0 : index
    %122 = vector.load %arg15[%c0_59, %c0_60, %c0_61] : memref<1x8x64xf32, #tpu.memory_space<vmem>>, vector<1x8x64xf32>
    %123 = vector.shape_cast %122 : vector<1x8x64xf32> to vector<8x64xf32>
    %124 = vector.shape_cast %121 : vector<8x64xf32> to vector<1x8x64xf32>
    tpu.vector_store %arg15[%c0_59, %c0_60, %c0_61], %124 {strides = array<i32>} : memref<1x8x64xf32, #tpu.memory_space<vmem>>, vector<1x8x64xf32>,
    return
  }
  func.func @transform_0(%arg0: i32) -> (i32, i32, i32) {
    %c0_i32 = arith.constant 0 : i32
    %c0_i32_0 = arith.constant 0 : i32
    %c0_i32_1 = arith.constant 0 : i32
    return %arg0, %c0_i32, %c0_i32_0 : i32, i32, i32
  }
  func.func @transform_1(%arg0: i32) -> (i32, i32, i32) {
    %c0_i32 = arith.constant 0 : i32
    %c0_i32_0 = arith.constant 0 : i32
    %c0_i32_1 = arith.constant 0 : i32
    return %arg0, %c0_i32, %c0_i32_0 : i32, i32, i32
  }
  func.func @transform_2(%arg0: i32) -> (i32, i32, i32) {
    %c0_i32 = arith.constant 0 : i32
    %c0_i32_0 = arith.constant 0 : i32
    %c0_i32_1 = arith.constant 0 : i32
    return %arg0, %c0_i32, %c0_i32_0 : i32, i32, i32
  }
  func.func @transform_3(%arg0: i32) -> (i32, i32, i32) {
    %c0_i32 = arith.constant 0 : i32
    %c0_i32_0 = arith.constant 0 : i32
    %c0_i32_1 = arith.constant 0 : i32
    return %arg0, %c0_i32, %c0_i32_0 : i32, i32, i32
  }
  func.func @transform_4(%arg0: i32) -> (i32, i32) {
    %c0_i32 = arith.constant 0 : i32
    %c0_i32_0 = arith.constant 0 : i32
    %c0_i32_1 = arith.constant 0 : i32
    return %c0_i32, %c0_i32_0 : i32, i32
  }
  func.func @transform_5(%arg0: i32) -> (i32, i32) {
    %c0_i32 = arith.constant 0 : i32
    %c0_i32_0 = arith.constant 0 : i32
    %c0_i32_1 = arith.constant 0 : i32
    return %c0_i32, %c0_i32_0 : i32, i32
  }
  func.func @transform_6(%arg0: i32) -> (i32, i32) {
    %c0_i32 = arith.constant 0 : i32
    %c0_i32_0 = arith.constant 0 : i32
    %c0_i32_1 = arith.constant 0 : i32
    return %c0_i32, %c0_i32_0 : i32, i32
  }
  func.func @transform_7(%arg0: i32) -> (i32, i32) {
    %c0_i32 = arith.constant 0 : i32
    %c0_i32_0 = arith.constant 0 : i32
    %c0_i32_1 = arith.constant 0 : i32
    return %c0_i32, %c0_i32_0 : i32, i32
  }
  func.func @transform_8(%arg0: i32) -> (i32, i32) {
    %c0_i32 = arith.constant 0 : i32
    %c0_i32_0 = arith.constant 0 : i32
    %c0_i32_1 = arith.constant 0 : i32
    return %c0_i32, %c0_i32_0 : i32, i32
  }
  func.func @transform_9(%arg0: i32) -> (i32, i32) {
    %c0_i32 = arith.constant 0 : i32
    %c0_i32_0 = arith.constant 0 : i32
    %c0_i32_1 = arith.constant 0 : i32
    return %c0_i32, %c0_i32_0 : i32, i32
  }
  func.func @transform_10(%arg0: i32) -> (i32, i32) {
    %c0_i32 = arith.constant 0 : i32
    %c0_i32_0 = arith.constant 0 : i32
    %c0_i32_1 = arith.constant 0 : i32
    return %c0_i32, %c0_i32_0 : i32, i32
  }
  func.func @transform_11(%arg0: i32) -> (i32, i32) {
    %c0_i32 = arith.constant 0 : i32
    %c0_i32_0 = arith.constant 0 : i32
    %c0_i32_1 = arith.constant 0 : i32
    return %c0_i32, %c0_i32_0 : i32, i32
  }
  func.func @transform_12(%arg0: i32) -> (i32, i32) {
    %c0_i32 = arith.constant 0 : i32
    %c0_i32_0 = arith.constant 0 : i32
    %c0_i32_1 = arith.constant 0 : i32
    return %c0_i32, %c0_i32_0 : i32, i32
  }
  func.func @transform_13(%arg0: i32) -> (i32, i32) {
    %c0_i32 = arith.constant 0 : i32
    %c0_i32_0 = arith.constant 0 : i32
    %c0_i32_1 = arith.constant 0 : i32
    return %c0_i32, %c0_i32_0 : i32, i32
  }
  func.func @transform_14(%arg0: i32) -> (i32, i32, i32) {
    %c0_i32 = arith.constant 0 : i32
    %c0_i32_0 = arith.constant 0 : i32
    %c0_i32_1 = arith.constant 0 : i32
    return %arg0, %c0_i32, %c0_i32_0 : i32, i32, i32
  }
}

module attributes {stable_mosaic.version = 11 : i64} {
  func.func @_ffn_block_kernel(%arg0: i32, %arg1: memref<1x8x64xf32, #tpu.memory_space<vmem>>, %arg2: memref<64x32xf32, #tpu.memory_space<vmem>>, %arg3: memref<1x32xf32, #tpu.memory_space<vmem>>, %arg4: memref<32x64xf32, #tpu.memory_space<vmem>>, %arg5: memref<1x64xf32, #tpu.memory_space<vmem>>, %arg6: memref<1x64xf32, #tpu.memory_space<vmem>>, %arg7: memref<1x64xf32, #tpu.memory_space<vmem>>, %arg8: memref<1x64xf32, #tpu.memory_space<vmem>>, %arg9: memref<1x64xf32, #tpu.memory_space<vmem>>, %arg10: memref<1x8x64xf32, #tpu.memory_space<vmem>>) attributes {dimension_semantics = [#tpu.dimension_semantics<parallel>], iteration_bounds = array<i64: 2>, scalar_prefetch = 0 : i64, scratch_operands = 0 : i64, tpu.core_type = #tpu.core_type<tc>, window_params = [{transform_indices = @transform_0, window_bounds = array<i64: 1, 8, 64>}, {pipeline_mode = #tpu.pipeline_mode<synchronous>, transform_indices = @transform_1, window_bounds = array<i64: 64, 32>}, {pipeline_mode = #tpu.pipeline_mode<synchronous>, transform_indices = @transform_2, window_bounds = array<i64: 1, 32>}, {pipeline_mode = #tpu.pipeline_mode<synchronous>, transform_indices = @transform_3, window_bounds = array<i64: 32, 64>}, {pipeline_mode = #tpu.pipeline_mode<synchronous>, transform_indices = @transform_4, window_bounds = array<i64: 1, 64>}, {pipeline_mode = #tpu.pipeline_mode<synchronous>, transform_indices = @transform_5, window_bounds = array<i64: 1, 64>}, {pipeline_mode = #tpu.pipeline_mode<synchronous>, transform_indices = @transform_6, window_bounds = array<i64: 1, 64>}, {pipeline_mode = #tpu.pipeline_mode<synchronous>, transform_indices = @transform_7, window_bounds = array<i64: 1, 64>}, {pipeline_mode = #tpu.pipeline_mode<synchronous>, transform_indices = @transform_8, window_bounds = array<i64: 1, 64>}, {transform_indices = @transform_9, window_bounds = array<i64: 1, 8, 64>}]} {
    %c0 = arith.constant 0 : index
    %c0_0 = arith.constant 0 : index
    %c0_1 = arith.constant 0 : index
    %0 = vector.load %arg1[%c0, %c0_0, %c0_1] : memref<1x8x64xf32, #tpu.memory_space<vmem>>, vector<1x8x64xf32>
    %1 = vector.shape_cast %0 : vector<1x8x64xf32> to vector<8x64xf32>
    %c0_2 = arith.constant 0 : index
    %c0_3 = arith.constant 0 : index
    %2 = vector.load %arg2[%c0_2, %c0_3] : memref<64x32xf32, #tpu.memory_space<vmem>>, vector<64x32xf32>
    %cst = arith.constant dense<0.000000e+00> : vector<8x32xf32>
    %3 = tpu.matmul %1, %2, %cst {dimension_numbers = #tpu.dot_dimension_numbers<[1], [0], [0], [1], [0, 0, 1, 1], [], []>} : vector<8x64xf32>, vector<64x32xf32>, vector<8x32xf32> -> vector<8x32xf32>
    %c0_4 = arith.constant 0 : index
    %c0_5 = arith.constant 0 : index
    %4 = vector.load %arg3[%c0_4, %c0_5] : memref<1x32xf32, #tpu.memory_space<vmem>>, vector<1x32xf32>
    %5 = vector.broadcast %4 : vector<1x32xf32> to vector<8x32xf32>
    %6 = arith.addf %3, %5 : vector<8x32xf32>
    %7 = arith.negf %6 : vector<8x32xf32>
    %8 = math.exp %7 : vector<8x32xf32>
    %cst_6 = arith.constant 1.000000e+00 : f32
    %9 = vector.broadcast %cst_6 : f32 to vector<8x32xf32>
    %10 = arith.addf %9, %8 : vector<8x32xf32>
    %11 = arith.divf %9, %10 : vector<8x32xf32>
    %12 = arith.mulf %6, %11 : vector<8x32xf32>
    %c0_7 = arith.constant 0 : index
    %c0_8 = arith.constant 0 : index
    %13 = vector.load %arg4[%c0_7, %c0_8] : memref<32x64xf32, #tpu.memory_space<vmem>>, vector<32x64xf32>
    %cst_9 = arith.constant dense<0.000000e+00> : vector<8x64xf32>
    %14 = tpu.matmul %12, %13, %cst_9 {dimension_numbers = #tpu.dot_dimension_numbers<[1], [0], [0], [1], [0, 0, 1, 1], [], []>} : vector<8x32xf32>, vector<32x64xf32>, vector<8x64xf32> -> vector<8x64xf32>
    %c0_10 = arith.constant 0 : index
    %c0_11 = arith.constant 0 : index
    %15 = vector.load %arg5[%c0_10, %c0_11] : memref<1x64xf32, #tpu.memory_space<vmem>>, vector<1x64xf32>
    %16 = vector.broadcast %15 : vector<1x64xf32> to vector<8x64xf32>
    %17 = arith.addf %14, %16 : vector<8x64xf32>
    %18 = arith.addf %17, %1 : vector<8x64xf32>
    %c0_12 = arith.constant 0 : index
    %c0_13 = arith.constant 0 : index
    %19 = vector.load %arg6[%c0_12, %c0_13] : memref<1x64xf32, #tpu.memory_space<vmem>>, vector<1x64xf32>
    %c0_14 = arith.constant 0 : index
    %c0_15 = arith.constant 0 : index
    %20 = vector.load %arg7[%c0_14, %c0_15] : memref<1x64xf32, #tpu.memory_space<vmem>>, vector<1x64xf32>
    %cst_16 = arith.constant dense<0.000000e+00> : vector<8xf32>
    %21 = vector.multi_reduction <add>, %18, %cst_16 [1] : vector<8x64xf32> to vector<8xf32>
    %22 = vector.shape_cast %21 : vector<8xf32> to vector<8x1xf32>
    %cst_17 = arith.constant 6.400000e+01 : f32
    %23 = vector.broadcast %cst_17 : f32 to vector<8x1xf32>
    %24 = arith.divf %22, %23 : vector<8x1xf32>
    %25 = vector.broadcast %24 : vector<8x1xf32> to vector<8x64xf32>
    %26 = arith.subf %18, %25 : vector<8x64xf32>
    %27 = arith.mulf %26, %26 : vector<8x64xf32>
    %cst_18 = arith.constant dense<0.000000e+00> : vector<8xf32>
    %28 = vector.multi_reduction <add>, %27, %cst_18 [1] : vector<8x64xf32> to vector<8xf32>
    %29 = vector.shape_cast %28 : vector<8xf32> to vector<8x1xf32>
    %cst_19 = arith.constant 6.400000e+01 : f32
    %30 = vector.broadcast %cst_19 : f32 to vector<8x1xf32>
    %31 = arith.divf %29, %30 : vector<8x1xf32>
    %cst_20 = arith.constant 9.99999974E-6 : f32
    %32 = vector.broadcast %cst_20 : f32 to vector<8x1xf32>
    %33 = arith.addf %31, %32 : vector<8x1xf32>
    %34 = math.rsqrt %33 : vector<8x1xf32>
    %35 = vector.broadcast %34 : vector<8x1xf32> to vector<8x64xf32>
    %36 = arith.mulf %26, %35 : vector<8x64xf32>
    %37 = vector.broadcast %19 : vector<1x64xf32> to vector<8x64xf32>
    %38 = arith.mulf %36, %37 : vector<8x64xf32>
    %39 = vector.broadcast %20 : vector<1x64xf32> to vector<8x64xf32>
    %40 = arith.addf %38, %39 : vector<8x64xf32>
    %c0_21 = arith.constant 0 : index
    %c0_22 = arith.constant 0 : index
    %41 = vector.load %arg8[%c0_21, %c0_22] : memref<1x64xf32, #tpu.memory_space<vmem>>, vector<1x64xf32>
    %c0_23 = arith.constant 0 : index
    %c0_24 = arith.constant 0 : index
    %42 = vector.load %arg9[%c0_23, %c0_24] : memref<1x64xf32, #tpu.memory_space<vmem>>, vector<1x64xf32>
    %cst_25 = arith.constant dense<0.000000e+00> : vector<8xf32>
    %43 = vector.multi_reduction <add>, %40, %cst_25 [1] : vector<8x64xf32> to vector<8xf32>
    %44 = vector.shape_cast %43 : vector<8xf32> to vector<8x1xf32>
    %cst_26 = arith.constant 6.400000e+01 : f32
    %45 = vector.broadcast %cst_26 : f32 to vector<8x1xf32>
    %46 = arith.divf %44, %45 : vector<8x1xf32>
    %47 = vector.broadcast %46 : vector<8x1xf32> to vector<8x64xf32>
    %48 = arith.subf %40, %47 : vector<8x64xf32>
    %49 = arith.mulf %48, %48 : vector<8x64xf32>
    %cst_27 = arith.constant dense<0.000000e+00> : vector<8xf32>
    %50 = vector.multi_reduction <add>, %49, %cst_27 [1] : vector<8x64xf32> to vector<8xf32>
    %51 = vector.shape_cast %50 : vector<8xf32> to vector<8x1xf32>
    %cst_28 = arith.constant 6.400000e+01 : f32
    %52 = vector.broadcast %cst_28 : f32 to vector<8x1xf32>
    %53 = arith.divf %51, %52 : vector<8x1xf32>
    %cst_29 = arith.constant 9.99999974E-6 : f32
    %54 = vector.broadcast %cst_29 : f32 to vector<8x1xf32>
    %55 = arith.addf %53, %54 : vector<8x1xf32>
    %56 = math.rsqrt %55 : vector<8x1xf32>
    %57 = vector.broadcast %56 : vector<8x1xf32> to vector<8x64xf32>
    %58 = arith.mulf %48, %57 : vector<8x64xf32>
    %59 = vector.broadcast %41 : vector<1x64xf32> to vector<8x64xf32>
    %60 = arith.mulf %58, %59 : vector<8x64xf32>
    %61 = vector.broadcast %42 : vector<1x64xf32> to vector<8x64xf32>
    %62 = arith.addf %60, %61 : vector<8x64xf32>
    %c0_30 = arith.constant 0 : index
    %c0_31 = arith.constant 0 : index
    %c0_32 = arith.constant 0 : index
    %63 = vector.load %arg10[%c0_30, %c0_31, %c0_32] : memref<1x8x64xf32, #tpu.memory_space<vmem>>, vector<1x8x64xf32>
    %64 = vector.shape_cast %63 : vector<1x8x64xf32> to vector<8x64xf32>
    %65 = vector.shape_cast %62 : vector<8x64xf32> to vector<1x8x64xf32>
    tpu.vector_store %arg10[%c0_30, %c0_31, %c0_32], %65 {strides = array<i32>} : memref<1x8x64xf32, #tpu.memory_space<vmem>>, vector<1x8x64xf32>,
    return
  }
  func.func @transform_0(%arg0: i32) -> (i32, i32, i32) {
    %c0_i32 = arith.constant 0 : i32
    %c0_i32_0 = arith.constant 0 : i32
    %c0_i32_1 = arith.constant 0 : i32
    return %arg0, %c0_i32, %c0_i32_0 : i32, i32, i32
  }
  func.func @transform_1(%arg0: i32) -> (i32, i32) {
    %c0_i32 = arith.constant 0 : i32
    %c0_i32_0 = arith.constant 0 : i32
    %c0_i32_1 = arith.constant 0 : i32
    return %c0_i32, %c0_i32_0 : i32, i32
  }
  func.func @transform_2(%arg0: i32) -> (i32, i32) {
    %c0_i32 = arith.constant 0 : i32
    %c0_i32_0 = arith.constant 0 : i32
    %c0_i32_1 = arith.constant 0 : i32
    return %c0_i32, %c0_i32_0 : i32, i32
  }
  func.func @transform_3(%arg0: i32) -> (i32, i32) {
    %c0_i32 = arith.constant 0 : i32
    %c0_i32_0 = arith.constant 0 : i32
    %c0_i32_1 = arith.constant 0 : i32
    return %c0_i32, %c0_i32_0 : i32, i32
  }
  func.func @transform_4(%arg0: i32) -> (i32, i32) {
    %c0_i32 = arith.constant 0 : i32
    %c0_i32_0 = arith.constant 0 : i32
    %c0_i32_1 = arith.constant 0 : i32
    return %c0_i32, %c0_i32_0 : i32, i32
  }
  func.func @transform_5(%arg0: i32) -> (i32, i32) {
    %c0_i32 = arith.constant 0 : i32
    %c0_i32_0 = arith.constant 0 : i32
    %c0_i32_1 = arith.constant 0 : i32
    return %c0_i32, %c0_i32_0 : i32, i32
  }
  func.func @transform_6(%arg0: i32) -> (i32, i32) {
    %c0_i32 = arith.constant 0 : i32
    %c0_i32_0 = arith.constant 0 : i32
    %c0_i32_1 = arith.constant 0 : i32
    return %c0_i32, %c0_i32_0 : i32, i32
  }
  func.func @transform_7(%arg0: i32) -> (i32, i32) {
    %c0_i32 = arith.constant 0 : i32
    %c0_i32_0 = arith.constant 0 : i32
    %c0_i32_1 = arith.constant 0 : i32
    return %c0_i32, %c0_i32_0 : i32, i32
  }
  func.func @transform_8(%arg0: i32) -> (i32, i32) {
    %c0_i32 = arith.constant 0 : i32
    %c0_i32_0 = arith.constant 0 : i32
    %c0_i32_1 = arith.constant 0 : i32
    return %c0_i32, %c0_i32_0 : i32, i32
  }
  func.func @transform_9(%arg0: i32) -> (i32, i32, i32) {
    %c0_i32 = arith.constant 0 : i32
    %c0_i32_0 = arith.constant 0 : i32
    %c0_i32_1 = arith.constant 0 : i32
    return %arg0, %c0_i32, %c0_i32_0 : i32, i32, i32
  }
}

</mosaic_0001>

<bundles_post_ra>
// kernel: detr_decoder.8
= control target key start
LH: loop header
LB: loop body
LE: loop exit
PB: predicated region body
PF: predicated region fallthrough
CT: control target
= control target key end

     0   :  { %s784_s30 = smov 0   ;;  %s868_s0 = inlined_call_operand.vmem [shape: f32[2,8,64], index: 0, kind: input, shape index: {}]   ;;  %s869_s1 = inlined_call_operand.vmem [shape: f32[64,32], index: 1, kind: input, shape index: {}]   ;;  %s870_s2 = inlined_call_operand.vmem [shape: f32[1,32], index: 2, kind: input, shape index: {}]   ;;  %s871_s3 = inlined_call_operand.vmem [shape: f32[32,64], index: 3, kind: input, shape index: {}]   ;;  %s872_s4 = inlined_call_operand.vmem [shape: f32[1,64], index: 4, kind: input, shape index: {}]   ;;  %s873_s5 = inlined_call_operand.vmem [shape: f32[1,64], index: 5, kind: input, shape index: {}]   ;;  %s874_s6 = inlined_call_operand.vmem [shape: f32[1,64], index: 6, kind: input, shape index: {}]   ;;  %s875_s7 = inlined_call_operand.vmem [shape: f32[1,64], index: 7, kind: input, shape index: {}]   ;;  %s876_s8 = inlined_call_operand.vmem [shape: f32[1,64], index: 8, kind: input, shape index: {}]   ;;  %s877_s9 = inlined_call_operand.vmem [shape: f32[2,8,64], index: 9, kind: output, shape index: {}]  }
   0x1 LB: > { %s624_s10 = sadd.s32 4294967295, %s729_s30   ;;  %p628_p0 = scmp.ge.s32.totalorder %s729_s30, 1  ;;  %s729_s30 = sphi %s784_s30, %s19_s30  }
   0x2   : > { %p286_p1 = scmp.lt.s32.totalorder %s729_s30, 3 }
   0x4   : > { %p287_p2 = pnand %p628_p0, %p286_p1 }
   0x5   : > { %v329_v0 = vld [vmem:[%s869_s1] sm:$0xff] (!%p287_p2)  ;;  %v330_v1 = vld [vmem:[%s869_s1 + $0x8] sm:$0xff] (!%p287_p2)  ;;  %v331_v2 = vld [vmem:[%s869_s1 + $0x10] sm:$0xff] (!%p287_p2)  ;;  %v731_v3 = vmov (!%p287_p2), 0.0|0.0   ;;  %vm732_vm0 = vmmov (!%p287_p2), 0   ;;  %v733_v6 = vmov (!%p287_p2), 0.0  }
   0x6   : > { %290 = sbr.rel (%p287_p2) target bundleno = 1108 (0x454), region = 56  ;;  %686 = vmatprep.subr.bf16.mxu0 (!%p287_p2), %v731_v3  ;;  %v687_v4 = vpack.c.bf16 (!%p287_p2), %v330_v1, %v329_v0  ;;  %v332_v5 = vld [vmem:[%s869_s1 + $0x18] sm:$0xff] (!%p287_p2)  ;;  %672 = vmatprep.mubr.msk.f32.mxu0 (!%p287_p2), %vm732_vm0, %v733_v6  ;;  %p320_p3 = scmp.lt.s32.totalorder (!%p287_p2), %s624_s10, 1  ;;  %v333_v8 = vld [vmem:[%s869_s1 + $0x20] sm:$0xff] (!%p287_p2)  ;;  %v334_v9 = vld [vmem:[%s869_s1 + $0x28] sm:$0xff] (!%p287_p2)  ;;  %vm344_vm1 = vcmask (!%p287_p2), 523264  }
   0x7   : > { %698 = vmatprep.subr.bf16.mxu1 (!%p287_p2), %v731_v3  ;;  %683 = vmatprep.mubr.msk.f32.mxu1 (!%p287_p2), %vm732_vm0, %v733_v6  ;;  %v690_v7 = vpack.c.bf16 (!%p287_p2), %v332_v5, %v331_v2  ;;  %v693_v10 = vpack.c.bf16 (!%p287_p2), %v334_v9, %v333_v8  ;;  %v335_v11 = vld [vmem:[%s869_s1 + $0x30] sm:$0xff] (!%p287_p2)  ;;  %v336_v12 = vld [vmem:[%s869_s1 + $0x38] sm:$0xff] (!%p287_p2)  ;;  %v425_v15 = vld [vmem:[%s871_s3] sm:$0xff] (!%p287_p2)  ;;  %vm436_vm2 = vcmask (!%p287_p2), 261120  }
   0x8   : > { %688 = vmatpush3.bf16.msra.mxu0 (!%p287_p2), %v687_v4  ;;  %v696_v13 = vpack.c.bf16 (!%p287_p2), %v336_v12, %v335_v11  ;;  %v426_v16 = vld [vmem:[%s871_s3 + $0x8] sm:$0xff] (!%p287_p2)  ;;  %v427_v18 = vld [vmem:[%s871_s3 + $0x10] sm:$0xff] (!%p287_p2)  ;;  %v428_v19 = vld [vmem:[%s871_s3 + $0x18] sm:$0xff] (!%p287_p2) }
   0x9   : > { %689 = vmatprep.subr.bf16.mxu0 (!%p287_p2), %v731_v3  ;;  %v699_v17 = vpack.c.bf16 (!%p287_p2), %v426_v16, %v425_v15  ;;  %v702_v20 = vpack.c.bf16 (!%p287_p2), %v428_v19, %v427_v18  ;;  %v631_v21 = vld [vmem:[%s870_s2] ss:$0 sm:$0xff] (!%p287_p2) }
   0xa   : > { %v634_v30 = vld [vmem:[%s872_s4] ss:$0 sm:$0xff] (!%p287_p2) }
   0xb   : > { %700 = vmatpush3.bf16.msra.mxu1 (!%p287_p2), %v699_v17  ;;  %v636_v45 = vld [vmem:[%s873_s5] ss:$0 sm:$0xff] (!%p287_p2) }
   0xc   : > { %691 = vmatpush3.bf16.msra.mxu0 (!%p287_p2), %v690_v7  ;;  %701 = vmatprep.subr.bf16.mxu1 (!%p287_p2), %v731_v3  ;;  %v637_v47 = vld [vmem:[%s874_s6] ss:$0 sm:$0xff] (!%p287_p2) }
   0xd   : > { %s879_s10 = smov (!%p320_p3, %s624_s10), 1  ;;  %692 = vmatprep.subr.bf16.mxu0 %v731_v3  ;;  %v638_v60 = vld [vmem:[%s875_s7] ss:$0 sm:$0xff] }
   0xe   : > { %s629_s27 = sshll.u32 %s879_s10, 3  ;;  %v639_v62 = vld [vmem:[%s876_s8] ss:$0 sm:$0xff] }
   0xf   : > { %s323_s11 = scalar_lea.vmem %s868_s0, %s629_s27  ;;  %703 = vmatpush3.bf16.msra.mxu1 %v702_v20  ;;  %s327_s16 = scalar_lea.vmem %s877_s9, %s629_s27 }
  0x10   : > { %694 = vmatpush3.bf16.msra.mxu0 %v693_v10  ;;  %v328_v14 = vld [vmem:[%s323_s11] sm:$0xff] }
  0x11   : > { %695 = vmatprep.subr.bf16.mxu0 %v731_v3 }
  0x14   : > { %697 = vmatpush3.bf16.msra.mxu0 %v696_v13 }
  0x17   : > { %673 = vmatmul.mubr.msk.f32.vlgmr.msra.gmra.mrb[0].mxu0 %vm344_vm1, %v328_v14 }
  0xea   : > { %v414_v22 = vpop.f32.mrb[0].mxu0 }
  0xeb   : > { %v415_v23 = vadd.f32 %v631_v21, %v414_v22  ;;  %v674_v24 = vpop.f32.mrb[1].mxu0 }
  0xed   : > { %v633_v25 = vmul.f32 -1.442695, %v415_v23 }
  0xef   : > { %715 = vpow2.f32 %v633_v25 }
  0xf9   : > { %v716_v26 = vpop.eup %715 }
  0xfa   : > { %v421_v27 = vadd.f32 1.0, %v716_v26 }
  0xfc   : > { %717 = vrcp.f32 %v421_v27 }
 0x106   : > { %v718_v28 = vpop.eup %717 }
 0x107   : > { %v424_v29 = vmul.f32 %v718_v28, %v415_v23 }
 0x109   : > { %684 = vmatmul.mubr.msk.f32.vlgmr.msra.gmra.mrb[0].mxu1 %vm436_vm2, %v424_v29 }
 0x1dc   : > { %v506_v31 = vpop.f32.mrb[0].mxu1 }
 0x1dd   : > { %v507_v32 = vadd.f32 %v634_v30, %v506_v31  ;;  %v685_v33 = vpop.f32.mrb[1].mxu1 }
 0x1df   : > { %v510_v34 = vadd.f32 %v507_v32, %v328_v14 }
 0x1e1   : > { %v513_v35 = vsel %vm344_vm1, %v510_v34, 0.0 }
 0x1e2   : > { %514 = vadd.xlane.f32.xlu0 %v513_v35 }
 0x26f   : > { %v515_v36 = vpop.xlane.xlu0 %514 }
 0x270   : > { %v517_v37 = vmul.f32 0.015625, %v515_v36 }
 0x272   : > { %v518_v38 = vsub.f32 %v510_v34, %v517_v37 }
 0x274   : > { %v519_v39 = vmul.f32 %v518_v38, %v518_v38 }
 0x276   : > { %v520_v40 = vsel %vm344_vm1, %v519_v39, 0.0 }
 0x277   : > { %521 = vadd.xlane.f32.xlu0 %v520_v40 }
 0x304   : > { %v522_v41 = vpop.xlane.xlu0 %521 }
 0x305   : > { %v523_v42 = vmul.f32 0.015625, %v522_v41 }
 0x307   : > { %v524_v43 = vadd.f32 1e-05, %v523_v42 }
 0x309   : > { %719 = vrsqrt.f32 %v524_v43 }
 0x313   : > { %v720_v44 = vpop.eup %719 }
 0x314   : > { %v526_v46 = vmul.f32 %v720_v44, %v518_v38 }
 0x316   : > { %v533_v48 = vmul.f32 %v636_v45, %v526_v46 }
 0x318   : > { %v540_v49 = vadd.f32 %v637_v47, %v533_v48 }
 0x31a   : > { %v543_v50 = vsel %vm344_vm1, %v540_v49, 0.0 }
 0x31b   : > { %544 = vadd.xlane.f32.xlu1 %v543_v50 }
 0x3a8   : > { %v545_v51 = vpop.xlane.xlu1 %544 }
 0x3a9   : > { %v546_v52 = vmul.f32 0.015625, %v545_v51 }
 0x3ab   : > { %v547_v53 = vsub.f32 %v540_v49, %v546_v52 }
 0x3ad   : > { %v548_v54 = vmul.f32 %v547_v53, %v547_v53 }
 0x3af   : > { %v549_v55 = vsel %vm344_vm1, %v548_v54, 0.0 }
 0x3b0   : > { %550 = vadd.xlane.f32.xlu1 %v549_v55 }
 0x43d   : > { %v551_v56 = vpop.xlane.xlu1 %550 }
 0x43e   : > { %v552_v57 = vmul.f32 0.015625, %v551_v56 }
 0x440   : > { %v553_v58 = vadd.f32 1e-05, %v552_v57 }
 0x442   : > { %721 = vrsqrt.f32 %v553_v58 }
 0x44c   : > { %v722_v59 = vpop.eup %721 }
 0x44d   : > { %v555_v61 = vmul.f32 %v722_v59, %v547_v53 }
 0x44f   : > { %v562_v63 = vmul.f32 %v638_v60, %v555_v61 }
 0x451   : > { %v569_v0 = vadd.f32 %v639_v62, %v562_v63 }
 0x453   : > { %570 = vst.msk [vmem:[%s327_s16] sm:$0xff] %vm344_vm1, %v569_v0 }
 0x454 PF: > { %s19_s30 = sadd.s32 1, %s729_s30  }
 0x455   : > { %p16_p4 = scmp.ge.s32.totalorder %s19_s30, 4  }
 0x457   :  { %18 = sbr.rel (!%p16_p4) target bundleno = 1 (0x1), region = 86 }

// kernel: detr_decoder.7
= control target key start
LH: loop header
LB: loop body
LE: loop exit
PB: predicated region body
PF: predicated region fallthrough
CT: control target
= control target key end

     0   :  { %s2268_s18 = smov 0   ;;  %s2538_s0 = inlined_call_operand.vmem [shape: f32[2,8,64], index: 0, kind: input, shape index: {}]   ;;  %s2539_s1 = inlined_call_operand.vmem [shape: f32[2,8,64], index: 1, kind: input, shape index: {}]   ;;  %s2540_s2 = inlined_call_operand.vmem [shape: f32[2,16,64], index: 2, kind: input, shape index: {}]   ;;  %s2541_s3 = inlined_call_operand.vmem [shape: f32[2,16,64], index: 3, kind: input, shape index: {}]   ;;  %s2542_s4 = inlined_call_operand.vmem [shape: f32[2,1,16], index: 4, kind: input, shape index: {}]   ;;  %s2543_s5 = inlined_call_operand.vmem [shape: f32[64,64], index: 5, kind: input, shape index: {}]   ;;  %s2544_s6 = inlined_call_operand.vmem [shape: f32[1,64], index: 6, kind: input, shape index: {}]   ;;  %s2545_s7 = inlined_call_operand.vmem [shape: f32[64,64], index: 7, kind: input, shape index: {}]   ;;  %s2546_s8 = inlined_call_operand.vmem [shape: f32[1,64], index: 8, kind: input, shape index: {}]   ;;  %s2547_s9 = inlined_call_operand.vmem [shape: f32[64,64], index: 9, kind: input, shape index: {}]   ;;  %s2548_s10 = inlined_call_operand.vmem [shape: f32[1,64], index: 10, kind: input, shape index: {}]   ;;  %s2549_s11 = inlined_call_operand.vmem [shape: f32[64,64], index: 11, kind: input, shape index: {}]   ;;  %s2550_s12 = inlined_call_operand.vmem [shape: f32[1,64], index: 12, kind: input, shape index: {}]   ;;  %s2551_s13 = inlined_call_operand.vmem [shape: f32[1,64], index: 13, kind: input, shape index: {}]   ;;  %s2552_s14 = inlined_call_operand.vmem [shape: f32[1,64], index: 14, kind: input, shape index: {}]   ;;  %s2553_s15 = inlined_call_operand.vmem [shape: f32[2,8,64], index: 15, kind: output, shape index: {}]  }
   0x1 LB: > { %s1783_s19 = sadd.s32 4294967295, %s2177_s18   ;;  %p1787_p0 = scmp.ge.s32.totalorder %s2177_s18, 1  ;;  %s2177_s18 = sphi %s2268_s18, %s25_s18  }
   0x2   : > { %p473_p1 = scmp.lt.s32.totalorder %s2177_s18, 3 }
   0x4   : > { %p474_p2 = pnand %p1787_p0, %p473_p1 }
   0x5   : > { %v659_v0 = vld [vmem:[%s2545_s7] sm:$0xff] (!%p474_p2)  ;;  %v660_v1 = vld [vmem:[%s2545_s7 + $0x8] sm:$0xff] (!%p474_p2)  ;;  %v661_v2 = vld [vmem:[%s2545_s7 + $0x10] sm:$0xff] (!%p474_p2)  ;;  %p536_p3 = scmp.lt.s32.totalorder (!%p474_p2), %s1783_s19, 1  ;;  %v2179_v6 = vmov (!%p474_p2), 0.0|0.0   ;;  %vm2180_vm0 = vmmov (!%p474_p2), 0  }
   0x6   : > { %477 = sbr.rel (%p474_p2) target bundleno = 2723 (0xaa3), region = 80  ;;  %v2034_v3 = vpack.c.bf16 (!%p474_p2), %v660_v1, %v659_v0  ;;  %v662_v4 = vld [vmem:[%s2545_s7 + $0x18] sm:$0xff] (!%p474_p2)  ;;  %v663_v5 = vld [vmem:[%s2545_s7 + $0x20] sm:$0xff] (!%p474_p2)  ;;  %2022 = vmatprep.subr.bf16.mxu0 (!%p474_p2), %v2179_v6  ;;  %v664_v8 = vld [vmem:[%s2545_s7 + $0x28] sm:$0xff] (!%p474_p2)  ;;  %v2181_v11 = vmov (!%p474_p2), 0.0   ;;  %vm585_vm1 = vcmask (!%p474_p2), 523264  }
   0x7   : > { %v2038_v7 = vpack.c.bf16 (!%p474_p2), %v662_v4, %v661_v2  ;;  %v570_v9 = vld [vmem:[%s2543_s5] sm:$0xff] (!%p474_p2)  ;;  %v571_v10 = vld [vmem:[%s2543_s5 + $0x8] sm:$0xff] (!%p474_p2)  ;;  %1906 = vmatprep.mubr.msk.f32.mxu0 (!%p474_p2), %vm2180_vm0, %v2181_v11  ;;  %v572_v13 = vld [vmem:[%s2543_s5 + $0x10] sm:$0xff] (!%p474_p2)  ;;  %v2042_v15 = vpack.c.bf16 (!%p474_p2), %v664_v8, %v663_v5  ;;  %vm852_vm2 = vcmask (!%p474_p2), 130048   ;;  %s2183_s20 = smov (!%p474_p2), 96   ;;  %s2184_s22 = smov (!%p474_p2), 80  }
   0x8   : > { %2035 = vmatprep.subr.bf16.mxu1 (!%p474_p2), %v2034_v3  ;;  %v2023_v12 = vpack.c.bf16 (!%p474_p2), %v571_v10, %v570_v9  ;;  %v573_v14 = vld [vmem:[%s2543_s5 + $0x18] sm:$0xff] (!%p474_p2)  ;;  %v665_v16 = vld [vmem:[%s2545_s7 + $0x30] sm:$0xff] (!%p474_p2)  ;;  %v574_v19 = vld [vmem:[%s2543_s5 + $0x20] sm:$0xff] (!%p474_p2)  ;;  %s2186_s26 = smov (!%p474_p2), 32   ;;  %s2187_s28 = smov (!%p474_p2), 48   ;;  %vm1561_vm4 = vcmask (!%p474_p2), 261120  }
   0x9   : > { %2037 = vmatpush3.bf16.msra.mxu1 (!%p474_p2), %v2034_v3  ;;  %v666_v17 = vld [vmem:[%s2545_s7 + $0x38] sm:$0xff] (!%p474_p2)  ;;  %v2026_v18 = vpack.c.bf16 (!%p474_p2), %v573_v14, %v572_v13  ;;  %v575_v22 = vld [vmem:[%s2543_s5 + $0x28] sm:$0xff] (!%p474_p2)  ;;  %v576_v26 = vld [vmem:[%s2543_s5 + $0x30] sm:$0xff] (!%p474_p2)  ;;  %vm1563_vm5 = vcmask (!%p474_p2), 392192  }
   0xa   : > { %2039 = vmatprep.subr.bf16.mxu1 (!%p474_p2), %v2038_v7  ;;  %2024 = vmatpush3.bf16.msra.mxu0 (!%p474_p2), %v2023_v12  ;;  %v2046_v24 = vpack.c.bf16 (!%p474_p2), %v666_v17, %v665_v16  ;;  %v2029_v25 = vpack.c.bf16 (!%p474_p2), %v575_v22, %v574_v19  ;;  %v577_v27 = vld [vmem:[%s2543_s5 + $0x38] sm:$0xff] (!%p474_p2)  ;;  %v1797_v35 = vld [vmem:[%s2546_s8] ss:$0 sm:$0xff] (!%p474_p2)  ;;  %vm2365_vm3 = vmpackc.low (!%p474_p2), %vm852_vm2, %vm852_vm2 }
   0xb   : > { %2025 = vmatprep.subr.bf16.mxu0 (!%p474_p2), %v2179_v6  ;;  %v2032_v30 = vpack.c.bf16 (!%p474_p2), %v577_v27, %v576_v26  ;;  %v1795_v45 = vld [vmem:[%s2544_s6] ss:$0 sm:$0xff] (!%p474_p2)  ;;  %v756_v48 = vld [vmem:[%s2547_s9 + $0x8] sm:$0xff] (!%p474_p2)  ;;  %v757_v49 = vld [vmem:[%s2547_s9 + $0x10] sm:$0xff] (!%p474_p2) }
   0xc   : > { %v755_v47 = vld [vmem:[%s2547_s9] sm:$0xff] (!%p474_p2)  ;;  %v758_v51 = vld [vmem:[%s2547_s9 + $0x18] sm:$0xff] (!%p474_p2)  ;;  %v760_v54 = vld [vmem:[%s2547_s9 + $0x28] sm:$0xff] (!%p474_p2) }
   0xd   : > { %s2557_s19 = smov (!%p536_p3, %s1783_s19), 1  ;;  %2041 = vmatpush3.bf16.msra.mxu1 %v2038_v7  ;;  %v2050_v50 = vpack.c.bf16 %v756_v48, %v755_v47  ;;  %v2054_v52 = vpack.c.bf16 %v758_v51, %v757_v49  ;;  %v759_v53 = vld [vmem:[%s2547_s9 + $0x20] sm:$0xff]  ;;  %v761_v56 = vld [vmem:[%s2547_s9 + $0x30] sm:$0xff]  ;;  %v762_v57 = vld [vmem:[%s2547_s9 + $0x38] sm:$0xff] }
   0xe   : > { %s1826_s27 = sshll.u32 %s2557_s19, 4  ;;  %s2332_s30 = sshll.u32 %s2557_s19, 3  ;;  %2043 = vmatprep.subr.bf16.mxu1 %v2042_v15  ;;  %2027 = vmatpush3.bf16.msra.mxu0 %v2026_v18  ;;  %v2058_v55 = vpack.c.bf16 %v760_v54, %v759_v53  ;;  %v2062_v58 = vpack.c.bf16 %v762_v57, %v761_v56  ;;  %v1800_v9 = vld [vmem:[%s2548_s10] ss:$0 sm:$0xff] }
   0xf   : > { %s548_s21 = scalar_lea.vmem %s2540_s2, %s1826_s27  ;;  %s553_s24 = scalar_lea.vmem %s2541_s3, %s1826_s27  ;;  %2028 = vmatprep.subr.bf16.mxu0 %v2179_v6 }
  0x10   : > { %v564_v20 = vld [vmem:[%s548_s21] sm:$0xff]  ;;  %s539_s25 = scalar_lea.vmem %s2538_s0, %s2332_s30  ;;  %s543_s29 = scalar_lea.vmem %s2539_s1, %s2332_s30  ;;  %v565_v28 = vld [vmem:[%s548_s21 + $0x8] sm:$0xff] }
  0x11   : > { %v566_v21 = vld [vmem:[%s553_s24] sm:$0xff]  ;;  %2045 = vmatpush3.bf16.msra.mxu1 %v2042_v15  ;;  %v567_v29 = vld [vmem:[%s553_s24 + $0x8] sm:$0xff]  ;;  %s2182_s27 = smov 112   ;;  %s556_s16 = scalar_lea.vmem %s2542_s4, %s2557_s19 }
  0x12   : > { %v568_v23 = vadd.f32 %v566_v21, %v564_v20  ;;  %2047 = vmatprep.subr.bf16.mxu1 %v2046_v24  ;;  %2030 = vmatpush3.bf16.msra.mxu0 %v2029_v25  ;;  %v2350_v31 = vld [vmem:[%s539_s25] sm:$0xff]  ;;  %v569_v33 = vadd.f32 %v567_v29, %v565_v28  ;;  %s2185_s25 = smov 16  }
  0x13   : > { %v562_v32 = vld [vmem:[%s543_s29] sm:$0xff]  ;;  %2031 = vmatprep.subr.bf16.mxu0 %v2179_v6 }
  0x14   : > { %1925 = vmatprep.mubr.msk.f32.mxu1 %vm585_vm1, %v568_v23  ;;  %v563_v34 = vadd.f32 %v562_v32, %v2350_v31  ;;  %v2421_v60 = vld [vmem:[%s556_s16] ss:$0 sm:$0xff] }
  0x15   : > { %2049 = vmatpush3.bf16.msra.mxu1 %v2046_v24 }
  0x16   : > { %2033 = vmatpush3.bf16.msra.mxu0 %v2032_v30  ;;  %2066 = vmatprep.subr.bf16.mxu1 %v2179_v6 }
  0x17   : > { %2051 = vmatprep.subr.bf16.mxu0 %v2050_v50 }
  0x18   : > { %1926 = vmatmul.mubr.msk.f32.vlgmr.msra.gmra.mrb[0].mxu1 %vm585_vm1, %v569_v33 }
  0x19   : > { %1907 = vmatmul.mubr.msk.f32.vlgmr.msra.gmra.mrb[0].mxu0 %vm585_vm1, %v563_v34  ;;  %1951 = vmatprep.mubr.msk.f32.mxu1 %vm2180_vm0, %v2181_v11 }
  0x1a   : > { %1944 = vmatprep.mubr.msk.f32.mxu0 %vm585_vm1, %v564_v20  ;;  %2053 = vmatpush3.bf16.msra.mxu0 %v2050_v50 }
  0x1b   : > { %2055 = vmatprep.subr.bf16.mxu0 %v2054_v52 }
  0x1e   : > { %2057 = vmatpush3.bf16.msra.mxu0 %v2054_v52 }
  0x1f   : > { %2059 = vmatprep.subr.bf16.mxu0 %v2058_v55 }
  0x22   : > { %2061 = vmatpush3.bf16.msra.mxu0 %v2058_v55 }
  0x23   : > { %2063 = vmatprep.subr.bf16.mxu0 %v2062_v58 }
  0x26   : > { %2065 = vmatpush3.bf16.msra.mxu0 %v2062_v58 }
  0x27   : > { %2077 = vmatprep.subr.bf16.mxu0 %v2179_v6 }
  0x29   : > { %1945 = vmatmul.mubr.msk.f32.vlgmr.msra.gmra.mrb[2].mxu0 %vm585_vm1, %v565_v28 }
  0x2a   : > { %1972 = vmatprep.mubr.msk.f32.mxu0 %vm2180_vm0, %v2181_v11 }
  0xeb   : > { %v1927_v36 = vpop.f32.mrb[0].mxu1 }
  0xec   : > { %v752_v37 = vadd.f32 %v1927_v36, %v1797_v35  ;;  %v746_v38 = vpop.f32.mrb[1].mxu1  ;;  %v655_v39 = vpop.f32.mrb[0].mxu0 }
  0xed   : > { %v747_v40 = vadd.f32 %v1797_v35, %v746_v38  ;;  %v1908_v41 = vpop.f32.mrb[1].mxu0  ;;  %v2379_v46 = vadd.f32 %v1795_v45, %v655_v39 }
  0xef   : > { %v2067_v43 = vpack.c.bf16 %v752_v37, %v747_v40  ;;  %v2369_v44 = vpack.i.bf16 %v752_v37, %v747_v40 }
  0xf1   : > { %2124 = vrot.lane.b32.xlu1 %v2369_v44, %s2182_s27  ;;  %2069 = vmatpush3.bf16.xpose.msk.msra.mxu1 %vm2365_vm3, %v2067_v43 }
  0xf2   : > { %2070 = vmatprep.subr.bf16.mxu1 %v2179_v6 }
  0xf5   : > { %2129 = vrot.lane.b32.xlu1 %v2369_v44, %s2183_s20 }
  0xf8   : > { %1952 = vmatmul.mubr.msk.f32.vlgmr.msra.gmra.mrb[2].mxu1 %vm852_vm2, %v2379_v46 }
  0xf9   : > { %1200 = vrot.lane.b32.xlu1 %v2379_v46, %s2183_s20  ;;  %1958 = vmatprep.mubr.msk.f32.mxu1 %vm2180_vm0, %v2181_v11 }
  0xfc   : > { %v1946_v1 = vpop.f32.mrb[2].mxu0 }
  0xfd   : > { %v842_v2 = vpop.f32.mrb[3].mxu0  ;;  %v848_v10 = vadd.f32 %v1946_v1, %v1800_v9 }
  0xfe   : > { %v843_v12 = vadd.f32 %v1800_v9, %v842_v2 }
 0x100   : > { %v2071_v13 = vpack.c.bf16 %v848_v10, %v843_v12  ;;  %v2429_v14 = vpack.i.bf16 %v848_v10, %v843_v12 }
 0x102   : > { %2072 = vmatpush3.bf16.msra.mxu1 %v2071_v13 }
 0x103   : > { %2073 = vmatprep.subr.bf16.mxu1 %v2179_v6 }
 0x163   : > { %v2125_v16 = vpop.permute.xlu1 %2124 }
 0x164   : > { %v2127_v17 = vunpack.i.h.bf16 %v2125_v16  ;;  %v2126_v18 = vunpack.i.l.bf16 %v2125_v16 }
 0x166   : > { %v2074_v21 = vpack.c.bf16 %v2127_v17, %v2126_v18 }
 0x167   : > { %v2130_v22 = vpop.permute.xlu1 %2129 }
 0x168   : > { %v2132_v23 = vunpack.i.h.bf16 %v2130_v22  ;;  %v2131_v24 = vunpack.i.l.bf16 %v2130_v22 }
 0x16a   : > { %v2081_v25 = vpack.c.bf16 %v2132_v23, %v2131_v24 }
 0x16b   : > { %v1201_v27 = vpop.permute.xlu1 %1200 }
 0x1cb   : > { %v928_v59 = vpop.f32.mrb[2].mxu1 }
 0x1cc   : > { %v932_v61 = vmul.f32 0.25, %v928_v59  ;;  %v1953_v62 = vpop.f32.mrb[3].mxu1 }
 0x1ce   : > { %v939_v63 = vadd.f32 %v2421_v60, %v932_v61 }
 0x1d0   : > { %v940_v0 = vsel %vm852_vm2, %v939_v63, -inf }
 0x1d1   : > { %941 = vmax.xlane.f32.xlu0 %v940_v0 }
 0x25e   : > { %v942_v3 = vpop.xlane.xlu0 %941 }
 0x25f   : > { %v943_v4 = vsub.f32 %v939_v63, %v942_v3 }
 0x261   : > { %v944_v5 = vmul.f32 1.442695, %v943_v4 }
 0x263   : > { %2153 = vpow2.f32 %v944_v5 }
 0x26d   : > { %v2154_v7 = vpop.eup %2153 }
 0x26e   : > { %v946_v8 = vsel %vm852_vm2, %v2154_v7, 0.0 }
 0x26f   : > { %947 = vadd.xlane.f32.xlu0 %v946_v8 }
 0x285   : > { %1024 = vrot.lane.b32.xlu0 %v2379_v46, %s2182_s27 }
 0x2fc   : > { %v948_v15 = vpop.xlane.xlu0 %947 }
 0x2fd   : > { %2155 = vrcp.f32 %v948_v15 }
 0x300   : > { %v1025_v26 = vpop.permute.xlu0 %1024 }
 0x307   : > { %v2156_v19 = vpop.eup %2155 }
 0x308   : > { %v950_v20 = vmul.f32 %v2156_v19, %v2154_v7 }
 0x30a   : > { %1959 = vmatmul.mubr.msk.f32.vlgmr.msra.gmra.mrb[4].mxu1 %vm852_vm2, %v950_v20 }
 0x30b   : > { %2076 = vmatpush3.bf16.xpose.msk.msra.mxu1 %vm2365_vm3, %v2074_v21  ;;  %1965 = vmatprep.mubr.msk.f32.mxu1 %vm2180_vm0, %v2181_v11 }
 0x30c   : > { %2080 = vmatprep.subr.bf16.mxu1 %v2179_v6 }
 0x312   : > { %1966 = vmatmul.mubr.msk.f32.vlgmr.msra.gmra.mrb[6].mxu1 %vm852_vm2, %v1025_v26 }
 0x313   : > { %2083 = vmatpush3.bf16.xpose.msk.msra.mxu1 %vm2365_vm3, %v2081_v25  ;;  %1979 = vmatprep.mubr.msk.f32.mxu1 %vm2180_vm0, %v2181_v11 }
 0x314   : > { %2084 = vmatprep.subr.bf16.mxu1 %v2179_v6 }
 0x31a   : > { %1980 = vmatmul.mubr.msk.f32.vlgmr.msra.gmra.mrb[8].mxu1 %vm852_vm2, %v1201_v27  ;;  %v1565_v27 = vld [vmem:[%s2549_s11] sm:$0xff] }
 0x31b   : > { %1986 = vmatprep.mubr.msk.f32.mxu1 %vm2180_vm0, %v2181_v11 }
 0x3dd   : > { %v2449_v28 = vpop.f32.mrb[4].mxu1 }
 0x3de   : > { %v1960_v29 = vpop.f32.mrb[5].mxu1 }
 0x3df   : > { %v1566_v29 = vld [vmem:[%s2549_s11 + $0x8] sm:$0xff] }
 0x3e5   : > { %v1102_v30 = vpop.f32.mrb[6].mxu1 }
 0x3e6   : > { %v1967_v32 = vpop.f32.mrb[7].mxu1  ;;  %v1106_v38 = vmul.f32 0.25, %v1102_v30  ;;  %v1567_v30 = vld [vmem:[%s2549_s11 + $0x10] sm:$0xff] }
 0x3e7   : > { %v2095_v32 = vpack.c.bf16 %v1566_v29, %v1565_v27 }
 0x3e8   : > { %v1107_v39 = vadd.f32 %v2421_v60, %v1106_v38  ;;  %v1572_v38 = vld [vmem:[%s2549_s11 + $0x38] sm:$0xff] }
 0x3ea   : > { %v1108_v40 = vsel %vm852_vm2, %v1107_v39, -inf }
 0x3ed   : > { %v1278_v33 = vpop.f32.mrb[8].mxu1 }
 0x3ee   : > { %v1282_v34 = vmul.f32 0.25, %v1278_v33  ;;  %v1981_v35 = vpop.f32.mrb[9].mxu1  ;;  %v1568_v33 = vld [vmem:[%s2549_s11 + $0x18] sm:$0xff] }
 0x3ef   : > { %v1570_v35 = vld [vmem:[%s2549_s11 + $0x28] sm:$0xff] }
 0x3f0   : > { %v1283_v36 = vadd.f32 %v2421_v60, %v1282_v34  ;;  %v2098_v34 = vpack.c.bf16 %v1568_v33, %v1567_v30 }
 0x3f2   : > { %v1284_v37 = vsel %vm852_vm2, %v1283_v36, -inf }
 0x3f3   : > { %1285 = vmax.xlane.f32.xlu1 %v1284_v37  ;;  %v1571_v37 = vld [vmem:[%s2549_s11 + $0x30] sm:$0xff] }
 0x404   : > { %2134 = vrot.lane.b32.xlu1 %v2429_v14, %s2183_s20  ;;  %s560_s20 = scalar_lea.vmem %s2553_s15, %s2332_s30 }
 0x408   : > { %1374 = vrot.lane.b32.xlu1 %v2379_v46, %s2184_s22 }
 0x42c   : > { %1109 = vmax.xlane.f32.xlu1 %v1108_v40 }
 0x480   : > { %v1286_v41 = vpop.xlane.xlu1 %1285 }
 0x481   : > { %v1287_v43 = vsub.f32 %v1283_v36, %v1286_v41 }
 0x483   : > { %v1288_v45 = vmul.f32 1.442695, %v1287_v43 }
 0x484   : > { %v2135_v47 = vpop.permute.xlu1 %2134 }
 0x485   : > { %2157 = vpow2.f32 %v1288_v45  ;;  %v2137_v48 = vunpack.i.h.bf16 %v2135_v47  ;;  %v2136_v49 = vunpack.i.l.bf16 %v2135_v47 }
 0x487   : > { %v2085_v50 = vpack.c.bf16 %v2137_v48, %v2136_v49 }
 0x488   : > { %v1375_v52 = vpop.permute.xlu1 %1374 }
 0x489   : > { %2086 = vmatpush3.bf16.msra.mxu1 %v2085_v50 }
 0x48a   : > { %2087 = vmatprep.subr.bf16.mxu1 %v2179_v6 }
 0x48f   : > { %v2158_v51 = vpop.eup %2157 }
 0x490   : > { %v1290_v46 = vsel %vm852_vm2, %v2158_v51, 0.0 }
 0x491   : > { %1291 = vadd.xlane.f32.xlu0 %v1290_v46  ;;  %v1820_v46 = vld [vmem:[%s2550_s12] ss:$0 sm:$0xff] }
 0x4a7   : > { %2139 = vrot.lane.b32.xlu0 %v2369_v44, %s2184_s22 }
 0x4b9   : > { %v1110_v53 = vpop.xlane.xlu1 %1109 }
 0x4ba   : > { %v1111_v54 = vsub.f32 %v1107_v39, %v1110_v53  ;;  %v2104_v39 = vpack.c.bf16 %v1572_v38, %v1571_v37 }
 0x4bc   : > { %v1112_v55 = vmul.f32 1.442695, %v1111_v54 }
 0x4be   : > { %2159 = vpow2.f32 %v1112_v55 }
 0x4c8   : > { %v2160_v56 = vpop.eup %2159 }
 0x4c9   : > { %v1114_v57 = vsel %vm852_vm2, %v2160_v56, 0.0 }
 0x4ca   : > { %1115 = vadd.xlane.f32.xlu1 %v1114_v57 }
 0x51e   : > { %v1292_v58 = vpop.xlane.xlu0 %1291 }
 0x51f   : > { %2161 = vrcp.f32 %v1292_v58 }
 0x522   : > { %v2140_v59 = vpop.permute.xlu0 %2139 }
 0x523   : > { %v2142_v61 = vunpack.i.h.bf16 %v2140_v59  ;;  %v2141_v62 = vunpack.i.l.bf16 %v2140_v59 }
 0x525   : > { %v2088_v1 = vpack.c.bf16 %v2142_v61, %v2141_v62 }
 0x529   : > { %v2162_v63 = vpop.eup %2161 }
 0x52a   : > { %v1294_v0 = vmul.f32 %v2162_v63, %v2158_v51 }
 0x52c   : > { %1987 = vmatmul.mubr.msk.f32.vlgmr.msra.gmra.mrb[10].mxu1 %vm852_vm2, %v1294_v0 }
 0x52d   : > { %2090 = vmatpush3.bf16.xpose.msk.msra.mxu1 %vm2365_vm3, %v2088_v1  ;;  %1993 = vmatprep.mubr.msk.f32.mxu1 %vm2180_vm0, %v2181_v11 }
 0x534   : > { %1994 = vmatmul.mubr.msk.f32.vlgmr.msra.gmra.mrb[12].mxu1 %vm852_vm2, %v1375_v52 }
 0x557   : > { %v1116_v15 = vpop.xlane.xlu1 %1115 }
 0x5ff   : > { %v2470_v44 = vpop.f32.mrb[10].mxu1 }
 0x600   : > { %v1988_v2 = vpop.f32.mrb[11].mxu1 }
 0x601   : > { %v1823_v2 = vld [vmem:[%s2552_s14] ss:$0 sm:$0xff] }
 0x607   : > { %v1452_v3 = vpop.f32.mrb[12].mxu1 }
 0x608   : > { %v1456_v4 = vmul.f32 0.25, %v1452_v3  ;;  %v1995_v5 = vpop.f32.mrb[13].mxu1 }
 0x60a   : > { %v1457_v7 = vadd.f32 %v2421_v60, %v1456_v4 }
 0x60c   : > { %v1458_v8 = vsel %vm852_vm2, %v1457_v7, -inf }
 0x60d   : > { %1459 = vmax.xlane.f32.xlu0 %v1458_v8 }
 0x623   : > { %2149 = vrot.lane.b32.xlu0 %v2429_v14, %s2184_s22 }
 0x69a   : > { %v1460_v42 = vpop.xlane.xlu0 %1459 }
 0x69b   : > { %v1461_v9 = vsub.f32 %v1457_v7, %v1460_v42 }
 0x69d   : > { %v1462_v10 = vmul.f32 1.442695, %v1461_v9 }
 0x69e   : > { %v2150_v16 = vpop.permute.xlu0 %2149 }
 0x69f   : > { %2163 = vpow2.f32 %v1462_v10  ;;  %v2152_v21 = vunpack.i.h.bf16 %v2150_v16  ;;  %v2151_v22 = vunpack.i.l.bf16 %v2150_v16 }
 0x6a0   : > { %2165 = vrcp.f32 %v1116_v15 }
 0x6a1   : > { %v2092_v26 = vpack.c.bf16 %v2152_v21, %v2151_v22 }
 0x6a9   : > { %v2164_v12 = vpop.eup %2163 }
 0x6aa   : > { %v1464_v13 = vsel %vm852_vm2, %v2164_v12, 0.0  ;;  %v2166_v20 = vpop.eup %2165 }
 0x6ab   : > { %1465 = vadd.xlane.f32.xlu1 %v1464_v13  ;;  %v1118_v24 = vmul.f32 %v2166_v20, %v2160_v56 }
 0x6bc   : > { %2144 = vrot.lane.b32.xlu1 %v2429_v14, %s2182_s27 }
 0x738   : > { %v1466_v60 = vpop.xlane.xlu1 %1465 }
 0x739   : > { %2167 = vrcp.f32 %v1466_v60 }
 0x73c   : > { %v2145_v17 = vpop.permute.xlu1 %2144 }
 0x73d   : > { %v2147_v18 = vunpack.i.h.bf16 %v2145_v17  ;;  %v2146_v19 = vunpack.i.l.bf16 %v2145_v17 }
 0x73f   : > { %v2078_v23 = vpack.c.bf16 %v2147_v18, %v2146_v19 }
 0x741   : > { %2079 = vmatpush3.bf16.msra.mxu0 %v2078_v23 }
 0x742   : > { %2091 = vmatprep.subr.bf16.mxu0 %v2179_v6 }
 0x743   : > { %v2168_v25 = vpop.eup %2167 }
 0x744   : > { %1973 = vmatmul.mubr.msk.f32.vlgmr.msra.gmra.mrb[4].mxu0 %vm852_vm2, %v1118_v24  ;;  %v1468_v14 = vmul.f32 %v2168_v25, %v2164_v12 }
 0x745   : > { %2093 = vmatpush3.bf16.msra.mxu0 %v2092_v26  ;;  %2000 = vmatprep.mubr.msk.f32.mxu0 %vm2180_vm0, %v2181_v11 }
 0x746   : > { %2094 = vmatprep.subr.bf16.mxu0 %v2179_v6 }
 0x748   : > { %2001 = vmatmul.mubr.msk.f32.vlgmr.msra.gmra.mrb[6].mxu0 %vm852_vm2, %v1468_v14 }
 0x749   : > { %2019 = vmatprep.mubr.msk.f32.mxu0 %vm2180_vm0, %v2181_v11  ;;  %2096 = vmatpush3.bf16.msra.mxu0 %v2095_v32  ;;  %v1569_v11 = vld [vmem:[%s2549_s11 + $0x20] sm:$0xff] }
 0x74a   : > { %2097 = vmatprep.subr.bf16.mxu0 %v2179_v6  ;;  %v2101_v36 = vpack.c.bf16 %v1570_v35, %v1569_v11 }
 0x74d   : > { %2099 = vmatpush3.bf16.msra.mxu0 %v2098_v34 }
 0x74e   : > { %2100 = vmatprep.subr.bf16.mxu0 %v2179_v6 }
 0x751   : > { %2102 = vmatpush3.bf16.msra.mxu0 %v2101_v36 }
 0x752   : > { %2103 = vmatprep.subr.bf16.mxu0 %v2179_v6 }
 0x755   : > { %2105 = vmatpush3.bf16.msra.mxu0 %v2104_v39 }
 0x817   : > { %v1196_v40 = vpop.f32.mrb[4].mxu0 }
 0x818   : > { %1549 = vrot.lane.b32.xlu1 %v1196_v40, %s2185_s25  ;;  %v1974_v41 = vpop.f32.mrb[5].mxu0 }
 0x81b   : > { %v1544_v43 = vpop.f32.mrb[6].mxu0 }
 0x81c   : > { %1553 = vrot.lane.b32.xlu1 %v2470_v44, %s2186_s26  ;;  %1557 = vrot.lane.b32.xlu0 %v1544_v43, %s2187_s28  ;;  %v2002_v6 = vpop.f32.mrb[7].mxu0 }
 0x88a   : > { %v1550_v45 = vpop.permute.xlu1 %1549 }
 0x88b   : > { %v1560_v47 = vsel %vm852_vm2, %v2449_v28, %v1550_v45 }
 0x88e   : > { %v1554_v48 = vpop.permute.xlu1 %1553  ;;  %v1558_v49 = vpop.permute.xlu0 %1557 }
 0x88f   : > { %v1562_v50 = vsel %vm1561_vm4, %v1560_v47, %v1554_v48 }
 0x890   : > { %v1564_v51 = vsel %vm1563_vm5, %v1562_v50, %v1558_v49 }
 0x891   : > { %2020 = vmatmul.mubr.msk.f32.vlgmr.msra.gmra.mrb[8].mxu0 %vm585_vm1, %v1564_v51 }
 0x964   : > { %v1649_v52 = vpop.f32.mrb[8].mxu0 }
 0x965   : > { %v1650_v53 = vadd.f32 %v1820_v46, %v1649_v52  ;;  %v2021_v54 = vpop.f32.mrb[9].mxu0 }
 0x967   : > { %v1653_v55 = vadd.f32 %v1650_v53, %v2350_v31  ;;  %v1822_v31 = vld [vmem:[%s2551_s13] ss:$0 sm:$0xff] }
 0x969   : > { %v1656_v56 = vsel %vm585_vm1, %v1653_v55, 0.0 }
 0x96a   : > { %1657 = vadd.xlane.f32.xlu1 %v1656_v56 }
 0x9f7   : > { %v1658_v28 = vpop.xlane.xlu1 %1657 }
 0x9f8   : > { %v1660_v57 = vmul.f32 0.015625, %v1658_v28 }
 0x9fa   : > { %v1661_v58 = vsub.f32 %v1653_v55, %v1660_v57 }
 0x9fc   : > { %v1662_v59 = vmul.f32 %v1661_v58, %v1661_v58 }
 0x9fe   : > { %v1663_v61 = vsel %vm585_vm1, %v1662_v59, 0.0 }
 0x9ff   : > { %1664 = vadd.xlane.f32.xlu0 %v1663_v61 }
 0xa8c   : > { %v1665_v62 = vpop.xlane.xlu0 %1664 }
 0xa8d   : > { %v1666_v63 = vmul.f32 0.015625, %v1665_v62 }
 0xa8f   : > { %v1667_v0 = vadd.f32 1e-05, %v1666_v63 }
 0xa91   : > { %2169 = vrsqrt.f32 %v1667_v0 }
 0xa9b   : > { %v2170_v1 = vpop.eup %2169 }
 0xa9c   : > { %v1669_v44 = vmul.f32 %v2170_v1, %v1661_v58 }
 0xa9e   : > { %v1676_v3 = vmul.f32 %v1822_v31, %v1669_v44 }
 0xaa0   : > { %v1683_v4 = vadd.f32 %v1823_v2, %v1676_v3 }
 0xaa2   : > { %1684 = vst.msk [vmem:[%s560_s20] sm:$0xff] %vm585_vm1, %v1683_v4 }
 0xaa3 PF: > { %s25_s18 = sadd.s32 1, %s2177_s18  }
 0xaa4   : > { %p22_p4 = scmp.ge.s32.totalorder %s25_s18, 4  }
 0xaa6   :  { %24 = sbr.rel (!%p22_p4) target bundleno = 1 (0x1), region = 122 }

// kernel: detr_decoder.6
= control target key start
LH: loop header
LB: loop body
LE: loop exit
PB: predicated region body
PF: predicated region fallthrough
CT: control target
= control target key end

     0   :  { %s2634_s0 = inlined_call_operand.vmem [shape: f32[2,8,64], index: 0, kind: input, shape index: {}, may-alias: {0,2}]   ;;  %s2635_s1 = inlined_call_operand.vmem [shape: f32[2,8,64], index: 1, kind: input, shape index: {}, may-alias: {1,3}]   ;;  %s2636_s2 = inlined_call_operand.vmem [shape: f32[2,8,64], index: 2, kind: input, shape index: {}, may-alias: {0,2}]   ;;  %s2637_s3 = inlined_call_operand.vmem [shape: f32[2,8,64], index: 3, kind: input, shape index: {}, may-alias: {1,3}]   ;;  %s2638_s4 = inlined_call_operand.hbm [shape: f32[64,64], index: 4, kind: input, shape index: {}]   ;;  %s2639_s5 = inlined_call_operand.vmem [shape: f32[1,64], index: 5, kind: input, shape index: {}]   ;;  %s2640_s6 = inlined_call_operand.hbm [shape: f32[64,64], index: 6, kind: input, shape index: {}]   ;;  %s2641_s7 = inlined_call_operand.vmem [shape: f32[1,64], index: 7, kind: input, shape index: {}]   ;;  %s2642_s8 = inlined_call_operand.hbm [shape: f32[64,64], index: 8, kind: input, shape index: {}]   ;;  %s2643_s9 = inlined_call_operand.vmem [shape: f32[1,64], index: 9, kind: input, shape index: {}]   ;;  %s2644_s10 = inlined_call_operand.hbm [shape: f32[64,64], index: 10, kind: input, shape index: {}]   ;;  %s2645_s11 = inlined_call_operand.vmem [shape: f32[1,64], index: 11, kind: input, shape index: {}]   ;;  %s2646_s12 = inlined_call_operand.vmem [shape: f32[1,64], index: 12, kind: input, shape index: {}]   ;;  %s2647_s13 = inlined_call_operand.vmem [shape: f32[1,64], index: 13, kind: input, shape index: {}]   ;;  %s2648_s14 = inlined_call_operand.vmem [shape: f32[2,8,64], index: 14, kind: output, shape index: {}]  }
   0x1   :  { %2652 = sst [smem:[#allocation13_spill]] %s2646_s12 }
   0x2   :  { %2653 = sst [smem:[#allocation14_spill]] %s2647_s13 }
   0x3   :  { %2654 = sst [smem:[#allocation15_spill]] %s2648_s14 }
   0x4   :  { %19 = vsyncpa [#allocation3], 0 }
   0x5   :  { %20 = vsyncpa [#allocation5], 0 }
   0x6   :  { %21 = vsyncpa [#allocation8], 0  ;;  %s2331_s29 = smov 0  }
   0x7 LB: > { %2655 = sst [smem:[#allocation12_spill]] %s2239_s29  ;;  %s2337_s30 = sadd.s32 4294967295, %s2239_s29   ;;  %s2239_s29 = sphi %s2331_s29, %s27_s29  }
   0x8   : > { %p1775_p0 = scmp.ge.s32.totalorder %s2239_s29, 1  ;;  %p372_p1 = scmp.lt.s32.totalorder %s2239_s29, 3 }
   0x9   : > { %p2650_p2 = scmp.eq.s32.totalorder %s2337_s30, 0  ;;  %s2241_s16 = smov [#allocation4]  }
   0xa   : > { %p2342_p3 = pnand %p1775_p0, %p372_p1  ;;  %s400_s17 = sshll.u32 %s2241_s16, 4  ;;  %s2346_s17 = int_to_ptr.vmem [resolvable:$true] %s400_s17 }
   0xb   : > { %s2242_s18 = smov [#allocation2]   ;;  %s2243_s21 = smov [#allocation6]  }
   0xc   : > { %s2656_s15 = scalar_select %p2342_p3, 1, 0 }
   0xd   : > { %p2047_p4 = pneg %p2342_p3  ;;  %s384_s19 = sshll.u32 %s2242_s18, 4  ;;  %s2350_s19 = int_to_ptr.vmem [resolvable:$true] %s384_s19 }
   0xe   : > { %s416_s22 = sshll.u32 %s2243_s21, 4  ;;  %s2244_s23 = smov [#allocation7]   ;;  %s2358_s22 = int_to_ptr.vmem [resolvable:$true] %s416_s22 }
   0xf   : > { %p2354_p5 = pnand %p2650_p2, %p2047_p4  ;;  %s2360_s24 = sshll.u32 %s2244_s23, 4  ;;  %s433_s24 = int_to_ptr.vmem [resolvable:$true] %s2360_s24 }
  0x10   : > { %s2109_s27 = scalar_lea.hbm %s2640_s6, 1024 }
  0x11   : > { %p2110_p6 = scmp.ne.s32.totalorder %s2640_s6, %s2109_s27  ;;  %p2370_p7 = pneg %p2354_p5 }
  0x12   : > { %p2116_p10 = scmp.lt.u32.totalorder %s2109_s27, %s2640_s6 }
  0x13   : > { %p2112_p8 = pnand %p2370_p7, %p2110_p6 }
  0x15   : > { %p2113_p9 = pneg %p2112_p8 }
  0x17   : > { %p2118_p11 = pnand %p2116_p10, %p2113_p9 }
  0x19   : > { %2121 = shalt.err (!%p2118_p11)
}
  0x1a   : > { %s2122_s25 = scalar_lea.vmem %s2346_s17, 1024  ;;  %p2130_p1 = scmp.lt.s32.totalorder %s2346_s17, %s2346_s17 }
  0x1b   : > { %p2123_p12 = scmp.ne.s32.totalorder %s2346_s17, %s2122_s25  ;;  %p2131_p4 = scmp.lt.s32.totalorder %s2122_s25, %s2122_s25 }
  0x1d   : > { %p2125_p13 = pnand %p2123_p12, %p2370_p7  ;;  %p2132_p6 = por %p2131_p4, %p2130_p1 }
  0x1f   : > { %p2126_p0 = pneg %p2125_p13 }
  0x21   : > { %p2133_p8 = pnand %p2132_p6, %p2126_p0 }
  0x23   : > { %2136 = shalt.err (!%p2133_p8)
}
  0x24   : > { %s2245_s26 = smov 128   ;;  %s2246_s27 = smov 8  }
  0x25   : > { %2053 = dma.hbm_to_vmem [thread:$0]  (!%p2354_p5), %s2640_s6, 1024, %s2346_s17, [#allocation5], %s2245_s26, %s2245_s26, %s2246_s27  }
  0x26   : > { %s2137_s25 = scalar_lea.hbm %s2638_s4, 1024 }
  0x27   : > { %p2138_p9 = scmp.ne.s32.totalorder %s2638_s4, %s2137_s25  ;;  %p2144_p12 = scmp.lt.u32.totalorder %s2137_s25, %s2638_s4 }
  0x29   : > { %p2140_p10 = pnand %p2138_p9, %p2370_p7 }
  0x2b   : > { %p2141_p11 = pneg %p2140_p10 }
  0x2d   : > { %p2146_p13 = pnand %p2144_p12, %p2141_p11 }
  0x2f   : > { %2149 = shalt.err (!%p2146_p13)
}
  0x30   : > { %s2150_s17 = scalar_lea.vmem %s2350_s19, 1024  ;;  %p2158_p6 = scmp.lt.s32.totalorder %s2350_s19, %s2350_s19 }
  0x31   : > { %p2151_p0 = scmp.ne.s32.totalorder %s2350_s19, %s2150_s17  ;;  %p2159_p8 = scmp.lt.s32.totalorder %s2150_s17, %s2150_s17 }
  0x33   : > { %p2153_p1 = pnand %p2151_p0, %p2370_p7  ;;  %p2160_p9 = por %p2159_p8, %p2158_p6 }
  0x35   : > { %p2154_p4 = pneg %p2153_p1 }
  0x37   : > { %p2161_p10 = pnand %p2160_p9, %p2154_p4 }
  0x39   : > { %2164 = shalt.err (!%p2161_p10)
}
  0x3a   : > { %2050 = dma.hbm_to_vmem [thread:$0]  (!%p2354_p5), %s2638_s4, 1024, %s2350_s19, [#allocation3], %s2245_s26, %s2245_s26, %s2246_s27  }
  0x3b   : > { %s2165_s28 = scalar_lea.hbm %s2642_s8, 1024 }
  0x3c   : > { %p2166_p11 = scmp.ne.s32.totalorder %s2642_s8, %s2165_s28  ;;  %p2172_p0 = scmp.lt.u32.totalorder %s2165_s28, %s2642_s8 }
  0x3e   : > { %p2168_p12 = pnand %p2166_p11, %p2370_p7 }
  0x40   : > { %p2169_p13 = pneg %p2168_p12 }
  0x42   : > { %p2174_p1 = pnand %p2172_p0, %p2169_p13 }
  0x44   : > { %2177 = shalt.err (!%p2174_p1)
}
  0x45   : > { %s2178_s19 = scalar_lea.vmem %s2358_s22, 1024  ;;  %p2186_p9 = scmp.lt.s32.totalorder %s2358_s22, %s2358_s22 }
  0x46   : > { %p2179_p4 = scmp.ne.s32.totalorder %s2358_s22, %s2178_s19  ;;  %p2187_p10 = scmp.lt.s32.totalorder %s2178_s19, %s2178_s19 }
  0x48   : > { %p2181_p6 = pnand %p2179_p4, %p2370_p7  ;;  %p2188_p11 = por %p2187_p10, %p2186_p9 }
  0x4a   : > { %p2182_p8 = pneg %p2181_p6 }
  0x4c   : > { %p2189_p12 = pnand %p2188_p11, %p2182_p8 }
  0x4e   : > { %2192 = shalt.err (!%p2189_p12)
}
  0x4f   : > { %2056 = dma.hbm_to_vmem [thread:$0]  (!%p2354_p5), %s2642_s8, 1024, %s2358_s22, [#allocation5], %s2245_s26, %s2245_s26, %s2246_s27  }
  0x50   : > { %s2193_s29 = scalar_lea.hbm %s2644_s10, 1024 }
  0x51   : > { %p2194_p13 = scmp.ne.s32.totalorder %s2644_s10, %s2193_s29  ;;  %p2200_p4 = scmp.lt.u32.totalorder %s2193_s29, %s2644_s10 }
  0x53   : > { %p2196_p0 = pnand %p2194_p13, %p2370_p7 }
  0x55   : > { %p2197_p1 = pneg %p2196_p0 }
  0x57   : > { %p2202_p6 = pnand %p2200_p4, %p2197_p1 }
  0x59   : > { %2205 = shalt.err (!%p2202_p6)
}
  0x5a   : > { %s2206_s25 = scalar_lea.vmem %s433_s24, 1024  ;;  %p2214_p11 = scmp.lt.s32.totalorder %s433_s24, %s433_s24 }
  0x5b   : > { %p2207_p8 = scmp.ne.s32.totalorder %s433_s24, %s2206_s25  ;;  %p2215_p12 = scmp.lt.s32.totalorder %s2206_s25, %s2206_s25 }
  0x5d   : > { %p2209_p9 = pnand %p2207_p8, %p2370_p7  ;;  %p2216_p2 = por %p2215_p12, %p2214_p11 }
  0x5f   : > { %p2210_p10 = pneg %p2209_p9 }
  0x61   : > { %p2217_p3 = pnand %p2216_p2, %p2210_p10 }
  0x63   : > { %2220 = shalt.err (!%p2217_p3)
}
  0x64   : > { %2059 = dma.hbm_to_vmem [thread:$0]  (!%p2354_p5), %s2644_s10, 1024, %s433_s24, [#allocation8], %s2245_s26, %s2245_s26, %s2246_s27  }
  0x65   : > { %p2659_p13 = scmp.ne.s32.totalorder %s2656_s15, 0 }
  0x66   : > { %p2660_p7 = scmp.eq.s32.totalorder (!%p2659_p13), %s2337_s30, 0 }
  0x67   : > { %485 = sbr.rel (%p2659_p13) target bundleno = 3336 (0xd08), region = 76 }
  0x6e   : > { %2226 = dma.done.wait (%p2660_p7), [#allocation3], 1024   ;;  %p2661_p0 = pmov %p2660_p7 }
  0x70   : > { %2228 = vsyncadd (%p2661_p0), [#allocation3], 4294966272  ;;  %p2662_p2 = pmov %p2661_p0 }
  0x71   : > { %p2663_p3 = pmov %p2661_p0 }
  0x72   : > { %2230 = dma.done.wait (%p2662_p2), [#allocation5], 2048  }
  0x73   : > { %2232 = vsyncadd (%p2663_p3), [#allocation5], 4294965248  ;;  %p2664_p1 = pmov %p2661_p0 }
  0x74   : > { %p2665_p5 = pmov %p2661_p0 }
  0x75   : > { %2234 = dma.done.wait (%p2664_p1), [#allocation8], 1024  }
  0x76   : > { %2236 = vsyncadd (%p2665_p5), [#allocation8], 4294966272  ;;  %v2247_v0 = vmov 0.0|0.0   ;;  %vm2248_vm0 = vmmov 0   ;;  %v2249_v1 = vmov 0.0   ;;  %p553_p4 = scmp.lt.s32.totalorder %s2337_s30, 1 }
  0x77   : > { %1995 = vmatprep.subr.bf16.mxu1 %v2247_v0  ;;  %1983 = vmatprep.subr.bf16.mxu0 %v2247_v0  ;;  %v668_v2 = vld [vmem:[#allocation4] sm:$0xff]  ;;  %v669_v3 = vld [vmem:[#allocation4 + $0x8] sm:$0xff]  ;;  %v670_v7 = vld [vmem:[#allocation4 + $0x10] sm:$0xff]  ;;  %vm594_vm1 = vcmask 523264   ;;  %vm844_vm2 = vcmask 130048   ;;  %s2250_s22 = smov 112  }
  0x78   : > { %1902 = vmatprep.mubr.msk.f32.mxu1 %vm2248_vm0, %v2249_v1  ;;  %1883 = vmatprep.mubr.msk.f32.mxu0 %vm2248_vm0, %v2249_v1  ;;  %v579_v4 = vld [vmem:[#allocation2] sm:$0xff]  ;;  %v1996_v5 = vpack.c.bf16 %v669_v3, %v668_v2  ;;  %v580_v6 = vld [vmem:[#allocation2 + $0x8] sm:$0xff]  ;;  %v671_v8 = vld [vmem:[#allocation4 + $0x18] sm:$0xff]  ;;  %s2671_s30 = smov (!%p553_p4, %s2337_s30), 1  ;;  %vm922_vm3 = vcmask 64512   ;;  %s2251_s24 = smov 96  }
  0x79   : > { %v1984_v9 = vpack.c.bf16 %v580_v6, %v579_v4  ;;  %v581_v10 = vld [vmem:[#allocation2 + $0x10] sm:$0xff]  ;;  %v582_v11 = vld [vmem:[#allocation2 + $0x18] sm:$0xff]  ;;  %v1999_v12 = vpack.c.bf16 %v671_v8, %v670_v7  ;;  %v672_v14 = vld [vmem:[#allocation4 + $0x20] sm:$0xff]  ;;  %s2492_s15 = sshll.u32 %s2671_s30, 3  ;;  %s2253_s26 = smov 16   ;;  %vm1519_vm4 = vcmask 261120  }
  0x7a   : > { %1997 = vmatpush3.bf16.msra.mxu1 %v1996_v5  ;;  %v1987_v13 = vpack.c.bf16 %v582_v11, %v581_v10  ;;  %v673_v15 = vld [vmem:[#allocation4 + $0x28] sm:$0xff]  ;;  %v583_v16 = vld [vmem:[#allocation2 + $0x20] sm:$0xff]  ;;  %v674_v20 = vld [vmem:[#allocation4 + $0x30] sm:$0xff]  ;;  %s564_s18 = scalar_lea.vmem %s2636_s2, %s2492_s15  ;;  %s568_s30 = scalar_lea.vmem %s2637_s3, %s2492_s15  ;;  %vm1521_vm5 = vcmask 392192  }
  0x7b   : > { %1985 = vmatpush3.bf16.msra.mxu0 %v1984_v9  ;;  %1998 = vmatprep.subr.bf16.mxu1 %v2247_v0  ;;  %v584_v17 = vld [vmem:[#allocation2 + $0x28] sm:$0xff]  ;;  %v2002_v18 = vpack.c.bf16 %v673_v15, %v672_v14  ;;  %v675_v21 = vld [vmem:[#allocation4 + $0x38] sm:$0xff]  ;;  %v585_v22 = vld [vmem:[#allocation2 + $0x30] sm:$0xff]  ;;  %s556_s13 = scalar_lea.vmem %s2634_s0, %s2492_s15  ;;  %s560_s28 = scalar_lea.vmem %s2635_s1, %s2492_s15 }
  0x7c   : > { %1986 = vmatprep.subr.bf16.mxu0 %v2247_v0  ;;  %v1990_v19 = vpack.c.bf16 %v584_v17, %v583_v16  ;;  %v586_v23 = vld [vmem:[#allocation2 + $0x38] sm:$0xff]  ;;  %v2005_v24 = vpack.c.bf16 %v675_v21, %v674_v20  ;;  %v576_v25 = vld [vmem:[%s564_s18] sm:$0xff]  ;;  %v757_v41 = vld [vmem:[#allocation6 + $0x8] sm:$0xff]  ;;  %s2252_s18 = smov 80   ;;  %s2254_s27 = smov 32  }
  0x7d   : > { %v577_v26 = vld [vmem:[%s568_s30] sm:$0xff]  ;;  %v1993_v27 = vpack.c.bf16 %v586_v23, %v585_v22  ;;  %v758_v42 = vld [vmem:[#allocation6 + $0x10] sm:$0xff]  ;;  %v759_v44 = vld [vmem:[#allocation6 + $0x18] sm:$0xff]  ;;  %s2255_s30 = smov 48   ;;  %s2666_s29 = sld [smem:[#allocation13_spill]] }
  0x7e   : > { %2000 = vmatpush3.bf16.msra.mxu1 %v1999_v12  ;;  %v2513_v28 = vld [vmem:[%s556_s13] sm:$0xff]  ;;  %v578_v30 = vadd.f32 %v577_v26, %v576_v25  ;;  %v2011_v45 = vpack.c.bf16 %v759_v44, %v758_v42  ;;  %v761_v47 = vld [vmem:[#allocation6 + $0x28] sm:$0xff]  ;;  %v762_v49 = vld [vmem:[#allocation6 + $0x30] sm:$0xff]  ;;  %s2667_s21 = sld [smem:[#allocation14_spill]] }
  0x7f   : > { %1988 = vmatpush3.bf16.msra.mxu0 %v1987_v13  ;;  %2001 = vmatprep.subr.bf16.mxu1 %v2247_v0  ;;  %v574_v29 = vld [vmem:[%s560_s28] sm:$0xff]  ;;  %v763_v50 = vld [vmem:[#allocation6 + $0x38] sm:$0xff] }
  0x80   : > { %1989 = vmatprep.subr.bf16.mxu0 %v2247_v0  ;;  %v575_v31 = vadd.f32 %v574_v29, %v2513_v28  ;;  %v1793_v32 = vld [vmem:[%s2641_s7] ss:$0 sm:$0xff]  ;;  %v2017_v51 = vpack.c.bf16 %v763_v50, %v762_v49 }
  0x81   : > { %v1791_v33 = vld [vmem:[%s2639_s5] ss:$0 sm:$0xff] }
  0x82   : > { %2003 = vmatpush3.bf16.msra.mxu1 %v2002_v18  ;;  %v756_v40 = vld [vmem:[#allocation6] sm:$0xff] }
  0x83   : > { %1991 = vmatpush3.bf16.msra.mxu0 %v1990_v19  ;;  %2004 = vmatprep.subr.bf16.mxu1 %v2247_v0  ;;  %v2008_v43 = vpack.c.bf16 %v757_v41, %v756_v40  ;;  %v760_v46 = vld [vmem:[#allocation6 + $0x20] sm:$0xff] }
  0x84   : > { %1992 = vmatprep.subr.bf16.mxu0 %v2247_v0  ;;  %v2014_v48 = vpack.c.bf16 %v761_v47, %v760_v46  ;;  %v1795_v61 = vld [vmem:[%s2643_s9] ss:$0 sm:$0xff] }
  0x86   : > { %2006 = vmatpush3.bf16.msra.mxu1 %v2005_v24 }
  0x87   : > { %1994 = vmatpush3.bf16.msra.mxu0 %v1993_v27  ;;  %1924 = vmatprep.subr.mxu1 %v2249_v1 }
  0x88   : > { %2007 = vmatprep.subr.bf16.mxu0 %v2247_v0 }
  0x89   : > { %1903 = vmatmul.mubr.msk.f32.vlgmr.msra.gmra.mrb[0].mxu1 %vm594_vm1, %v578_v30 }
  0x8a   : > { %1884 = vmatmul.mubr.msk.f32.vlgmr.msra.gmra.mrb[0].mxu0 %vm594_vm1, %v575_v31  ;;  %1926 = vmatprep.mubr.msk.f32.mxu1 %vm2248_vm0, %v2249_v1 }
  0x8b   : > { %1921 = vmatprep.mubr.msk.f32.mxu0 %vm2248_vm0, %v2249_v1  ;;  %2009 = vmatpush3.bf16.msra.mxu0 %v2008_v43 }
  0x8c   : > { %2010 = vmatprep.subr.bf16.mxu0 %v2247_v0 }
  0x8f   : > { %2012 = vmatpush3.bf16.msra.mxu0 %v2011_v45 }
  0x90   : > { %2013 = vmatprep.subr.bf16.mxu0 %v2247_v0 }
  0x93   : > { %2015 = vmatpush3.bf16.msra.mxu0 %v2014_v48 }
  0x94   : > { %2016 = vmatprep.subr.bf16.mxu0 %v2247_v0 }
  0x97   : > { %2018 = vmatpush3.bf16.msra.mxu0 %v2017_v51 }
  0x98   : > { %2019 = vmatprep.subr.bf16.mxu0 %v2247_v0 }
  0x9a   : > { %1922 = vmatmul.mubr.msk.f32.vlgmr.msra.gmra.mrb[2].mxu0 %vm594_vm1, %v576_v25 }
  0x9b   : > { %1980 = vmatprep.mubr.msk.f32.mxu0 %vm2248_vm0, %v2249_v1 }
 0x15c   : > { %v752_v34 = vpop.f32.mrb[0].mxu1 }
 0x15d   : > { %v2531_v35 = vadd.f32 %v1793_v32, %v752_v34  ;;  %v1904_v36 = vpop.f32.mrb[1].mxu1  ;;  %v664_v37 = vpop.f32.mrb[0].mxu0 }
 0x15e   : > { %v2533_v38 = vadd.f32 %v1791_v33, %v664_v37  ;;  %v1885_v39 = vpop.f32.mrb[1].mxu0 }
 0x15f   : > { %1009 = vrot.lane.b32.xlu1 %v2531_v35, %s2250_s22  ;;  %1925 = vmatpush3.xpose.msk.msra.mxu1 %vm844_vm2, %v2531_v35 }
 0x160   : > { %1929 = vmatprep.subr.mxu1 %v2249_v1 }
 0x162   : > { %1927 = vmatmul.mubr.msk.f32.vlgmr.msra.gmra.mrb[2].mxu1 %vm844_vm2, %v2533_v38 }
 0x163   : > { %1007 = vrot.lane.b32.xlu1 %v2533_v38, %s2250_s22  ;;  %1931 = vmatprep.mubr.msk.f32.mxu1 %vm2248_vm0, %v2249_v1 }
 0x16d   : > { %v840_v62 = vpop.f32.mrb[2].mxu0 }
 0x16e   : > { %v2558_v63 = vadd.f32 %v1795_v61, %v840_v62  ;;  %v1923_v2 = vpop.f32.mrb[3].mxu0  ;;  %v1526_v61 = vld [vmem:[#allocation7 + $0x18] sm:$0xff] }
 0x16f   : > { %v1528_v2 = vld [vmem:[#allocation7 + $0x28] sm:$0xff] }
 0x170   : > { %1930 = vmatpush3.msra.mxu1 %v2558_v63 }
 0x171   : > { %1934 = vmatprep.subr.mxu1 %v2249_v1 }
 0x1d1   : > { %v1010_v5 = vpop.permute.xlu1 %1009 }
 0x1d5   : > { %v1008_v7 = vpop.permute.xlu1 %1007 }
 0x235   : > { %v917_v52 = vpop.f32.mrb[2].mxu1 }
 0x236   : > { %v921_v53 = vmul.f32 0.25, %v917_v52  ;;  %v1928_v54 = vpop.f32.mrb[3].mxu1 }
 0x238   : > { %v923_v55 = vsel %vm922_vm3, %v921_v53, -inf }
 0x239   : > { %924 = vmax.xlane.f32.xlu0 %v923_v55 }
 0x2c6   : > { %v925_v56 = vpop.xlane.xlu0 %924 }
 0x2c7   : > { %v926_v57 = vsub.f32 %v921_v53, %v925_v56 }
 0x2c9   : > { %v927_v58 = vmul.f32 1.442695, %v926_v57  ;;  %v1523_v57 = vld [vmem:[#allocation7] sm:$0xff] }
 0x2cb   : > { %2091 = vpow2.f32 %v927_v58  ;;  %v1524_v58 = vld [vmem:[#allocation7 + $0x8] sm:$0xff] }
 0x2d5   : > { %v2092_v59 = vpop.eup %2091 }
 0x2d6   : > { %v929_v60 = vsel %vm922_vm3, %v2092_v59, 0.0 }
 0x2d7   : > { %930 = vadd.xlane.f32.xlu0 %v929_v60  ;;  %v2020_v60 = vpack.c.bf16 %v1524_v58, %v1523_v57 }
 0x2d9   : > { %2021 = vmatpush3.bf16.msra.mxu0 %v2020_v60 }
 0x2da   : > { %2022 = vmatprep.subr.bf16.mxu0 %v2247_v0 }
 0x364   : > { %v931_v3 = vpop.xlane.xlu0 %930 }
 0x365   : > { %2093 = vrcp.f32 %v931_v3 }
 0x36f   : > { %v2094_v4 = vpop.eup %2093 }
 0x370   : > { %v933_v6 = vmul.f32 %v2094_v4, %v2092_v59  ;;  %v1525_v59 = vld [vmem:[#allocation7 + $0x10] sm:$0xff] }
 0x371   : > { %v2023_v62 = vpack.c.bf16 %v1526_v61, %v1525_v59  ;;  %v1529_v4 = vld [vmem:[#allocation7 + $0x30] sm:$0xff] }
 0x372   : > { %1932 = vmatmul.mubr.msk.f32.vlgmr.msra.gmra.mrb[4].mxu1 %vm922_vm3, %v933_v6 }
 0x373   : > { %1935 = vmatpush3.xpose.msk.msra.mxu1 %vm844_vm2, %v1010_v5  ;;  %1936 = vmatprep.mubr.msk.f32.mxu1 %vm2248_vm0, %v2249_v1  ;;  %v1530_v5 = vld [vmem:[#allocation7 + $0x38] sm:$0xff] }
 0x374   : > { %1939 = vmatprep.subr.mxu1 %v2249_v1  ;;  %2024 = vmatpush3.bf16.msra.mxu0 %v2023_v62  ;;  %v2029_v6 = vpack.c.bf16 %v1530_v5, %v1529_v4 }
 0x375   : > { %2025 = vmatprep.subr.bf16.mxu0 %v2247_v0 }
 0x376   : > { %1937 = vmatmul.mubr.msk.f32.vlgmr.msra.gmra.mrb[6].mxu1 %vm844_vm2, %v1008_v7 }
 0x377   : > { %1941 = vmatprep.mubr.msk.f32.mxu1 %vm2248_vm0, %v2249_v1 }
 0x445   : > { %v2570_v8 = vpop.f32.mrb[4].mxu1 }
 0x446   : > { %v1933_v9 = vpop.f32.mrb[5].mxu1 }
 0x449   : > { %v1081_v10 = vpop.f32.mrb[6].mxu1 }
 0x44a   : > { %v1085_v11 = vmul.f32 0.25, %v1081_v10  ;;  %v1938_v12 = vpop.f32.mrb[7].mxu1 }
 0x44c   : > { %v1086_v13 = vsel %vm922_vm3, %v1085_v11, -inf }
 0x44d   : > { %1087 = vmax.xlane.f32.xlu0 %v1086_v13 }
 0x463   : > { %1098 = vrot.lane.b32.xlu0 %v2558_v63, %s2250_s22  ;;  %s2668_s22 = sld [smem:[#allocation15_spill]] }
 0x467   : > { %1176 = vrot.lane.b32.xlu0 %v2531_v35, %s2251_s24 }
 0x469   : > { %s572_s19 = scalar_lea.vmem %s2668_s22, %s2492_s15 }
 0x46b   : > { %1174 = vrot.lane.b32.xlu0 %v2533_v38, %s2251_s24 }
 0x4da   : > { %v1088_v14 = vpop.xlane.xlu0 %1087 }
 0x4db   : > { %v1089_v15 = vsub.f32 %v1085_v11, %v1088_v14 }
 0x4dd   : > { %v1090_v16 = vmul.f32 1.442695, %v1089_v15 }
 0x4de   : > { %v1099_v17 = vpop.permute.xlu0 %1098 }
 0x4df   : > { %2095 = vpow2.f32 %v1090_v16  ;;  %1940 = vmatpush3.msra.mxu1 %v1099_v17 }
 0x4e0   : > { %1944 = vmatprep.subr.mxu1 %v2249_v1 }
 0x4e2   : > { %v1177_v22 = vpop.permute.xlu0 %1176 }
 0x4e6   : > { %v1175_v24 = vpop.permute.xlu0 %1174 }
 0x4e9   : > { %v2096_v18 = vpop.eup %2095 }
 0x4ea   : > { %v1092_v19 = vsel %vm922_vm3, %v2096_v18, 0.0 }
 0x4eb   : > { %1093 = vadd.xlane.f32.xlu1 %v1092_v19 }
 0x4fc   : > { %1264 = vrot.lane.b32.xlu1 %v2558_v63, %s2251_s24 }
 0x500   : > { %1342 = vrot.lane.b32.xlu1 %v2531_v35, %s2252_s18 }
 0x578   : > { %v1094_v20 = vpop.xlane.xlu1 %1093 }
 0x579   : > { %2097 = vrcp.f32 %v1094_v20 }
 0x57c   : > { %v1265_v25 = vpop.permute.xlu1 %1264 }
 0x580   : > { %v1343_v39 = vpop.permute.xlu1 %1342 }
 0x583   : > { %v2098_v21 = vpop.eup %2097 }
 0x584   : > { %v1096_v23 = vmul.f32 %v2098_v21, %v2096_v18 }
 0x586   : > { %1942 = vmatmul.mubr.msk.f32.vlgmr.msra.gmra.mrb[8].mxu1 %vm922_vm3, %v1096_v23 }
 0x587   : > { %1945 = vmatpush3.xpose.msk.msra.mxu1 %vm844_vm2, %v1177_v22  ;;  %1946 = vmatprep.mubr.msk.f32.mxu1 %vm2248_vm0, %v2249_v1 }
 0x588   : > { %1949 = vmatprep.subr.mxu1 %v2249_v1 }
 0x58a   : > { %1947 = vmatmul.mubr.msk.f32.vlgmr.msra.gmra.mrb[10].mxu1 %vm844_vm2, %v1175_v24 }
 0x58b   : > { %1950 = vmatpush3.msra.mxu1 %v1265_v25  ;;  %1951 = vmatprep.mubr.msk.f32.mxu1 %vm2248_vm0, %v2249_v1 }
 0x58c   : > { %1954 = vmatprep.subr.mxu1 %v2249_v1 }
 0x659   : > { %v1170_v26 = vpop.f32.mrb[8].mxu1 }
 0x65a   : > { %v1943_v27 = vpop.f32.mrb[9].mxu1 }
 0x65d   : > { %v1248_v29 = vpop.f32.mrb[10].mxu1 }
 0x65e   : > { %v1252_v30 = vmul.f32 0.25, %v1248_v29  ;;  %v1948_v31 = vpop.f32.mrb[11].mxu1 }
 0x65f   : > { %v1812_v31 = vld [vmem:[%s2667_s21] ss:$0 sm:$0xff] }
 0x660   : > { %v1253_v32 = vsel %vm922_vm3, %v1252_v30, -inf }
 0x661   : > { %1254 = vmax.xlane.f32.xlu0 %v1253_v32 }
 0x6ee   : > { %v1255_v33 = vpop.xlane.xlu0 %1254 }
 0x6ef   : > { %v1256_v34 = vsub.f32 %v1252_v30, %v1255_v33 }
 0x6f1   : > { %v1257_v35 = vmul.f32 1.442695, %v1256_v34 }
 0x6f3   : > { %2099 = vpow2.f32 %v1257_v35 }
 0x6fd   : > { %v2100_v36 = vpop.eup %2099 }
 0x6fe   : > { %v1259_v37 = vsel %vm922_vm3, %v2100_v36, 0.0 }
 0x6ff   : > { %1260 = vadd.xlane.f32.xlu1 %v1259_v37 }
 0x710   : > { %1340 = vrot.lane.b32.xlu1 %v2533_v38, %s2252_s18 }
 0x78c   : > { %v1261_v40 = vpop.xlane.xlu1 %1260 }
 0x78d   : > { %2101 = vrcp.f32 %v1261_v40 }
 0x790   : > { %v1341_v43 = vpop.permute.xlu1 %1340 }
 0x797   : > { %v2102_v41 = vpop.eup %2101 }
 0x798   : > { %v1263_v42 = vmul.f32 %v2102_v41, %v2100_v36 }
 0x79a   : > { %1952 = vmatmul.mubr.msk.f32.vlgmr.msra.gmra.mrb[12].mxu1 %vm922_vm3, %v1263_v42 }
 0x79b   : > { %1955 = vmatpush3.xpose.msk.msra.mxu1 %vm844_vm2, %v1343_v39  ;;  %1956 = vmatprep.mubr.msk.f32.mxu1 %vm2248_vm0, %v2249_v1 }
 0x79c   : > { %1959 = vmatprep.subr.mxu1 %v2249_v1 }
 0x79e   : > { %1957 = vmatmul.mubr.msk.f32.vlgmr.msra.gmra.mrb[14].mxu1 %vm844_vm2, %v1341_v43 }
 0x79f   : > { %1961 = vmatprep.mubr.msk.f32.mxu1 %vm2248_vm0, %v2249_v1 }
 0x86d   : > { %v1336_v38 = vpop.f32.mrb[12].mxu1 }
 0x86e   : > { %v1953_v44 = vpop.f32.mrb[13].mxu1 }
 0x871   : > { %v1414_v45 = vpop.f32.mrb[14].mxu1 }
 0x872   : > { %v1418_v46 = vmul.f32 0.25, %v1414_v45  ;;  %v1958_v47 = vpop.f32.mrb[15].mxu1 }
 0x874   : > { %v1419_v48 = vsel %vm922_vm3, %v1418_v46, -inf }
 0x875   : > { %1420 = vmax.xlane.f32.xlu0 %v1419_v48 }
 0x88b   : > { %1430 = vrot.lane.b32.xlu0 %v2558_v63, %s2252_s18  ;;  %v1527_v63 = vld [vmem:[#allocation7 + $0x20] sm:$0xff] }
 0x88c   : > { %v2026_v3 = vpack.c.bf16 %v1528_v2, %v1527_v63 }
 0x88e   : > { %2027 = vmatpush3.bf16.msra.mxu0 %v2026_v3 }
 0x88f   : > { %1507 = vrot.lane.b32.xlu0 %v1170_v26, %s2253_s26  ;;  %2028 = vmatprep.subr.bf16.mxu0 %v2247_v0  ;;  %v1809_v0 = vld [vmem:[%s2645_s11] ss:$0 sm:$0xff] }
 0x892   : > { %2030 = vmatpush3.bf16.msra.mxu0 %v2029_v6 }
 0x893   : > { %1511 = vrot.lane.b32.xlu0 %v1336_v38, %s2254_s27 }
 0x902   : > { %v1421_v49 = vpop.xlane.xlu0 %1420 }
 0x903   : > { %v1422_v50 = vsub.f32 %v1418_v46, %v1421_v49 }
 0x905   : > { %v1423_v51 = vmul.f32 1.442695, %v1422_v50 }
 0x906   : > { %v1431_v52 = vpop.permute.xlu0 %1430 }
 0x907   : > { %2103 = vpow2.f32 %v1423_v51  ;;  %1960 = vmatpush3.msra.mxu1 %v1431_v52 }
 0x90a   : > { %v1508_v10 = vpop.permute.xlu0 %1507 }
 0x90b   : > { %v1518_v12 = vsel %vm844_vm2, %v2570_v8, %v1508_v10 }
 0x90e   : > { %v1512_v11 = vpop.permute.xlu0 %1511 }
 0x90f   : > { %v1520_v13 = vsel %vm1519_vm4, %v1518_v12, %v1512_v11 }
 0x911   : > { %v2104_v1 = vpop.eup %2103 }
 0x912   : > { %v1425_v53 = vsel %vm922_vm3, %v2104_v1, 0.0 }
 0x913   : > { %1426 = vadd.xlane.f32.xlu1 %v1425_v53 }
 0x9a0   : > { %v1427_v54 = vpop.xlane.xlu1 %1426 }
 0x9a1   : > { %2105 = vrcp.f32 %v1427_v54 }
 0x9ab   : > { %v2106_v55 = vpop.eup %2105 }
 0x9ac   : > { %v1429_v56 = vmul.f32 %v2106_v55, %v2104_v1 }
 0x9ae   : > { %1962 = vmatmul.mubr.msk.f32.vlgmr.msra.gmra.mrb[16].mxu1 %vm922_vm3, %v1429_v56 }
 0xa81   : > { %v1502_v7 = vpop.f32.mrb[16].mxu1 }
 0xa82   : > { %1515 = vrot.lane.b32.xlu0 %v1502_v7, %s2255_s30  ;;  %v1963_v9 = vpop.f32.mrb[17].mxu1 }
 0xaf4   : > { %v1516_v14 = vpop.permute.xlu0 %1515 }
 0xaf5   : > { %v1522_v15 = vsel %vm1521_vm5, %v1520_v13, %v1516_v14 }
 0xaf6   : > { %1981 = vmatmul.mubr.msk.f32.vlgmr.msra.gmra.mrb[4].mxu0 %vm594_vm1, %v1522_v15 }
 0xbc9   : > { %v1607_v16 = vpop.f32.mrb[4].mxu0 }
 0xbca   : > { %v1608_v17 = vadd.f32 %v1809_v0, %v1607_v16  ;;  %v1982_v18 = vpop.f32.mrb[5].mxu0 }
 0xbcc   : > { %v1611_v19 = vadd.f32 %v1608_v17, %v2513_v28  ;;  %v1811_v28 = vld [vmem:[%s2666_s29] ss:$0 sm:$0xff] }
 0xbce   : > { %v1614_v20 = vsel %vm594_vm1, %v1611_v19, 0.0 }
 0xbcf   : > { %1615 = vadd.xlane.f32.xlu1 %v1614_v20 }
 0xc5c   : > { %v1616_v21 = vpop.xlane.xlu1 %1615 }
 0xc5d   : > { %v1618_v8 = vmul.f32 0.015625, %v1616_v21 }
 0xc5f   : > { %v1619_v22 = vsub.f32 %v1611_v19, %v1618_v8 }
 0xc61   : > { %v1620_v23 = vmul.f32 %v1619_v22, %v1619_v22 }
 0xc63   : > { %v1621_v24 = vsel %vm594_vm1, %v1620_v23, 0.0 }
 0xc64   : > { %1622 = vadd.xlane.f32.xlu0 %v1621_v24 }
 0xcf1   : > { %v1623_v25 = vpop.xlane.xlu0 %1622 }
 0xcf2   : > { %v1624_v26 = vmul.f32 0.015625, %v1623_v25 }
 0xcf4   : > { %v1625_v27 = vadd.f32 1e-05, %v1624_v26 }
 0xcf6   : > { %2107 = vrsqrt.f32 %v1625_v27 }
 0xd00   : > { %v2108_v29 = vpop.eup %2107 }
 0xd01   : > { %v1627_v30 = vmul.f32 %v2108_v29, %v1619_v22 }
 0xd03   : > { %v1634_v32 = vmul.f32 %v1811_v28, %v1627_v30 }
 0xd05   : > { %v1641_v33 = vadd.f32 %v1812_v31, %v1634_v32 }
 0xd07   : > { %1642 = vst.msk [vmem:[%s572_s19] sm:$0xff] %vm594_vm1, %v1641_v33 }
 0xd08 PF: > { %s2669_s20 = sld [smem:[#allocation12_spill]] }
 0xd0e   : > { %s27_s29 = sadd.s32 1, %s2669_s20  }
 0xd0f   : > { %p24_p6 = scmp.ge.s32.totalorder %s27_s29, 4  }
 0xd11   :  { %26 = sbr.rel (!%p24_p6) target bundleno = 7 (0x7), region = 132 }
 0xd18   :  { %1662 = vsyncpa [#allocation3], 1 }
 0xd19   :  { %1664 = vsyncpa [#allocation3 + $0x1], 1 }
 0xd1a   :  { %1665 = vsyncpa [#allocation5], 1 }
 0xd1b   :  { %1666 = vsyncpa [#allocation8], 1 }

// kernel: detr_decoder.9
= control target key start
LH: loop header
LB: loop body
LE: loop exit
PB: predicated region body
PF: predicated region fallthrough
CT: control target
= control target key end

     0   :  { %s2050_s29 = smov 0   ;;  %s2304_s0 = inlined_call_operand.vmem [shape: f32[2,8,64], index: 0, kind: input, shape index: {}, may-alias: {0,2}]   ;;  %s2305_s1 = inlined_call_operand.vmem [shape: f32[2,8,64], index: 1, kind: input, shape index: {}, may-alias: {1,3}]   ;;  %s2306_s2 = inlined_call_operand.vmem [shape: f32[2,8,64], index: 2, kind: input, shape index: {}, may-alias: {0,2}]   ;;  %s2307_s3 = inlined_call_operand.vmem [shape: f32[2,8,64], index: 3, kind: input, shape index: {}, may-alias: {1,3}]   ;;  %s2308_s4 = inlined_call_operand.vmem [shape: f32[64,64], index: 4, kind: input, shape index: {}]   ;;  %s2309_s5 = inlined_call_operand.vmem [shape: f32[1,64], index: 5, kind: input, shape index: {}]   ;;  %s2310_s6 = inlined_call_operand.vmem [shape: f32[64,64], index: 6, kind: input, shape index: {}]   ;;  %s2311_s7 = inlined_call_operand.vmem [shape: f32[1,64], index: 7, kind: input, shape index: {}]   ;;  %s2312_s8 = inlined_call_operand.vmem [shape: f32[64,64], index: 8, kind: input, shape index: {}]   ;;  %s2313_s9 = inlined_call_operand.vmem [shape: f32[1,64], index: 9, kind: input, shape index: {}]   ;;  %s2314_s10 = inlined_call_operand.vmem [shape: f32[64,64], index: 10, kind: input, shape index: {}]   ;;  %s2315_s11 = inlined_call_operand.vmem [shape: f32[1,64], index: 11, kind: input, shape index: {}]   ;;  %s2316_s12 = inlined_call_operand.vmem [shape: f32[1,64], index: 12, kind: input, shape index: {}]   ;;  %s2317_s13 = inlined_call_operand.vmem [shape: f32[1,64], index: 13, kind: input, shape index: {}]   ;;  %s2318_s14 = inlined_call_operand.vmem [shape: f32[2,8,64], index: 14, kind: output, shape index: {}]  }
   0x1 LB: > { %s1673_s30 = sadd.s32 4294967295, %s1964_s29   ;;  %p1677_p0 = scmp.ge.s32.totalorder %s1964_s29, 1  ;;  %s1964_s29 = sphi %s2050_s29, %s24_s29  }
   0x2   : > { %p438_p1 = scmp.lt.s32.totalorder %s1964_s29, 3 }
   0x4   : > { %p439_p2 = pnand %p1677_p0, %p438_p1 }
   0x5   : > { %v609_v0 = vld [vmem:[%s2310_s6] sm:$0xff] (!%p439_p2)  ;;  %v610_v1 = vld [vmem:[%s2310_s6 + $0x8] sm:$0xff] (!%p439_p2)  ;;  %v1966_v3 = vmov (!%p439_p2), 0.0|0.0   ;;  %v611_v6 = vld [vmem:[%s2310_s6 + $0x10] sm:$0xff] (!%p439_p2)  ;;  %p494_p3 = scmp.lt.s32.totalorder (!%p439_p2), %s1673_s30, 1  ;;  %vm1967_vm0 = vmmov (!%p439_p2), 0  }
   0x6   : > { %442 = sbr.rel (%p439_p2) target bundleno = 3222 (0xc96), region = 76  ;;  %v520_v2 = vld [vmem:[%s2308_s4] sm:$0xff] (!%p439_p2)  ;;  %1887 = vmatprep.subr.bf16.mxu1 (!%p439_p2), %v1966_v3  ;;  %v1888_v4 = vpack.c.bf16 (!%p439_p2), %v610_v1, %v609_v0  ;;  %1875 = vmatprep.subr.bf16.mxu0 (!%p439_p2), %v1966_v3  ;;  %v521_v5 = vld [vmem:[%s2308_s4 + $0x8] sm:$0xff] (!%p439_p2)  ;;  %v612_v7 = vld [vmem:[%s2310_s6 + $0x18] sm:$0xff] (!%p439_p2)  ;;  %v1968_v11 = vmov (!%p439_p2), 0.0   ;;  %vm535_vm1 = vcmask (!%p439_p2), 523264  }
   0x7   : > { %v1876_v8 = vpack.c.bf16 (!%p439_p2), %v521_v5, %v520_v2  ;;  %v522_v9 = vld [vmem:[%s2308_s4 + $0x10] sm:$0xff] (!%p439_p2)  ;;  %v523_v10 = vld [vmem:[%s2308_s4 + $0x18] sm:$0xff] (!%p439_p2)  ;;  %1794 = vmatprep.mubr.msk.f32.mxu1 (!%p439_p2), %vm1967_vm0, %v1968_v11  ;;  %1775 = vmatprep.mubr.msk.f32.mxu0 (!%p439_p2), %vm1967_vm0, %v1968_v11  ;;  %v1891_v12 = vpack.c.bf16 (!%p439_p2), %v612_v7, %v611_v6  ;;  %v613_v14 = vld [vmem:[%s2310_s6 + $0x20] sm:$0xff] (!%p439_p2)  ;;  %vm785_vm2 = vcmask (!%p439_p2), 130048   ;;  %s1969_s21 = smov (!%p439_p2), 112   ;;  %vm863_vm3 = vcmask (!%p439_p2), 64512  }
   0x8   : > { %1889 = vmatpush3.bf16.msra.mxu1 (!%p439_p2), %v1888_v4  ;;  %v1879_v13 = vpack.c.bf16 (!%p439_p2), %v523_v10, %v522_v9  ;;  %v614_v15 = vld [vmem:[%s2310_s6 + $0x28] sm:$0xff] (!%p439_p2)  ;;  %v524_v16 = vld [vmem:[%s2308_s4 + $0x20] sm:$0xff] (!%p439_p2)  ;;  %v615_v20 = vld [vmem:[%s2310_s6 + $0x30] sm:$0xff] (!%p439_p2)  ;;  %s1972_s15 = smov (!%p439_p2), 16   ;;  %s1974_s18 = smov (!%p439_p2), 48   ;;  %vm1460_vm4 = vcmask (!%p439_p2), 261120  }
   0x9   : > { %1877 = vmatpush3.bf16.msra.mxu0 (!%p439_p2), %v1876_v8  ;;  %1890 = vmatprep.subr.bf16.mxu1 (!%p439_p2), %v1966_v3  ;;  %v525_v17 = vld [vmem:[%s2308_s4 + $0x28] sm:$0xff] (!%p439_p2)  ;;  %v1894_v18 = vpack.c.bf16 (!%p439_p2), %v614_v15, %v613_v14  ;;  %v616_v21 = vld [vmem:[%s2310_s6 + $0x38] sm:$0xff] (!%p439_p2)  ;;  %v526_v22 = vld [vmem:[%s2308_s4 + $0x30] sm:$0xff] (!%p439_p2)  ;;  %vm1462_vm5 = vcmask (!%p439_p2), 392192  }
   0xa   : > { %1878 = vmatprep.subr.bf16.mxu0 (!%p439_p2), %v1966_v3  ;;  %v1882_v19 = vpack.c.bf16 (!%p439_p2), %v525_v17, %v524_v16  ;;  %v527_v23 = vld [vmem:[%s2308_s4 + $0x38] sm:$0xff] (!%p439_p2)  ;;  %v1897_v24 = vpack.c.bf16 (!%p439_p2), %v616_v21, %v615_v20  ;;  %v1685_v32 = vld [vmem:[%s2311_s7] ss:$0 sm:$0xff] (!%p439_p2)  ;;  %v698_v41 = vld [vmem:[%s2312_s8 + $0x8] sm:$0xff] (!%p439_p2) }
   0xb   : > { %v1885_v27 = vpack.c.bf16 (!%p439_p2), %v527_v23, %v526_v22  ;;  %v1683_v33 = vld [vmem:[%s2309_s5] ss:$0 sm:$0xff] (!%p439_p2)  ;;  %v699_v42 = vld [vmem:[%s2312_s8 + $0x10] sm:$0xff] (!%p439_p2)  ;;  %v700_v44 = vld [vmem:[%s2312_s8 + $0x18] sm:$0xff] (!%p439_p2) }
   0xc   : > { %1892 = vmatpush3.bf16.msra.mxu1 (!%p439_p2), %v1891_v12  ;;  %v697_v40 = vld [vmem:[%s2312_s8] sm:$0xff] (!%p439_p2)  ;;  %v1903_v45 = vpack.c.bf16 (!%p439_p2), %v700_v44, %v699_v42  ;;  %v702_v47 = vld [vmem:[%s2312_s8 + $0x28] sm:$0xff] (!%p439_p2)  ;;  %v703_v49 = vld [vmem:[%s2312_s8 + $0x30] sm:$0xff] (!%p439_p2) }
   0xd   : > { %s2320_s30 = smov (!%p494_p3, %s1673_s30), 1  ;;  %1880 = vmatpush3.bf16.msra.mxu0 %v1879_v13  ;;  %1893 = vmatprep.subr.bf16.mxu1 %v1966_v3  ;;  %v1900_v43 = vpack.c.bf16 %v698_v41, %v697_v40  ;;  %v701_v46 = vld [vmem:[%s2312_s8 + $0x20] sm:$0xff]  ;;  %v704_v50 = vld [vmem:[%s2312_s8 + $0x38] sm:$0xff] }
   0xe   : > { %s2102_s25 = sshll.u32 %s2320_s30, 3  ;;  %1881 = vmatprep.subr.bf16.mxu0 %v1966_v3  ;;  %v1906_v48 = vpack.c.bf16 %v702_v47, %v701_v46  ;;  %v1909_v51 = vpack.c.bf16 %v704_v50, %v703_v49  ;;  %v1687_v61 = vld [vmem:[%s2313_s9] ss:$0 sm:$0xff]  ;;  %s1973_s30 = smov 32  }
   0xf   : > { %s505_s17 = scalar_lea.vmem %s2306_s2, %s2102_s25  ;;  %s509_s20 = scalar_lea.vmem %s2307_s3, %s2102_s25 }
  0x10   : > { %s497_s28 = scalar_lea.vmem %s2304_s0, %s2102_s25  ;;  %s501_s16 = scalar_lea.vmem %s2305_s1, %s2102_s25  ;;  %1895 = vmatpush3.bf16.msra.mxu1 %v1894_v18  ;;  %v517_v25 = vld [vmem:[%s505_s17] sm:$0xff] }
  0x11   : > { %v518_v26 = vld [vmem:[%s509_s20] sm:$0xff]  ;;  %1883 = vmatpush3.bf16.msra.mxu0 %v1882_v19  ;;  %1896 = vmatprep.subr.bf16.mxu1 %v1966_v3 }
  0x12   : > { %v2135_v28 = vld [vmem:[%s497_s28] sm:$0xff]  ;;  %1884 = vmatprep.subr.bf16.mxu0 %v1966_v3  ;;  %v519_v30 = vadd.f32 %v518_v26, %v517_v25  ;;  %s1970_s28 = smov 96  }
  0x13   : > { %v515_v29 = vld [vmem:[%s501_s16] sm:$0xff] }
  0x14   : > { %1898 = vmatpush3.bf16.msra.mxu1 %v1897_v24  ;;  %v516_v31 = vadd.f32 %v515_v29, %v2135_v28 }
  0x15   : > { %1886 = vmatpush3.bf16.msra.mxu0 %v1885_v27  ;;  %1816 = vmatprep.subr.mxu1 %v1968_v11 }
  0x16   : > { %1899 = vmatprep.subr.bf16.mxu0 %v1966_v3 }
  0x17   : > { %1795 = vmatmul.mubr.msk.f32.vlgmr.msra.gmra.mrb[0].mxu1 %vm535_vm1, %v519_v30 }
  0x18   : > { %1776 = vmatmul.mubr.msk.f32.vlgmr.msra.gmra.mrb[0].mxu0 %vm535_vm1, %v516_v31  ;;  %1818 = vmatprep.mubr.msk.f32.mxu1 %vm1967_vm0, %v1968_v11 }
  0x19   : > { %1813 = vmatprep.mubr.msk.f32.mxu0 %vm1967_vm0, %v1968_v11  ;;  %1901 = vmatpush3.bf16.msra.mxu0 %v1900_v43 }
  0x1a   : > { %1902 = vmatprep.subr.bf16.mxu0 %v1966_v3 }
  0x1d   : > { %1904 = vmatpush3.bf16.msra.mxu0 %v1903_v45 }
  0x1e   : > { %1905 = vmatprep.subr.bf16.mxu0 %v1966_v3 }
  0x21   : > { %1907 = vmatpush3.bf16.msra.mxu0 %v1906_v48 }
  0x22   : > { %1908 = vmatprep.subr.bf16.mxu0 %v1966_v3 }
  0x25   : > { %1910 = vmatpush3.bf16.msra.mxu0 %v1909_v51 }
  0x26   : > { %1911 = vmatprep.subr.bf16.mxu0 %v1966_v3 }
  0x28   : > { %1814 = vmatmul.mubr.msk.f32.vlgmr.msra.gmra.mrb[2].mxu0 %vm535_vm1, %v517_v25 }
  0x29   : > { %1872 = vmatprep.mubr.msk.f32.mxu0 %vm1967_vm0, %v1968_v11 }
  0xea   : > { %v693_v34 = vpop.f32.mrb[0].mxu1 }
  0xeb   : > { %v2153_v35 = vadd.f32 %v1685_v32, %v693_v34  ;;  %v1796_v36 = vpop.f32.mrb[1].mxu1  ;;  %v605_v37 = vpop.f32.mrb[0].mxu0 }
  0xec   : > { %v2155_v38 = vadd.f32 %v1683_v33, %v605_v37  ;;  %v1777_v39 = vpop.f32.mrb[1].mxu0 }
  0xed   : > { %950 = vrot.lane.b32.xlu1 %v2153_v35, %s1969_s21  ;;  %1817 = vmatpush3.xpose.msk.msra.mxu1 %vm785_vm2, %v2153_v35 }
  0xee   : > { %1821 = vmatprep.subr.mxu1 %v1968_v11 }
  0xf0   : > { %1819 = vmatmul.mubr.msk.f32.vlgmr.msra.gmra.mrb[2].mxu1 %vm785_vm2, %v2155_v38 }
  0xf1   : > { %948 = vrot.lane.b32.xlu1 %v2155_v38, %s1969_s21  ;;  %1823 = vmatprep.mubr.msk.f32.mxu1 %vm1967_vm0, %v1968_v11 }
  0xfb   : > { %v781_v62 = vpop.f32.mrb[2].mxu0 }
  0xfc   : > { %v2204_v63 = vadd.f32 %v1687_v61, %v781_v62  ;;  %v1815_v0 = vpop.f32.mrb[3].mxu0  ;;  %v1467_v61 = vld [vmem:[%s2314_s10 + $0x18] sm:$0xff] }
  0xfd   : > { %v1469_v0 = vld [vmem:[%s2314_s10 + $0x28] sm:$0xff] }
  0xfe   : > { %1822 = vmatpush3.msra.mxu1 %v2204_v63 }
  0xff   : > { %1826 = vmatprep.subr.mxu1 %v1968_v11 }
 0x15f   : > { %v951_v4 = vpop.permute.xlu1 %950 }
 0x163   : > { %v949_v6 = vpop.permute.xlu1 %948 }
 0x1c3   : > { %v858_v52 = vpop.f32.mrb[2].mxu1 }
 0x1c4   : > { %v862_v53 = vmul.f32 0.25, %v858_v52  ;;  %v1820_v54 = vpop.f32.mrb[3].mxu1 }
 0x1c6   : > { %v864_v55 = vsel %vm863_vm3, %v862_v53, -inf }
 0x1c7   : > { %865 = vmax.xlane.f32.xlu0 %v864_v55 }
 0x254   : > { %v866_v56 = vpop.xlane.xlu0 %865 }
 0x255   : > { %v867_v57 = vsub.f32 %v862_v53, %v866_v56 }
 0x257   : > { %v868_v58 = vmul.f32 1.442695, %v867_v57  ;;  %v1464_v57 = vld [vmem:[%s2314_s10] sm:$0xff] }
 0x259   : > { %1940 = vpow2.f32 %v868_v58  ;;  %v1465_v58 = vld [vmem:[%s2314_s10 + $0x8] sm:$0xff] }
 0x263   : > { %v1941_v59 = vpop.eup %1940 }
 0x264   : > { %v870_v60 = vsel %vm863_vm3, %v1941_v59, 0.0 }
 0x265   : > { %871 = vadd.xlane.f32.xlu0 %v870_v60  ;;  %v1912_v60 = vpack.c.bf16 %v1465_v58, %v1464_v57 }
 0x267   : > { %1913 = vmatpush3.bf16.msra.mxu0 %v1912_v60 }
 0x268   : > { %1914 = vmatprep.subr.bf16.mxu0 %v1966_v3 }
 0x2f2   : > { %v872_v1 = vpop.xlane.xlu0 %871 }
 0x2f3   : > { %1942 = vrcp.f32 %v872_v1 }
 0x2fd   : > { %v1943_v2 = vpop.eup %1942 }
 0x2fe   : > { %v874_v5 = vmul.f32 %v1943_v2, %v1941_v59  ;;  %v1466_v59 = vld [vmem:[%s2314_s10 + $0x10] sm:$0xff] }
 0x2ff   : > { %v1915_v62 = vpack.c.bf16 %v1467_v61, %v1466_v59  ;;  %v1470_v2 = vld [vmem:[%s2314_s10 + $0x30] sm:$0xff] }
 0x300   : > { %1824 = vmatmul.mubr.msk.f32.vlgmr.msra.gmra.mrb[4].mxu1 %vm863_vm3, %v874_v5 }
 0x301   : > { %1827 = vmatpush3.xpose.msk.msra.mxu1 %vm785_vm2, %v951_v4  ;;  %1828 = vmatprep.mubr.msk.f32.mxu1 %vm1967_vm0, %v1968_v11  ;;  %v1471_v4 = vld [vmem:[%s2314_s10 + $0x38] sm:$0xff] }
 0x302   : > { %1831 = vmatprep.subr.mxu1 %v1968_v11  ;;  %1916 = vmatpush3.bf16.msra.mxu0 %v1915_v62  ;;  %v1921_v5 = vpack.c.bf16 %v1471_v4, %v1470_v2 }
 0x303   : > { %1917 = vmatprep.subr.bf16.mxu0 %v1966_v3 }
 0x304   : > { %1829 = vmatmul.mubr.msk.f32.vlgmr.msra.gmra.mrb[6].mxu1 %vm785_vm2, %v949_v6 }
 0x305   : > { %1833 = vmatprep.mubr.msk.f32.mxu1 %vm1967_vm0, %v1968_v11 }
 0x3d3   : > { %v2216_v7 = vpop.f32.mrb[4].mxu1 }
 0x3d4   : > { %v1825_v8 = vpop.f32.mrb[5].mxu1 }
 0x3d7   : > { %v1022_v9 = vpop.f32.mrb[6].mxu1 }
 0x3d8   : > { %v1026_v10 = vmul.f32 0.25, %v1022_v9  ;;  %v1830_v12 = vpop.f32.mrb[7].mxu1 }
 0x3da   : > { %v1027_v13 = vsel %vm863_vm3, %v1026_v10, -inf }
 0x3db   : > { %1028 = vmax.xlane.f32.xlu0 %v1027_v13 }
 0x3f1   : > { %1039 = vrot.lane.b32.xlu0 %v2204_v63, %s1969_s21  ;;  %s1971_s21 = smov 80  }
 0x3f5   : > { %1117 = vrot.lane.b32.xlu0 %v2153_v35, %s1970_s28 }
 0x3f9   : > { %1115 = vrot.lane.b32.xlu0 %v2155_v38, %s1970_s28 }
 0x468   : > { %v1029_v14 = vpop.xlane.xlu0 %1028 }
 0x469   : > { %v1030_v15 = vsub.f32 %v1026_v10, %v1029_v14 }
 0x46b   : > { %v1031_v16 = vmul.f32 1.442695, %v1030_v15 }
 0x46c   : > { %v1040_v17 = vpop.permute.xlu0 %1039 }
 0x46d   : > { %1944 = vpow2.f32 %v1031_v16  ;;  %1832 = vmatpush3.msra.mxu1 %v1040_v17 }
 0x46e   : > { %1836 = vmatprep.subr.mxu1 %v1968_v11 }
 0x470   : > { %v1118_v22 = vpop.permute.xlu0 %1117 }
 0x474   : > { %v1116_v24 = vpop.permute.xlu0 %1115 }
 0x477   : > { %v1945_v18 = vpop.eup %1944 }
 0x478   : > { %v1033_v19 = vsel %vm863_vm3, %v1945_v18, 0.0 }
 0x479   : > { %1034 = vadd.xlane.f32.xlu1 %v1033_v19 }
 0x48a   : > { %1205 = vrot.lane.b32.xlu1 %v2204_v63, %s1970_s28 }
 0x48e   : > { %1283 = vrot.lane.b32.xlu1 %v2153_v35, %s1971_s21 }
 0x506   : > { %v1035_v20 = vpop.xlane.xlu1 %1034 }
 0x507   : > { %1946 = vrcp.f32 %v1035_v20 }
 0x50a   : > { %v1206_v25 = vpop.permute.xlu1 %1205 }
 0x50e   : > { %v1284_v39 = vpop.permute.xlu1 %1283 }
 0x511   : > { %v1947_v21 = vpop.eup %1946 }
 0x512   : > { %v1037_v23 = vmul.f32 %v1947_v21, %v1945_v18 }
 0x514   : > { %1834 = vmatmul.mubr.msk.f32.vlgmr.msra.gmra.mrb[8].mxu1 %vm863_vm3, %v1037_v23 }
 0x515   : > { %1837 = vmatpush3.xpose.msk.msra.mxu1 %vm785_vm2, %v1118_v22  ;;  %1838 = vmatprep.mubr.msk.f32.mxu1 %vm1967_vm0, %v1968_v11 }
 0x516   : > { %1841 = vmatprep.subr.mxu1 %v1968_v11 }
 0x518   : > { %1839 = vmatmul.mubr.msk.f32.vlgmr.msra.gmra.mrb[10].mxu1 %vm785_vm2, %v1116_v24 }
 0x519   : > { %1842 = vmatpush3.msra.mxu1 %v1206_v25  ;;  %1843 = vmatprep.mubr.msk.f32.mxu1 %vm1967_vm0, %v1968_v11 }
 0x51a   : > { %1846 = vmatprep.subr.mxu1 %v1968_v11 }
 0x5e7   : > { %v1111_v26 = vpop.f32.mrb[8].mxu1 }
 0x5e8   : > { %v1835_v27 = vpop.f32.mrb[9].mxu1 }
 0x5eb   : > { %v1189_v29 = vpop.f32.mrb[10].mxu1 }
 0x5ec   : > { %v1193_v30 = vmul.f32 0.25, %v1189_v29  ;;  %v1840_v31 = vpop.f32.mrb[11].mxu1 }
 0x5ed   : > { %v1704_v31 = vld [vmem:[%s2317_s13] ss:$0 sm:$0xff] }
 0x5ee   : > { %v1194_v32 = vsel %vm863_vm3, %v1193_v30, -inf }
 0x5ef   : > { %1195 = vmax.xlane.f32.xlu0 %v1194_v32 }
 0x67c   : > { %v1196_v33 = vpop.xlane.xlu0 %1195 }
 0x67d   : > { %v1197_v34 = vsub.f32 %v1193_v30, %v1196_v33 }
 0x67f   : > { %v1198_v35 = vmul.f32 1.442695, %v1197_v34 }
 0x681   : > { %1948 = vpow2.f32 %v1198_v35 }
 0x68b   : > { %v1949_v36 = vpop.eup %1948 }
 0x68c   : > { %v1200_v37 = vsel %vm863_vm3, %v1949_v36, 0.0 }
 0x68d   : > { %1201 = vadd.xlane.f32.xlu1 %v1200_v37 }
 0x69e   : > { %1281 = vrot.lane.b32.xlu1 %v2155_v38, %s1971_s21 }
 0x71a   : > { %v1202_v40 = vpop.xlane.xlu1 %1201 }
 0x71b   : > { %1950 = vrcp.f32 %v1202_v40 }
 0x71e   : > { %v1282_v43 = vpop.permute.xlu1 %1281 }
 0x725   : > { %v1951_v41 = vpop.eup %1950 }
 0x726   : > { %v1204_v42 = vmul.f32 %v1951_v41, %v1949_v36 }
 0x728   : > { %1844 = vmatmul.mubr.msk.f32.vlgmr.msra.gmra.mrb[12].mxu1 %vm863_vm3, %v1204_v42 }
 0x729   : > { %1847 = vmatpush3.xpose.msk.msra.mxu1 %vm785_vm2, %v1284_v39  ;;  %1848 = vmatprep.mubr.msk.f32.mxu1 %vm1967_vm0, %v1968_v11 }
 0x72a   : > { %1851 = vmatprep.subr.mxu1 %v1968_v11 }
 0x72c   : > { %1849 = vmatmul.mubr.msk.f32.vlgmr.msra.gmra.mrb[14].mxu1 %vm785_vm2, %v1282_v43 }
 0x72d   : > { %1853 = vmatprep.mubr.msk.f32.mxu1 %vm1967_vm0, %v1968_v11 }
 0x7fb   : > { %v1277_v38 = vpop.f32.mrb[12].mxu1 }
 0x7fc   : > { %v1845_v44 = vpop.f32.mrb[13].mxu1 }
 0x7ff   : > { %v1355_v45 = vpop.f32.mrb[14].mxu1 }
 0x800   : > { %v1359_v46 = vmul.f32 0.25, %v1355_v45  ;;  %v1850_v47 = vpop.f32.mrb[15].mxu1 }
 0x802   : > { %v1360_v48 = vsel %vm863_vm3, %v1359_v46, -inf }
 0x803   : > { %1361 = vmax.xlane.f32.xlu0 %v1360_v48 }
 0x819   : > { %1371 = vrot.lane.b32.xlu0 %v2204_v63, %s1971_s21  ;;  %v1468_v63 = vld [vmem:[%s2314_s10 + $0x20] sm:$0xff]  ;;  %s513_s21 = scalar_lea.vmem %s2318_s14, %s2102_s25 }
 0x81a   : > { %v1918_v1 = vpack.c.bf16 %v1469_v0, %v1468_v63 }
 0x81c   : > { %1919 = vmatpush3.bf16.msra.mxu0 %v1918_v1 }
 0x81d   : > { %1448 = vrot.lane.b32.xlu0 %v1111_v26, %s1972_s15  ;;  %1920 = vmatprep.subr.bf16.mxu0 %v1966_v3  ;;  %v1701_v3 = vld [vmem:[%s2315_s11] ss:$0 sm:$0xff] }
 0x820   : > { %1922 = vmatpush3.bf16.msra.mxu0 %v1921_v5 }
 0x821   : > { %1452 = vrot.lane.b32.xlu0 %v1277_v38, %s1973_s30 }
 0x890   : > { %v1362_v49 = vpop.xlane.xlu0 %1361 }
 0x891   : > { %v1363_v50 = vsub.f32 %v1359_v46, %v1362_v49 }
 0x893   : > { %v1364_v51 = vmul.f32 1.442695, %v1363_v50 }
 0x894   : > { %v1372_v52 = vpop.permute.xlu0 %1371 }
 0x895   : > { %1952 = vpow2.f32 %v1364_v51  ;;  %1852 = vmatpush3.msra.mxu1 %v1372_v52 }
 0x898   : > { %v1449_v9 = vpop.permute.xlu0 %1448 }
 0x899   : > { %v1459_v12 = vsel %vm785_vm2, %v2216_v7, %v1449_v9 }
 0x89c   : > { %v1453_v10 = vpop.permute.xlu0 %1452 }
 0x89d   : > { %v1461_v13 = vsel %vm1460_vm4, %v1459_v12, %v1453_v10 }
 0x89f   : > { %v1953_v11 = vpop.eup %1952 }
 0x8a0   : > { %v1366_v53 = vsel %vm863_vm3, %v1953_v11, 0.0 }
 0x8a1   : > { %1367 = vadd.xlane.f32.xlu1 %v1366_v53 }
 0x92e   : > { %v1368_v54 = vpop.xlane.xlu1 %1367 }
 0x92f   : > { %1954 = vrcp.f32 %v1368_v54 }
 0x939   : > { %v1955_v55 = vpop.eup %1954 }
 0x93a   : > { %v1370_v56 = vmul.f32 %v1955_v55, %v1953_v11 }
 0x93c   : > { %1854 = vmatmul.mubr.msk.f32.vlgmr.msra.gmra.mrb[16].mxu1 %vm863_vm3, %v1370_v56 }
 0xa0f   : > { %v1443_v6 = vpop.f32.mrb[16].mxu1 }
 0xa10   : > { %1456 = vrot.lane.b32.xlu0 %v1443_v6, %s1974_s18  ;;  %v1855_v8 = vpop.f32.mrb[17].mxu1 }
 0xa82   : > { %v1457_v14 = vpop.permute.xlu0 %1456 }
 0xa83   : > { %v1463_v15 = vsel %vm1462_vm5, %v1461_v13, %v1457_v14 }
 0xa84   : > { %1873 = vmatmul.mubr.msk.f32.vlgmr.msra.gmra.mrb[4].mxu0 %vm535_vm1, %v1463_v15 }
 0xb57   : > { %v1548_v16 = vpop.f32.mrb[4].mxu0 }
 0xb58   : > { %v1549_v17 = vadd.f32 %v1701_v3, %v1548_v16  ;;  %v1874_v18 = vpop.f32.mrb[5].mxu0 }
 0xb5a   : > { %v1552_v19 = vadd.f32 %v1549_v17, %v2135_v28  ;;  %v1703_v28 = vld [vmem:[%s2316_s12] ss:$0 sm:$0xff] }
 0xb5c   : > { %v1555_v20 = vsel %vm535_vm1, %v1552_v19, 0.0 }
 0xb5d   : > { %1556 = vadd.xlane.f32.xlu1 %v1555_v20 }
 0xbea   : > { %v1557_v21 = vpop.xlane.xlu1 %1556 }
 0xbeb   : > { %v1559_v7 = vmul.f32 0.015625, %v1557_v21 }
 0xbed   : > { %v1560_v22 = vsub.f32 %v1552_v19, %v1559_v7 }
 0xbef   : > { %v1561_v23 = vmul.f32 %v1560_v22, %v1560_v22 }
 0xbf1   : > { %v1562_v24 = vsel %vm535_vm1, %v1561_v23, 0.0 }
 0xbf2   : > { %1563 = vadd.xlane.f32.xlu0 %v1562_v24 }
 0xc7f   : > { %v1564_v25 = vpop.xlane.xlu0 %1563 }
 0xc80   : > { %v1565_v26 = vmul.f32 0.015625, %v1564_v25 }
 0xc82   : > { %v1566_v27 = vadd.f32 1e-05, %v1565_v26 }
 0xc84   : > { %1956 = vrsqrt.f32 %v1566_v27 }
 0xc8e   : > { %v1957_v29 = vpop.eup %1956 }
 0xc8f   : > { %v1568_v30 = vmul.f32 %v1957_v29, %v1560_v22 }
 0xc91   : > { %v1575_v32 = vmul.f32 %v1703_v28, %v1568_v30 }
 0xc93   : > { %v1582_v33 = vadd.f32 %v1704_v31, %v1575_v32 }
 0xc95   : > { %1583 = vst.msk [vmem:[%s513_s21] sm:$0xff] %vm535_vm1, %v1582_v33 }
 0xc96 PF: > { %s24_s29 = sadd.s32 1, %s1964_s29  }
 0xc97   : > { %p21_p4 = scmp.ge.s32.totalorder %s24_s29, 4  }
 0xc99   :  { %23 = sbr.rel (!%p21_p4) target bundleno = 1 (0x1), region = 115 }

// kernel: detr_decoder.11
= control target key start
LH: loop header
LB: loop body
LE: loop exit
PB: predicated region body
PF: predicated region fallthrough
CT: control target
= control target key end

     0   :  { %14 = vsyncpa [#allocation3], 0  ;;  %s1053_s0 = inlined_call_operand.vmem [shape: f32[2,8,64], index: 0, kind: input, shape index: {}]   ;;  %s1054_s1 = inlined_call_operand.vmem [shape: f32[64,32], index: 1, kind: input, shape index: {}]   ;;  %s1055_s2 = inlined_call_operand.vmem [shape: f32[1,32], index: 2, kind: input, shape index: {}]   ;;  %s1056_s3 = inlined_call_operand.vmem [shape: f32[32,64], index: 3, kind: input, shape index: {}]   ;;  %s1057_s4 = inlined_call_operand.vmem [shape: f32[1,64], index: 4, kind: input, shape index: {}]   ;;  %s1058_s5 = inlined_call_operand.vmem [shape: f32[1,64], index: 5, kind: input, shape index: {}]   ;;  %s1059_s6 = inlined_call_operand.vmem [shape: f32[1,64], index: 6, kind: input, shape index: {}]   ;;  %s1060_s7 = inlined_call_operand.vmem [shape: f32[1,64], index: 7, kind: input, shape index: {}]   ;;  %s1061_s8 = inlined_call_operand.vmem [shape: f32[1,64], index: 8, kind: input, shape index: {}]   ;;  %s1062_s9 = inlined_call_operand.hbm [shape: f32[2,8,64], index: 9, kind: output, shape index: {}]  }
   0x1   :  { %16 = vsyncpa [#allocation3 + $0x1], 0  ;;  %s893_s30 = smov 0   ;;  %s895_s10 = smov 0  }
   0x2   :  { %s897_s11 = smov 0   ;;  %s899_s12 = smov 0  }
   0x3 LB: > { %s914_s13 = sadd.s32 4294967295, %s837_s12   ;;  %s644_s14 = sadd.s32 4294967294, %s837_s12   ;;  %s837_s12 = sphi %s899_s12, %s1068_s12   ;;  %s833_s11 = sphi %s897_s11, %s1067_s11   ;;  %s829_s10 = sphi %s895_s10, %s1066_s10   ;;  %s825_s30 = sphi %s893_s30, %s1065_s30  }
   0x4   : > { %s918_s15 = sadd.s32 1, %s837_s12   ;;  %s223_s16 = sadd.s32 1, %s833_s11 }
   0x5   : > { %s220_s17 = ssub.s32 %s837_s12, %s918_s15  ;;  %p233_p0 = scmp.ne.s32.totalorder %s833_s11, %s829_s10 }
   0x6   : > { %p221_p1 = scmp.eq.s32.totalorder %s220_s17, 0  ;;  %p234_p2 = scmp.eq.s32.totalorder %s914_s13, 1 }
   0x7   : > { %p239_p3 = scmp.ne.s32.totalorder %s829_s10, %s825_s30  ;;  %p240_p4 = scmp.eq.s32.totalorder %s644_s14, 1 }
   0x8   : > { %s929_s18 = scalar_select %p221_p1, %s833_s11, %s223_s16  }
   0x9   : > { %p931_p5 = por %p234_p2, %p233_p0  ;;  %p935_p6 = por %p240_p4, %p239_p3 }
   0xa   : > { %p647_p7 = scmp.ge.s32.totalorder %s837_s12, 1  ;;  %p289_p8 = scmp.lt.s32.totalorder %s837_s12, 3 }
   0xc   : > { %p290_p9 = pnand %p647_p7, %p289_p8 }
   0xd   : > { %v329_v0 = vld [vmem:[%s1054_s1] sm:$0xff] (!%p290_p9)  ;;  %v330_v1 = vld [vmem:[%s1054_s1 + $0x8] sm:$0xff] (!%p290_p9)  ;;  %v331_v2 = vld [vmem:[%s1054_s1 + $0x10] sm:$0xff] (!%p290_p9)  ;;  %v839_v3 = vmov (!%p290_p9), 0.0|0.0   ;;  %vm840_vm0 = vmmov (!%p290_p9), 0   ;;  %v841_v6 = vmov (!%p290_p9), 0.0  }
   0xe   : > { %293 = sbr.rel (%p290_p9) target bundleno = 1129 (0x469), region = 56  ;;  %707 = vmatprep.subr.bf16.mxu0 (!%p290_p9), %v839_v3  ;;  %v708_v4 = vpack.c.bf16 (!%p290_p9), %v330_v1, %v329_v0  ;;  %v332_v5 = vld [vmem:[%s1054_s1 + $0x18] sm:$0xff] (!%p290_p9)  ;;  %693 = vmatprep.mubr.msk.f32.mxu0 (!%p290_p9), %vm840_vm0, %v841_v6  ;;  %p324_p10 = scmp.lt.s32.totalorder (!%p290_p9), %s914_s13, 1  ;;  %v333_v8 = vld [vmem:[%s1054_s1 + $0x20] sm:$0xff] (!%p290_p9)  ;;  %v334_v9 = vld [vmem:[%s1054_s1 + $0x28] sm:$0xff] (!%p290_p9)  ;;  %vm344_vm1 = vcmask (!%p290_p9), 523264  }
   0xf   : > { %719 = vmatprep.subr.bf16.mxu1 (!%p290_p9), %v839_v3  ;;  %704 = vmatprep.mubr.msk.f32.mxu1 (!%p290_p9), %vm840_vm0, %v841_v6  ;;  %v711_v7 = vpack.c.bf16 (!%p290_p9), %v332_v5, %v331_v2  ;;  %v714_v10 = vpack.c.bf16 (!%p290_p9), %v334_v9, %v333_v8  ;;  %v335_v11 = vld [vmem:[%s1054_s1 + $0x30] sm:$0xff] (!%p290_p9)  ;;  %v336_v12 = vld [vmem:[%s1054_s1 + $0x38] sm:$0xff] (!%p290_p9)  ;;  %v425_v15 = vld [vmem:[%s1056_s3] sm:$0xff] (!%p290_p9)  ;;  %vm436_vm2 = vcmask (!%p290_p9), 261120   ;;  %s660_s28 = sshll.u32 (!%p290_p9), %s914_s13, 7 }
  0x10   : > { %709 = vmatpush3.bf16.msra.mxu0 (!%p290_p9), %v708_v4  ;;  %v717_v13 = vpack.c.bf16 (!%p290_p9), %v336_v12, %v335_v11  ;;  %v426_v16 = vld [vmem:[%s1056_s3 + $0x8] sm:$0xff] (!%p290_p9)  ;;  %v427_v18 = vld [vmem:[%s1056_s3 + $0x10] sm:$0xff] (!%p290_p9)  ;;  %v428_v19 = vld [vmem:[%s1056_s3 + $0x18] sm:$0xff] (!%p290_p9)  ;;  %s1010_s22 = scalar_lea.hbm (!%p290_p9), %s1062_s9, %s660_s28 }
  0x11   : > { %710 = vmatprep.subr.bf16.mxu0 (!%p290_p9), %v839_v3  ;;  %v720_v17 = vpack.c.bf16 (!%p290_p9), %v426_v16, %v425_v15  ;;  %v723_v20 = vpack.c.bf16 (!%p290_p9), %v428_v19, %v427_v18  ;;  %v650_v21 = vld [vmem:[%s1055_s2] ss:$0 sm:$0xff] (!%p290_p9) }
  0x12   : > { %v653_v30 = vld [vmem:[%s1057_s4] ss:$0 sm:$0xff] (!%p290_p9) }
  0x13   : > { %721 = vmatpush3.bf16.msra.mxu1 (!%p290_p9), %v720_v17  ;;  %v655_v45 = vld [vmem:[%s1058_s5] ss:$0 sm:$0xff] (!%p290_p9) }
  0x14   : > { %712 = vmatpush3.bf16.msra.mxu0 (!%p290_p9), %v711_v7  ;;  %722 = vmatprep.subr.bf16.mxu1 (!%p290_p9), %v839_v3  ;;  %v656_v47 = vld [vmem:[%s1059_s6] ss:$0 sm:$0xff] (!%p290_p9) }
  0x15   : > { %s325_s21 = scalar_select %p324_p10, %s914_s13, 1  ;;  %713 = vmatprep.subr.bf16.mxu0 %v839_v3  ;;  %v657_v60 = vld [vmem:[%s1060_s7] ss:$0 sm:$0xff] }
  0x16   : > { %v658_v62 = vld [vmem:[%s1061_s8] ss:$0 sm:$0xff]  ;;  %s842_s13 = smov [#allocation2]  }
  0x17   : > { %s649_s26 = sshll.u32 %s325_s21, 3  ;;  %724 = vmatpush3.bf16.msra.mxu1 %v723_v20  ;;  %s321_s21 = sand.u32 1, %s829_s10  }
  0x18   : > { %715 = vmatpush3.bf16.msra.mxu0 %v714_v10  ;;  %s327_s29 = scalar_lea.vmem %s1053_s0, %s649_s26  ;;  %s648_s23 = sshll.u32 %s321_s21, 3 }
  0x19   : > { %716 = vmatprep.subr.bf16.mxu0 %v839_v3  ;;  %v328_v14 = vld [vmem:[%s327_s29] sm:$0xff]  ;;  %s323_s29 = scalar_lea.vmem [#allocation2], %s648_s23  ;;  %s572_s24 = scalar_lea.sflag [#allocation3], %s321_s21 }
  0x1a   : > { %s585_s14 = sshll.u32 %s323_s29, 4  ;;  %s779_s23 = sshll.u32 %s842_s13, 4  ;;  %s1012_s14 = int_to_ptr.vmem [resolvable:$true] %s585_s14  ;;  %s780_s23 = int_to_ptr.vmem [resolvable:$false] %s779_s23 }
  0x1b   : > { %s775_s25 = scalar_lea.vmem %s1012_s14, 128  ;;  %s781_s26 = scalar_lea.vmem %s780_s23, 256 }
  0x1c   : > { %718 = vmatpush3.bf16.msra.mxu0 %v717_v13  ;;  %p776_p11 = scmp.ne.s32.totalorder %s1012_s14, %s775_s25  ;;  %p782_p0 = scmp.lt.s32.totalorder %s1012_s14, %s780_s23 }
  0x1d   : > { %p783_p1 = scmp.lt.s32.totalorder %s781_s26, %s775_s25 }
  0x1e   : > { %p777_p12 = pnand %p776_p11, %p931_p5 }
  0x1f   : > { %694 = vmatmul.mubr.msk.f32.vlgmr.msra.gmra.mrb[0].mxu0 %vm344_vm1, %v328_v14  ;;  %p784_p2 = por %p783_p1, %p782_p0 }
  0x20   : > { %p778_p13 = pneg %p777_p12 }
  0x22   : > { %p785_p3 = pnand %p784_p2, %p778_p13 }
  0xf2   : > { %v414_v22 = vpop.f32.mrb[0].mxu0 }
  0xf3   : > { %v415_v23 = vadd.f32 %v650_v21, %v414_v22  ;;  %v695_v24 = vpop.f32.mrb[1].mxu0 }
  0xf5   : > { %v652_v25 = vmul.f32 -1.442695, %v415_v23 }
  0xf7   : > { %767 = vpow2.f32 %v652_v25 }
 0x101   : > { %v768_v26 = vpop.eup %767 }
 0x102   : > { %v421_v27 = vadd.f32 1.0, %v768_v26 }
 0x104   : > { %769 = vrcp.f32 %v421_v27 }
 0x10e   : > { %v770_v28 = vpop.eup %769 }
 0x10f   : > { %v424_v29 = vmul.f32 %v770_v28, %v415_v23 }
 0x111   : > { %705 = vmatmul.mubr.msk.f32.vlgmr.msra.gmra.mrb[0].mxu1 %vm436_vm2, %v424_v29 }
 0x1e4   : > { %v506_v31 = vpop.f32.mrb[0].mxu1 }
 0x1e5   : > { %v507_v32 = vadd.f32 %v653_v30, %v506_v31  ;;  %v706_v33 = vpop.f32.mrb[1].mxu1 }
 0x1e7   : > { %v510_v34 = vadd.f32 %v507_v32, %v328_v14 }
 0x1e9   : > { %v513_v35 = vsel %vm344_vm1, %v510_v34, 0.0 }
 0x1ea   : > { %514 = vadd.xlane.f32.xlu0 %v513_v35 }
 0x277   : > { %v515_v36 = vpop.xlane.xlu0 %514 }
 0x278   : > { %v517_v37 = vmul.f32 0.015625, %v515_v36 }
 0x27a   : > { %v518_v38 = vsub.f32 %v510_v34, %v517_v37 }
 0x27c   : > { %v519_v39 = vmul.f32 %v518_v38, %v518_v38 }
 0x27e   : > { %v520_v40 = vsel %vm344_vm1, %v519_v39, 0.0 }
 0x27f   : > { %521 = vadd.xlane.f32.xlu0 %v520_v40 }
 0x30c   : > { %v522_v41 = vpop.xlane.xlu0 %521 }
 0x30d   : > { %v523_v42 = vmul.f32 0.015625, %v522_v41 }
 0x30f   : > { %v524_v43 = vadd.f32 1e-05, %v523_v42 }
 0x311   : > { %771 = vrsqrt.f32 %v524_v43 }
 0x31b   : > { %v772_v44 = vpop.eup %771 }
 0x31c   : > { %v526_v46 = vmul.f32 %v772_v44, %v518_v38 }
 0x31e   : > { %v533_v48 = vmul.f32 %v655_v45, %v526_v46 }
 0x320   : > { %v540_v49 = vadd.f32 %v656_v47, %v533_v48 }
 0x322   : > { %v543_v50 = vsel %vm344_vm1, %v540_v49, 0.0 }
 0x323   : > { %544 = vadd.xlane.f32.xlu1 %v543_v50 }
 0x3b0   : > { %v545_v51 = vpop.xlane.xlu1 %544 }
 0x3b1   : > { %v546_v52 = vmul.f32 0.015625, %v545_v51 }
 0x3b3   : > { %v547_v53 = vsub.f32 %v540_v49, %v546_v52 }
 0x3b5   : > { %v548_v54 = vmul.f32 %v547_v53, %v547_v53 }
 0x3b7   : > { %v549_v55 = vsel %vm344_vm1, %v548_v54, 0.0 }
 0x3b8   : > { %550 = vadd.xlane.f32.xlu1 %v549_v55 }
 0x445   : > { %v551_v56 = vpop.xlane.xlu1 %550 }
 0x446   : > { %v552_v57 = vmul.f32 0.015625, %v551_v56 }
 0x448   : > { %v553_v58 = vadd.f32 1e-05, %v552_v57 }
 0x44a   : > { %773 = vrsqrt.f32 %v553_v58 }
 0x454   : > { %v774_v59 = vpop.eup %773 }
 0x455   : > { %v555_v61 = vmul.f32 %v774_v59, %v547_v53 }
 0x457   : > { %v562_v63 = vmul.f32 %v657_v60, %v555_v61 }
 0x459   : > { %v569_v0 = vadd.f32 %v658_v62, %v562_v63 }
 0x45b   : > { %570 = vst.msk [vmem:[%s323_s29] sm:$0xff] %vm344_vm1, %v569_v0 }
 0x45c   : > { %788 = shalt.err (!%p785_p3)
}
 0x45d   : > { %s789_s21 = scalar_lea.hbm %s1010_s22, 128  ;;  %s793_s29 = scalar_lea.hbm %s1062_s9, 256 }
 0x45e   : > { %p790_p4 = scmp.ne.s32.totalorder %s1010_s22, %s789_s21  ;;  %p794_p9 = scmp.lt.u32.totalorder %s1010_s22, %s1062_s9 }
 0x45f   : > { %p795_p10 = scmp.lt.u32.totalorder %s793_s29, %s789_s21  ;;  %p797_p12 = scmp.lt.u32.totalorder %s789_s21, %s1010_s22 }
 0x460   : > { %p791_p7 = pnand %p790_p4, %p931_p5 }
 0x461   : > { %p796_p11 = por %p795_p10, %p794_p9 }
 0x462   : > { %p792_p8 = pneg %p791_p7 }
 0x463   : > { %p798_p13 = por %p797_p12, %p796_p11 }
 0x465   : > { %p799_p0 = pnand %p798_p13, %p792_p8 }
 0x467   : > { %802 = shalt.err (!%p799_p0)
}
 0x468   : > { %725 = dma.vmem_to_hbm [thread:$0]  (%p931_p5), %s1012_s14, 128, %s1010_s22, %s572_s24  }
 0x469 PF: > { %p731_p1 = scmp.ge.s32.totalorder %s837_s12, 2  ;;  %s597_s25 = sand.u32 1, %s825_s30  }
 0x46a   : > { %s598_s13 = scalar_lea.sflag [#allocation3], %s597_s25 }
 0x46b   : > { %p728_p2 = pnand %p731_p1, %p935_p6 }
 0x46d   : > { %820 = dma.done.wait (!%p728_p2), %s598_s13, 128  }
 0x46e   : > { %822 = vsyncadd (!%p728_p2), %s598_s13, 4294967168  ;;  %p19_p3 = scmp.ge.s32.totalorder %s918_s15, 4   ;;  %s1065_s30 = smov %s829_s10 }
 0x46f   : > { %s1066_s10 = smov %s833_s11  ;;  %s1067_s11 = smov %s929_s18 }
 0x470   : > { %s1068_s12 = smov %s918_s15  ;;  %21 = sbr.rel (!%p19_p3) target bundleno = 3 (0x3), region = 91 }
 0x477   :  { %603 = vsyncpa [#allocation3], 1 }
 0x478   :  { %605 = vsyncpa [#allocation3 + $0x1], 1 }

</bundles_post_ra>
